<compile_context>
chip_gen: v7x
topology: tpu7x:2x2x1
jax: 0.10.0
libtpu: 0.0.40
codegen_flags: <defaults>
</compile_context>

<pallas_src>
import jax
import jax.numpy as jnp
from jax import lax
from jax.experimental import pallas as pl
from jax.experimental.pallas import tpu as pltpu


def _round_up(x, m):
    return (x + m - 1) // m * m


_VMEM_LIMIT = 48 * 1024 * 1024  # explicit scoped-VMEM budget (fits v5e/v6e/v7x)


# ----------------------------------------------------------------------------
# Kernel 1: fused 2-layer LSTM over the full sequence
# ----------------------------------------------------------------------------
def lstm2_fused_kernel(x_ref, wih0_ref, whh0_ref, b0_ref,
                       wih1_ref, whh1_ref, b1_ref,
                       out_ref,
                       gx_scr, hall_scr, h_scr, c_scr):
    """Fused 2-layer LSTM.

    x_ref:    (T, Bp, E)    time-major, batch padded to multiple of 8
    wih*_ref: (D_in, 4Hp)   transposed input->hidden weights, per-gate padded to Hp lanes
    whh*_ref: (Hp, 4Hp)     transposed hidden->hidden weights
    b*_ref:   (1, 4Hp)      b_ih + b_hh (f32)
    out_ref:  (T, Bp, Hp)   final-layer hidden states
    gx_scr:   (T, Bp, 4Hp)  hoisted input-gate pre-activations for the current layer
    hall_scr: (T, Bp, Hp)   layer-0 hidden states (stay in VMEM)
    h_scr, c_scr: (Bp, Hp)  recurrent state
    """
    T, Bp, E = x_ref.shape
    Hp = h_scr.shape[-1]
    cdt = wih0_ref.dtype                 # matmul input dtype (f32 or bf16)
    unroll = T if T <= 16 else 8

    # ---- layer 0: hoisted input->hidden projection for the whole sequence -----
    x2 = x_ref[...].reshape(T * Bp, E).astype(cdt)
    gx = jnp.dot(x2, wih0_ref[...], preferred_element_type=jnp.float32) + b0_ref[...]
    gx_scr[...] = gx.reshape(T, Bp, 4 * Hp)

    def recurrence(whh_ref, write_h):
        h_scr[...] = jnp.zeros_like(h_scr)
        c_scr[...] = jnp.zeros_like(c_scr)

        def step(t, carry):
            # only the small hidden->hidden matmul remains in the time loop
            gates = gx_scr[t] + jnp.dot(h_scr[...].astype(cdt), whh_ref[...],
                                        preferred_element_type=jnp.float32)
            i = jax.nn.sigmoid(gates[:, 0 * Hp:1 * Hp])   # lane-aligned gate slabs
            f = jax.nn.sigmoid(gates[:, 1 * Hp:2 * Hp])
            g = jnp.tanh(gates[:, 2 * Hp:3 * Hp])
            o = jax.nn.sigmoid(gates[:, 3 * Hp:4 * Hp])
            c = f * c_scr[...] + i * g
            h = o * jnp.tanh(c)
            c_scr[...] = c
            h_scr[...] = h
            write_h(t, h)
            return carry

        lax.fori_loop(0, T, step, 0, unroll=unroll)

    def write_layer0(t, h):
        hall_scr[t] = h

    def write_layer1(t, h):
        out_ref[t] = h

    recurrence(whh0_ref, write_layer0)

    # ---- layer 1: hoisted input->hidden projection from layer-0 hidden states --
    h2 = hall_scr[...].reshape(T * Bp, Hp).astype(cdt)
    gx = jnp.dot(h2, wih1_ref[...], preferred_element_type=jnp.float32) + b1_ref[...]
    gx_scr[...] = gx.reshape(T, Bp, 4 * Hp)

    recurrence(whh1_ref, write_layer1)


def lstm2_fused(x_tm, wih0, whh0, b0, wih1, whh1, b1):
    T, Bp, _ = x_tm.shape
    Hp = whh0.shape[0]
    return pl.pallas_call(
        lstm2_fused_kernel,
        out_shape=jax.ShapeDtypeStruct((T, Bp, Hp), jnp.float32),
        in_specs=[pl.BlockSpec(memory_space=pltpu.MemorySpace.VMEM)] * 7,
        out_specs=pl.BlockSpec(memory_space=pltpu.MemorySpace.VMEM),
        scratch_shapes=[
            pltpu.VMEM((T, Bp, 4 * Hp), jnp.float32),   # hoisted gates (current layer)
            pltpu.VMEM((T, Bp, Hp), jnp.float32),        # layer-0 hidden states
            pltpu.VMEM((Bp, Hp), jnp.float32),           # h
            pltpu.VMEM((Bp, Hp), jnp.float32),           # c
        ],
        compiler_params=pltpu.CompilerParams(vmem_limit_bytes=_VMEM_LIMIT),
    )(x_tm, wih0, whh0, b0, wih1, whh1, b1)


# ----------------------------------------------------------------------------
# Kernel 2: tiled output projection  out = x @ w + b
# ----------------------------------------------------------------------------
def matmul_bias_kernel(x_ref, w_ref, b_ref, o_ref, acc_ref):
    @pl.when(pl.program_id(2) == 0)
    def _():
        acc_ref[...] = jnp.zeros_like(acc_ref)

    acc_ref[...] += jnp.dot(x_ref[...].astype(w_ref.dtype), w_ref[...],
                            preferred_element_type=jnp.float32)

    @pl.when(pl.program_id(2) == pl.num_programs(2) - 1)
    def _():
        o_ref[...] = (acc_ref[...] + b_ref[...]).astype(o_ref.dtype)


def linear_tiled(x, w, b):
    """x: (N, Hp) f32, w: (Hp, Vp), b: (1, Vp) f32  ->  (N, Vp) f32.

    N % 8 == 0, Hp % 128 == 0, Vp % 128 == 0 (caller guarantees via padding).
    """
    N, Hp = x.shape
    Vp = w.shape[1]
    assert N % 8 == 0 and Hp % 128 == 0 and Vp % 128 == 0

    tn = 256 if N >= 256 else N
    Np = _round_up(N, tn)
    if Np != N:
        x = jnp.pad(x, ((0, Np - N), (0, 0)))
    tv = 256 if Vp % 256 == 0 else 128
    tk = next(c for c in (512, 256, 128) if Hp % c == 0)

    grid = (Np // tn, Vp // tv, Hp // tk)
    out = pl.pallas_call(
        matmul_bias_kernel,
        out_shape=jax.ShapeDtypeStruct((Np, Vp), jnp.float32),
        grid=grid,
        in_specs=[
            pl.BlockSpec((tn, tk), lambda i, j, k: (i, k)),
            pl.BlockSpec((tk, tv), lambda i, j, k: (k, j)),
            pl.BlockSpec((1, tv), lambda i, j, k: (0, j)),
        ],
        out_specs=pl.BlockSpec((tn, tv), lambda i, j, k: (i, j)),
        scratch_shapes=[pltpu.VMEM((tn, tv), jnp.float32)],
        compiler_params=pltpu.CompilerParams(
            dimension_semantics=("parallel", "parallel", "arbitrary"),
            vmem_limit_bytes=_VMEM_LIMIT),
    )(x, w, b)
    return out[:N] if Np != N else out


# ----------------------------------------------------------------------------
# Weight padding helpers (sublane/lane alignment; zero padding keeps math exact)
# ----------------------------------------------------------------------------
def _pad_gate_cols(w, H, Hp):
    """(..., 4*H) -> (..., 4*Hp), per-gate zero padding (PyTorch gate order i,f,g,o)."""
    lead = w.shape[:-1]
    w = w.reshape(lead + (4, H))
    w = jnp.pad(w, [(0, 0)] * len(lead) + [(0, 0), (0, Hp - H)])
    return w.reshape(lead + (4 * Hp,))


def _pad_lstm_layer(layer, H, Hp, input_is_hidden, dtype):
    wih_t, whh_t, b = layer                       # (D_in,4H), (H,4H), (1,4H)
    wih = _pad_gate_cols(wih_t, H, Hp)
    if input_is_hidden:                           # layers >= 1 take the hidden state
        wih = jnp.pad(wih, ((0, Hp - H), (0, 0)))
    whh = jnp.pad(_pad_gate_cols(whh_t, H, Hp), ((0, Hp - H), (0, 0)))
    bias = _pad_gate_cols(b, H, Hp)
    return wih.astype(dtype), whh.astype(dtype), bias.astype(jnp.float32)


# ----------------------------------------------------------------------------
# ELMo forward (mirrors ELMoModel.forward)
# ----------------------------------------------------------------------------
def elmo_forward(params, x_ids, direction="forward", matmul_dtype=jnp.float32):
    if direction == "forward":
        lstm_stack = params["lstm_forward"]
        out_w_t, out_b = params["out_forward"]
        ids = x_ids
    else:
        lstm_stack = params["lstm_backward"]
        out_w_t, out_b = params["out_backward"]
        ids = jnp.flip(x_ids, axis=1)             # torch.flip(x, [1]); spec does not re-flip outputs

    assert len(lstm_stack) == 2, "fused kernel is specialized for num_layers=2"

    emb_tab = params["embedding"]
    B, T = ids.shape
    H = lstm_stack[0][1].shape[0]                 # whh_t: (H, 4H)
    V = out_w_t.shape[1]

    Bp = _round_up(B, 8)                          # sublane alignment
    Hp = _round_up(H, 128)                        # lane alignment per gate slab
    Vp = _round_up(V, 128)                        # lane-dense projection output

    # Embedding gather directly in time-major layout (gather on transposed ids avoids
    # transposing the (B,T,E) activation tensor).  Gather itself stays in plain JAX.
    emb_tm = emb_tab[ids.swapaxes(0, 1)]          # (T, B, E)
    emb_tm = jnp.pad(emb_tm, ((0, 0), (0, Bp - B), (0, 0)))   # (T, Bp, E)

    wih0, whh0, b0 = _pad_lstm_layer(lstm_stack[0], H, Hp, False, matmul_dtype)
    wih1, whh1, b1 = _pad_lstm_layer(lstm_stack[1], H, Hp, True, matmul_dtype)

    h = lstm2_fused(emb_tm, wih0, whh0, b0, wih1, whh1, b1)   # (T, Bp, Hp) f32

    w_out = jnp.pad(out_w_t, ((0, Hp - H), (0, Vp - V))).astype(matmul_dtype)
    b_out = jnp.pad(out_b, ((0, 0), (0, Vp - V)))             # (1, Vp) f32

    logits = linear_tiled(h.reshape(T * Bp, Hp), w_out, b_out)  # (T*Bp, Vp)
    logits = logits.reshape(T, Bp, Vp)
    return jnp.transpose(logits, (1, 0, 2))[:B, :, :V]          # (B, T, V)


# ----------------------------------------------------------------------------
# Deterministic parameter construction (shapes match nn.Embedding / nn.LSTM / nn.Linear)
# ----------------------------------------------------------------------------
def init_params(key, vocab_size, embedding_dim, hidden_dim, num_layers=2):
    def nrm(k, shape, scale=0.1):
        return (scale * jax.random.normal(k, shape)).astype(jnp.float32)

    keys = iter(jax.random.split(key, 64))
    params = {"embedding": nrm(next(keys), (vocab_size, embedding_dim))}

    def make_lstm_stack():
        stack = []
        for layer in range(num_layers):
            d_in = embedding_dim if layer == 0 else hidden_dim
            w_ih = nrm(next(keys), (4 * hidden_dim, d_in))     # PyTorch weight_ih_l{k}
            w_hh = nrm(next(keys), (4 * hidden_dim, hidden_dim))
            b_ih = nrm(next(keys), (4 * hidden_dim,))
            b_hh = nrm(next(keys), (4 * hidden_dim,))
            stack.append((w_ih.T, w_hh.T, (b_ih + b_hh).reshape(1, 4 * hidden_dim)))
        return stack

    params["lstm_forward"] = make_lstm_stack()
    params["lstm_backward"] = make_lstm_stack()

    def make_out():
        w = nrm(next(keys), (vocab_size, hidden_dim))          # nn.Linear weight
        b = nrm(next(keys), (vocab_size,))
        return (w.T, b.reshape(1, vocab_size))

    params["out_forward"] = make_out()
    params["out_backward"] = make_out()
    return params


# ----------------------------------------------------------------------------
# Pure-JAX reference (sanity check)
# ----------------------------------------------------------------------------
def lstm_layer_ref(x_tm, wih_t, whh_t, b):
    T, B, _ = x_tm.shape
    H = whh_t.shape[0]

    def step(carry, x_t):
        h, c = carry
        gates = x_t @ wih_t + h @ whh_t + b
        i = jax.nn.sigmoid(gates[:, :H])
        f = jax.nn.sigmoid(gates[:, H:2 * H])
        g = jnp.tanh(gates[:, 2 * H:3 * H])
        o = jax.nn.sigmoid(gates[:, 3 * H:])
        c = f * c + i * g
        h = o * jnp.tanh(c)
        return (h, c), h

    init = (jnp.zeros((B, H), jnp.float32), jnp.zeros((B, H), jnp.float32))
    _, hs = lax.scan(step, init, x_tm)
    return hs


def elmo_forward_ref(params, x_ids, direction="forward"):
    if direction == "forward":
        lstm_stack = params["lstm_forward"]
        out_w_t, out_b = params["out_forward"]
        ids = x_ids
    else:
        lstm_stack = params["lstm_backward"]
        out_w_t, out_b = params["out_backward"]
        ids = jnp.flip(x_ids, axis=1)
    emb = params["embedding"][ids]
    h = jnp.transpose(emb, (1, 0, 2))
    for (wih_t, whh_t, b) in lstm_stack:
        h = lstm_layer_ref(h, wih_t, whh_t, b)
    logits = h @ out_w_t + out_b                     # (T, B, V)
    return jnp.transpose(logits, (1, 0, 2))


# ----------------------------------------------------------------------------
if __name__ == "__main__":
    vocab_size, embedding_dim, hidden_dim, num_layers = 16, 32, 32, 2
    batch, seq = 2, 8

    key = jax.random.PRNGKey(0)
    k_params, k_ids = jax.random.split(key)
    params = init_params(k_params, vocab_size, embedding_dim, hidden_dim, num_layers)
    x_ids = jax.random.randint(k_ids, (batch, seq), 0, vocab_size, dtype=jnp.int32)

    fwd = jax.jit(elmo_forward, static_argnames=("direction", "matmul_dtype"))

    out_fwd = jax.block_until_ready(fwd(params, x_ids, direction="forward"))
    out_bwd = jax.block_until_ready(fwd(params, x_ids, direction="backward"))

    ref_fwd = elmo_forward_ref(params, x_ids, direction="forward")
    ref_bwd = elmo_forward_ref(params, x_ids, direction="backward")

    assert out_fwd.shape == (batch, seq, vocab_size)
    assert out_bwd.shape == (batch, seq, vocab_size)
    assert jnp.allclose(out_fwd, ref_fwd, atol=2e-3, rtol=2e-3)
    assert jnp.allclose(out_bwd, ref_bwd, atol=2e-3, rtol=2e-3)

    # bf16 matmul-input fast path (v6e/v7x MXU); f32 gate math + f32 accumulation.
    out_bf16 = jax.block_until_ready(
        fwd(params, x_ids, direction="forward", matmul_dtype=jnp.bfloat16))
    assert out_bf16.shape == (batch, seq, vocab_size)
    assert jnp.allclose(out_bf16, ref_fwd, atol=2e-2, rtol=2e-2)

    print("KERNEL_OK")
</pallas_src>

<mosaic_0001>
module attributes {stable_mosaic.version = 11 : i64} {
  func.func @matmul_bias_kernel(%arg0: i32, %arg1: i32, %arg2: i32, %arg3: memref<64x128xf32, #tpu.memory_space<vmem>>, %arg4: memref<128x128xf32, #tpu.memory_space<vmem>>, %arg5: memref<1x128xf32, #tpu.memory_space<vmem>>, %arg6: memref<64x128xf32, #tpu.memory_space<vmem>>, %arg7: memref<64x128xf32, #tpu.memory_space<vmem>>) attributes {dimension_semantics = [#tpu.dimension_semantics<parallel>, #tpu.dimension_semantics<parallel>, #tpu.dimension_semantics<arbitrary>], iteration_bounds = array<i64: 1, 1, 1>, scalar_prefetch = 0 : i64, scratch_operands = 1 : i64, tpu.core_type = #tpu.core_type<tc>, window_params = [{transform_indices = @transform_0, window_bounds = array<i64: 64, 128>}, {transform_indices = @transform_1, window_bounds = array<i64: 128, 128>}, {transform_indices = @transform_2, window_bounds = array<i64: 1, 128>}, {transform_indices = @transform_3, window_bounds = array<i64: 64, 128>}]} {
    %c0_i32 = arith.constant 0 : i32
    %0 = arith.cmpi eq, %arg2, %c0_i32 : i32
    %1 = arith.extui %0 : i1 to i32
    %c0_i32_0 = arith.constant 0 : i32
    %2 = arith.cmpi ne, %1, %c0_i32_0 : i32
    scf.if %2 {
      %cst_10 = arith.constant 0.000000e+00 : f32
      %12 = vector.broadcast %cst_10 : f32 to vector<64x128xf32>
      %c0_11 = arith.constant 0 : index
      %c0_12 = arith.constant 0 : index
      %13 = vector.load %arg7[%c0_11, %c0_12] : memref<64x128xf32, #tpu.memory_space<vmem>>, vector<64x128xf32>
      tpu.vector_store %arg7[%c0_11, %c0_12], %12 {strides = array<i32>} : memref<64x128xf32, #tpu.memory_space<vmem>>, vector<64x128xf32>,
    } else {
    }
    %c0 = arith.constant 0 : index
    %c0_1 = arith.constant 0 : index
    %3 = vector.load %arg7[%c0, %c0_1] : memref<64x128xf32, #tpu.memory_space<vmem>>, vector<64x128xf32>
    %c0_2 = arith.constant 0 : index
    %c0_3 = arith.constant 0 : index
    %4 = vector.load %arg3[%c0_2, %c0_3] : memref<64x128xf32, #tpu.memory_space<vmem>>, vector<64x128xf32>
    %c0_4 = arith.constant 0 : index
    %c0_5 = arith.constant 0 : index
    %5 = vector.load %arg4[%c0_4, %c0_5] : memref<128x128xf32, #tpu.memory_space<vmem>>, vector<128x128xf32>
    %cst = arith.constant dense<0.000000e+00> : vector<64x128xf32>
    %6 = tpu.matmul %4, %5, %cst {dimension_numbers = #tpu.dot_dimension_numbers<[1], [0], [0], [1], [0, 0, 1, 1], [], []>} : vector<64x128xf32>, vector<128x128xf32>, vector<64x128xf32> -> vector<64x128xf32>
    %7 = arith.addf %3, %6 : vector<64x128xf32>
    %c0_6 = arith.constant 0 : index
    %c0_7 = arith.constant 0 : index
    %8 = vector.load %arg7[%c0_6, %c0_7] : memref<64x128xf32, #tpu.memory_space<vmem>>, vector<64x128xf32>
    tpu.vector_store %arg7[%c0_6, %c0_7], %7 {strides = array<i32>} : memref<64x128xf32, #tpu.memory_space<vmem>>, vector<64x128xf32>,
    %c0_i32_8 = arith.constant 0 : i32
    %9 = arith.cmpi eq, %arg2, %c0_i32_8 : i32
    %10 = arith.extui %9 : i1 to i32
    %c0_i32_9 = arith.constant 0 : i32
    %11 = arith.cmpi ne, %10, %c0_i32_9 : i32
    scf.if %11 {
      %c0_10 = arith.constant 0 : index
      %c0_11 = arith.constant 0 : index
      %12 = vector.load %arg7[%c0_10, %c0_11] : memref<64x128xf32, #tpu.memory_space<vmem>>, vector<64x128xf32>
      %c0_12 = arith.constant 0 : index
      %c0_13 = arith.constant 0 : index
      %13 = vector.load %arg5[%c0_12, %c0_13] : memref<1x128xf32, #tpu.memory_space<vmem>>, vector<1x128xf32>
      %14 = vector.broadcast %13 : vector<1x128xf32> to vector<64x128xf32>
      %15 = arith.addf %12, %14 : vector<64x128xf32>
      %c0_14 = arith.constant 0 : index
      %c0_15 = arith.constant 0 : index
      %16 = vector.load %arg6[%c0_14, %c0_15] : memref<64x128xf32, #tpu.memory_space<vmem>>, vector<64x128xf32>
      tpu.vector_store %arg6[%c0_14, %c0_15], %15 {strides = array<i32>} : memref<64x128xf32, #tpu.memory_space<vmem>>, vector<64x128xf32>,
    } else {
    }
    return
  }
  func.func @transform_0(%arg0: i32, %arg1: i32, %arg2: i32) -> (i32, i32) {
    %c0_i32 = arith.constant 0 : i32
    return %arg0, %arg2 : i32, i32
  }
  func.func @transform_1(%arg0: i32, %arg1: i32, %arg2: i32) -> (i32, i32) {
    %c0_i32 = arith.constant 0 : i32
    return %arg2, %arg1 : i32, i32
  }
  func.func @transform_2(%arg0: i32, %arg1: i32, %arg2: i32) -> (i32, i32) {
    %c0_i32 = arith.constant 0 : i32
    %c0_i32_0 = arith.constant 0 : i32
    return %c0_i32, %arg1 : i32, i32
  }
  func.func @transform_3(%arg0: i32, %arg1: i32, %arg2: i32) -> (i32, i32) {
    %c0_i32 = arith.constant 0 : i32
    return %arg0, %arg1 : i32, i32
  }
}

module attributes {stable_mosaic.version = 11 : i64} {
  func.func @lstm2_fused_kernel(%arg0: memref<8x8x32xf32, #tpu.memory_space<vmem>>, %arg1: memref<32x512xf32, #tpu.memory_space<vmem>>, %arg2: memref<128x512xf32, #tpu.memory_space<vmem>>, %arg3: memref<1x512xf32, #tpu.memory_space<vmem>>, %arg4: memref<128x512xf32, #tpu.memory_space<vmem>>, %arg5: memref<128x512xf32, #tpu.memory_space<vmem>>, %arg6: memref<1x512xf32, #tpu.memory_space<vmem>>, %arg7: memref<8x8x128xf32, #tpu.memory_space<vmem>>, %arg8: memref<8x8x512xf32, #tpu.memory_space<vmem>>, %arg9: memref<8x8x128xf32, #tpu.memory_space<vmem>>, %arg10: memref<8x128xf32, #tpu.memory_space<vmem>>, %arg11: memref<8x128xf32, #tpu.memory_space<vmem>>) attributes {dimension_semantics = [], scalar_prefetch = 0 : i64, scratch_operands = 4 : i64, tpu.core_type = #tpu.core_type<tc>} {
    %c0 = arith.constant 0 : index
    %c0_0 = arith.constant 0 : index
    %c0_1 = arith.constant 0 : index
    %0 = vector.load %arg0[%c0, %c0_0, %c0_1] : memref<8x8x32xf32, #tpu.memory_space<vmem>>, vector<8x8x32xf32>
    %1 = vector.shape_cast %0 : vector<8x8x32xf32> to vector<64x32xf32>
    %c0_2 = arith.constant 0 : index
    %c0_3 = arith.constant 0 : index
    %2 = vector.load %arg1[%c0_2, %c0_3] : memref<32x512xf32, #tpu.memory_space<vmem>>, vector<32x512xf32>
    %cst = arith.constant dense<0.000000e+00> : vector<64x512xf32>
    %3 = tpu.matmul %1, %2, %cst {dimension_numbers = #tpu.dot_dimension_numbers<[1], [0], [0], [1], [0, 0, 1, 1], [], []>} : vector<64x32xf32>, vector<32x512xf32>, vector<64x512xf32> -> vector<64x512xf32>
    %c0_4 = arith.constant 0 : index
    %c0_5 = arith.constant 0 : index
    %4 = vector.load %arg3[%c0_4, %c0_5] : memref<1x512xf32, #tpu.memory_space<vmem>>, vector<1x512xf32>
    %5 = vector.broadcast %4 : vector<1x512xf32> to vector<64x512xf32>
    %6 = arith.addf %3, %5 : vector<64x512xf32>
    %7 = vector.shape_cast %6 : vector<64x512xf32> to vector<8x8x512xf32>
    %c0_6 = arith.constant 0 : index
    %c0_7 = arith.constant 0 : index
    %c0_8 = arith.constant 0 : index
    %8 = vector.load %arg8[%c0_6, %c0_7, %c0_8] : memref<8x8x512xf32, #tpu.memory_space<vmem>>, vector<8x8x512xf32>
    tpu.vector_store %arg8[%c0_6, %c0_7, %c0_8], %7 {strides = array<i32>} : memref<8x8x512xf32, #tpu.memory_space<vmem>>, vector<8x8x512xf32>,
    %cst_9 = arith.constant 0.000000e+00 : f32
    %9 = vector.broadcast %cst_9 : f32 to vector<8x128xf32>
    %c0_10 = arith.constant 0 : index
    %c0_11 = arith.constant 0 : index
    %10 = vector.load %arg10[%c0_10, %c0_11] : memref<8x128xf32, #tpu.memory_space<vmem>>, vector<8x128xf32>
    tpu.vector_store %arg10[%c0_10, %c0_11], %9 {strides = array<i32>} : memref<8x128xf32, #tpu.memory_space<vmem>>, vector<8x128xf32>,
    %cst_12 = arith.constant 0.000000e+00 : f32
    %11 = vector.broadcast %cst_12 : f32 to vector<8x128xf32>
    %c0_13 = arith.constant 0 : index
    %c0_14 = arith.constant 0 : index
    %12 = vector.load %arg11[%c0_13, %c0_14] : memref<8x128xf32, #tpu.memory_space<vmem>>, vector<8x128xf32>
    tpu.vector_store %arg11[%c0_13, %c0_14], %11 {strides = array<i32>} : memref<8x128xf32, #tpu.memory_space<vmem>>, vector<8x128xf32>,
    %c0_i32 = arith.constant 0 : i32
    %13 = arith.index_cast %c0_i32 : i32 to index
    %c0_15 = arith.constant 0 : index
    %c0_16 = arith.constant 0 : index
    %14 = vector.load %arg8[%13, %c0_15, %c0_16] : memref<8x8x512xf32, #tpu.memory_space<vmem>>, vector<1x8x512xf32>
    %15 = vector.shape_cast %14 : vector<1x8x512xf32> to vector<8x512xf32>
    %c0_17 = arith.constant 0 : index
    %c0_18 = arith.constant 0 : index
    %16 = vector.load %arg10[%c0_17, %c0_18] : memref<8x128xf32, #tpu.memory_space<vmem>>, vector<8x128xf32>
    %c0_19 = arith.constant 0 : index
    %c0_20 = arith.constant 0 : index
    %17 = vector.load %arg2[%c0_19, %c0_20] : memref<128x512xf32, #tpu.memory_space<vmem>>, vector<128x512xf32>
    %cst_21 = arith.constant dense<0.000000e+00> : vector<8x512xf32>
    %18 = tpu.matmul %16, %17, %cst_21 {dimension_numbers = #tpu.dot_dimension_numbers<[1], [0], [0], [1], [0, 0, 1, 1], [], []>} : vector<8x128xf32>, vector<128x512xf32>, vector<8x512xf32> -> vector<8x512xf32>
    %19 = arith.addf %15, %18 : vector<8x512xf32>
    %20 = vector.extract_strided_slice %19 {offsets = [0, 0], sizes = [8, 128], strides = [1, 1]} : vector<8x512xf32> to vector<8x128xf32>
    %21 = arith.negf %20 : vector<8x128xf32>
    %22 = math.exp %21 : vector<8x128xf32>
    %cst_22 = arith.constant 1.000000e+00 : f32
    %23 = vector.broadcast %cst_22 : f32 to vector<8x128xf32>
    %24 = arith.addf %23, %22 : vector<8x128xf32>
    %25 = arith.divf %23, %24 : vector<8x128xf32>
    %26 = vector.extract_strided_slice %19 {offsets = [0, 128], sizes = [8, 128], strides = [1, 1]} : vector<8x512xf32> to vector<8x128xf32>
    %27 = arith.negf %26 : vector<8x128xf32>
    %28 = math.exp %27 : vector<8x128xf32>
    %cst_23 = arith.constant 1.000000e+00 : f32
    %29 = vector.broadcast %cst_23 : f32 to vector<8x128xf32>
    %30 = arith.addf %29, %28 : vector<8x128xf32>
    %31 = arith.divf %29, %30 : vector<8x128xf32>
    %32 = vector.extract_strided_slice %19 {offsets = [0, 256], sizes = [8, 128], strides = [1, 1]} : vector<8x512xf32> to vector<8x128xf32>
    %33 = math.tanh %32 : vector<8x128xf32>
    %34 = vector.extract_strided_slice %19 {offsets = [0, 384], sizes = [8, 128], strides = [1, 1]} : vector<8x512xf32> to vector<8x128xf32>
    %35 = arith.negf %34 : vector<8x128xf32>
    %36 = math.exp %35 : vector<8x128xf32>
    %cst_24 = arith.constant 1.000000e+00 : f32
    %37 = vector.broadcast %cst_24 : f32 to vector<8x128xf32>
    %38 = arith.addf %37, %36 : vector<8x128xf32>
    %39 = arith.divf %37, %38 : vector<8x128xf32>
    %c0_25 = arith.constant 0 : index
    %c0_26 = arith.constant 0 : index
    %40 = vector.load %arg11[%c0_25, %c0_26] : memref<8x128xf32, #tpu.memory_space<vmem>>, vector<8x128xf32>
    %41 = arith.mulf %31, %40 : vector<8x128xf32>
    %42 = arith.mulf %25, %33 : vector<8x128xf32>
    %43 = arith.addf %41, %42 : vector<8x128xf32>
    %44 = math.tanh %43 : vector<8x128xf32>
    %45 = arith.mulf %39, %44 : vector<8x128xf32>
    %c0_27 = arith.constant 0 : index
    %c0_28 = arith.constant 0 : index
    %46 = vector.load %arg11[%c0_27, %c0_28] : memref<8x128xf32, #tpu.memory_space<vmem>>, vector<8x128xf32>
    tpu.vector_store %arg11[%c0_27, %c0_28], %43 {strides = array<i32>} : memref<8x128xf32, #tpu.memory_space<vmem>>, vector<8x128xf32>,
    %c0_29 = arith.constant 0 : index
    %c0_30 = arith.constant 0 : index
    %47 = vector.load %arg10[%c0_29, %c0_30] : memref<8x128xf32, #tpu.memory_space<vmem>>, vector<8x128xf32>
    tpu.vector_store %arg10[%c0_29, %c0_30], %45 {strides = array<i32>} : memref<8x128xf32, #tpu.memory_space<vmem>>, vector<8x128xf32>,
    %48 = arith.index_cast %c0_i32 : i32 to index
    %c0_31 = arith.constant 0 : index
    %c0_32 = arith.constant 0 : index
    %49 = vector.load %arg9[%48, %c0_31, %c0_32] : memref<8x8x128xf32, #tpu.memory_space<vmem>>, vector<1x8x128xf32>
    %50 = vector.shape_cast %49 : vector<1x8x128xf32> to vector<8x128xf32>
    %51 = vector.shape_cast %45 : vector<8x128xf32> to vector<1x8x128xf32>
    tpu.vector_store %arg9[%48, %c0_31, %c0_32], %51 {strides = array<i32>} : memref<8x8x128xf32, #tpu.memory_space<vmem>>, vector<1x8x128xf32>,
    %c1_i32 = arith.constant 1 : i32
    %52 = arith.index_cast %c1_i32 : i32 to index
    %c0_33 = arith.constant 0 : index
    %c0_34 = arith.constant 0 : index
    %53 = vector.load %arg8[%52, %c0_33, %c0_34] : memref<8x8x512xf32, #tpu.memory_space<vmem>>, vector<1x8x512xf32>
    %54 = vector.shape_cast %53 : vector<1x8x512xf32> to vector<8x512xf32>
    %c0_35 = arith.constant 0 : index
    %c0_36 = arith.constant 0 : index
    %55 = vector.load %arg10[%c0_35, %c0_36] : memref<8x128xf32, #tpu.memory_space<vmem>>, vector<8x128xf32>
    %c0_37 = arith.constant 0 : index
    %c0_38 = arith.constant 0 : index
    %56 = vector.load %arg2[%c0_37, %c0_38] : memref<128x512xf32, #tpu.memory_space<vmem>>, vector<128x512xf32>
    %cst_39 = arith.constant dense<0.000000e+00> : vector<8x512xf32>
    %57 = tpu.matmul %55, %56, %cst_39 {dimension_numbers = #tpu.dot_dimension_numbers<[1], [0], [0], [1], [0, 0, 1, 1], [], []>} : vector<8x128xf32>, vector<128x512xf32>, vector<8x512xf32> -> vector<8x512xf32>
    %58 = arith.addf %54, %57 : vector<8x512xf32>
    %59 = vector.extract_strided_slice %58 {offsets = [0, 0], sizes = [8, 128], strides = [1, 1]} : vector<8x512xf32> to vector<8x128xf32>
    %60 = arith.negf %59 : vector<8x128xf32>
    %61 = math.exp %60 : vector<8x128xf32>
    %cst_40 = arith.constant 1.000000e+00 : f32
    %62 = vector.broadcast %cst_40 : f32 to vector<8x128xf32>
    %63 = arith.addf %62, %61 : vector<8x128xf32>
    %64 = arith.divf %62, %63 : vector<8x128xf32>
    %65 = vector.extract_strided_slice %58 {offsets = [0, 128], sizes = [8, 128], strides = [1, 1]} : vector<8x512xf32> to vector<8x128xf32>
    %66 = arith.negf %65 : vector<8x128xf32>
    %67 = math.exp %66 : vector<8x128xf32>
    %cst_41 = arith.constant 1.000000e+00 : f32
    %68 = vector.broadcast %cst_41 : f32 to vector<8x128xf32>
    %69 = arith.addf %68, %67 : vector<8x128xf32>
    %70 = arith.divf %68, %69 : vector<8x128xf32>
    %71 = vector.extract_strided_slice %58 {offsets = [0, 256], sizes = [8, 128], strides = [1, 1]} : vector<8x512xf32> to vector<8x128xf32>
    %72 = math.tanh %71 : vector<8x128xf32>
    %73 = vector.extract_strided_slice %58 {offsets = [0, 384], sizes = [8, 128], strides = [1, 1]} : vector<8x512xf32> to vector<8x128xf32>
    %74 = arith.negf %73 : vector<8x128xf32>
    %75 = math.exp %74 : vector<8x128xf32>
    %cst_42 = arith.constant 1.000000e+00 : f32
    %76 = vector.broadcast %cst_42 : f32 to vector<8x128xf32>
    %77 = arith.addf %76, %75 : vector<8x128xf32>
    %78 = arith.divf %76, %77 : vector<8x128xf32>
    %c0_43 = arith.constant 0 : index
    %c0_44 = arith.constant 0 : index
    %79 = vector.load %arg11[%c0_43, %c0_44] : memref<8x128xf32, #tpu.memory_space<vmem>>, vector<8x128xf32>
    %80 = arith.mulf %70, %79 : vector<8x128xf32>
    %81 = arith.mulf %64, %72 : vector<8x128xf32>
    %82 = arith.addf %80, %81 : vector<8x128xf32>
    %83 = math.tanh %82 : vector<8x128xf32>
    %84 = arith.mulf %78, %83 : vector<8x128xf32>
    %c0_45 = arith.constant 0 : index
    %c0_46 = arith.constant 0 : index
    %85 = vector.load %arg11[%c0_45, %c0_46] : memref<8x128xf32, #tpu.memory_space<vmem>>, vector<8x128xf32>
    tpu.vector_store %arg11[%c0_45, %c0_46], %82 {strides = array<i32>} : memref<8x128xf32, #tpu.memory_space<vmem>>, vector<8x128xf32>,
    %c0_47 = arith.constant 0 : index
    %c0_48 = arith.constant 0 : index
    %86 = vector.load %arg10[%c0_47, %c0_48] : memref<8x128xf32, #tpu.memory_space<vmem>>, vector<8x128xf32>
    tpu.vector_store %arg10[%c0_47, %c0_48], %84 {strides = array<i32>} : memref<8x128xf32, #tpu.memory_space<vmem>>, vector<8x128xf32>,
    %87 = arith.index_cast %c1_i32 : i32 to index
    %c0_49 = arith.constant 0 : index
    %c0_50 = arith.constant 0 : index
    %88 = vector.load %arg9[%87, %c0_49, %c0_50] : memref<8x8x128xf32, #tpu.memory_space<vmem>>, vector<1x8x128xf32>
    %89 = vector.shape_cast %88 : vector<1x8x128xf32> to vector<8x128xf32>
    %90 = vector.shape_cast %84 : vector<8x128xf32> to vector<1x8x128xf32>
    tpu.vector_store %arg9[%87, %c0_49, %c0_50], %90 {strides = array<i32>} : memref<8x8x128xf32, #tpu.memory_space<vmem>>, vector<1x8x128xf32>,
    %c2_i32 = arith.constant 2 : i32
    %91 = arith.index_cast %c2_i32 : i32 to index
    %c0_51 = arith.constant 0 : index
    %c0_52 = arith.constant 0 : index
    %92 = vector.load %arg8[%91, %c0_51, %c0_52] : memref<8x8x512xf32, #tpu.memory_space<vmem>>, vector<1x8x512xf32>
    %93 = vector.shape_cast %92 : vector<1x8x512xf32> to vector<8x512xf32>
    %c0_53 = arith.constant 0 : index
    %c0_54 = arith.constant 0 : index
    %94 = vector.load %arg10[%c0_53, %c0_54] : memref<8x128xf32, #tpu.memory_space<vmem>>, vector<8x128xf32>
    %c0_55 = arith.constant 0 : index
    %c0_56 = arith.constant 0 : index
    %95 = vector.load %arg2[%c0_55, %c0_56] : memref<128x512xf32, #tpu.memory_space<vmem>>, vector<128x512xf32>
    %cst_57 = arith.constant dense<0.000000e+00> : vector<8x512xf32>
    %96 = tpu.matmul %94, %95, %cst_57 {dimension_numbers = #tpu.dot_dimension_numbers<[1], [0], [0], [1], [0, 0, 1, 1], [], []>} : vector<8x128xf32>, vector<128x512xf32>, vector<8x512xf32> -> vector<8x512xf32>
    %97 = arith.addf %93, %96 : vector<8x512xf32>
    %98 = vector.extract_strided_slice %97 {offsets = [0, 0], sizes = [8, 128], strides = [1, 1]} : vector<8x512xf32> to vector<8x128xf32>
    %99 = arith.negf %98 : vector<8x128xf32>
    %100 = math.exp %99 : vector<8x128xf32>
    %cst_58 = arith.constant 1.000000e+00 : f32
    %101 = vector.broadcast %cst_58 : f32 to vector<8x128xf32>
    %102 = arith.addf %101, %100 : vector<8x128xf32>
    %103 = arith.divf %101, %102 : vector<8x128xf32>
    %104 = vector.extract_strided_slice %97 {offsets = [0, 128], sizes = [8, 128], strides = [1, 1]} : vector<8x512xf32> to vector<8x128xf32>
    %105 = arith.negf %104 : vector<8x128xf32>
    %106 = math.exp %105 : vector<8x128xf32>
    %cst_59 = arith.constant 1.000000e+00 : f32
    %107 = vector.broadcast %cst_59 : f32 to vector<8x128xf32>
    %108 = arith.addf %107, %106 : vector<8x128xf32>
    %109 = arith.divf %107, %108 : vector<8x128xf32>
    %110 = vector.extract_strided_slice %97 {offsets = [0, 256], sizes = [8, 128], strides = [1, 1]} : vector<8x512xf32> to vector<8x128xf32>
    %111 = math.tanh %110 : vector<8x128xf32>
    %112 = vector.extract_strided_slice %97 {offsets = [0, 384], sizes = [8, 128], strides = [1, 1]} : vector<8x512xf32> to vector<8x128xf32>
    %113 = arith.negf %112 : vector<8x128xf32>
    %114 = math.exp %113 : vector<8x128xf32>
    %cst_60 = arith.constant 1.000000e+00 : f32
    %115 = vector.broadcast %cst_60 : f32 to vector<8x128xf32>
    %116 = arith.addf %115, %114 : vector<8x128xf32>
    %117 = arith.divf %115, %116 : vector<8x128xf32>
    %c0_61 = arith.constant 0 : index
    %c0_62 = arith.constant 0 : index
    %118 = vector.load %arg11[%c0_61, %c0_62] : memref<8x128xf32, #tpu.memory_space<vmem>>, vector<8x128xf32>
    %119 = arith.mulf %109, %118 : vector<8x128xf32>
    %120 = arith.mulf %103, %111 : vector<8x128xf32>
    %121 = arith.addf %119, %120 : vector<8x128xf32>
    %122 = math.tanh %121 : vector<8x128xf32>
    %123 = arith.mulf %117, %122 : vector<8x128xf32>
    %c0_63 = arith.constant 0 : index
    %c0_64 = arith.constant 0 : index
    %124 = vector.load %arg11[%c0_63, %c0_64] : memref<8x128xf32, #tpu.memory_space<vmem>>, vector<8x128xf32>
    tpu.vector_store %arg11[%c0_63, %c0_64], %121 {strides = array<i32>} : memref<8x128xf32, #tpu.memory_space<vmem>>, vector<8x128xf32>,
    %c0_65 = arith.constant 0 : index
    %c0_66 = arith.constant 0 : index
    %125 = vector.load %arg10[%c0_65, %c0_66] : memref<8x128xf32, #tpu.memory_space<vmem>>, vector<8x128xf32>
    tpu.vector_store %arg10[%c0_65, %c0_66], %123 {strides = array<i32>} : memref<8x128xf32, #tpu.memory_space<vmem>>, vector<8x128xf32>,
    %126 = arith.index_cast %c2_i32 : i32 to index
    %c0_67 = arith.constant 0 : index
    %c0_68 = arith.constant 0 : index
    %127 = vector.load %arg9[%126, %c0_67, %c0_68] : memref<8x8x128xf32, #tpu.memory_space<vmem>>, vector<1x8x128xf32>
    %128 = vector.shape_cast %127 : vector<1x8x128xf32> to vector<8x128xf32>
    %129 = vector.shape_cast %123 : vector<8x128xf32> to vector<1x8x128xf32>
    tpu.vector_store %arg9[%126, %c0_67, %c0_68], %129 {strides = array<i32>} : memref<8x8x128xf32, #tpu.memory_space<vmem>>, vector<1x8x128xf32>,
    %c3_i32 = arith.constant 3 : i32
    %130 = arith.index_cast %c3_i32 : i32 to index
    %c0_69 = arith.constant 0 : index
    %c0_70 = arith.constant 0 : index
    %131 = vector.load %arg8[%130, %c0_69, %c0_70] : memref<8x8x512xf32, #tpu.memory_space<vmem>>, vector<1x8x512xf32>
    %132 = vector.shape_cast %131 : vector<1x8x512xf32> to vector<8x512xf32>
    %c0_71 = arith.constant 0 : index
    %c0_72 = arith.constant 0 : index
    %133 = vector.load %arg10[%c0_71, %c0_72] : memref<8x128xf32, #tpu.memory_space<vmem>>, vector<8x128xf32>
    %c0_73 = arith.constant 0 : index
    %c0_74 = arith.constant 0 : index
    %134 = vector.load %arg2[%c0_73, %c0_74] : memref<128x512xf32, #tpu.memory_space<vmem>>, vector<128x512xf32>
    %cst_75 = arith.constant dense<0.000000e+00> : vector<8x512xf32>
    %135 = tpu.matmul %133, %134, %cst_75 {dimension_numbers = #tpu.dot_dimension_numbers<[1], [0], [0], [1], [0, 0, 1, 1], [], []>} : vector<8x128xf32>, vector<128x512xf32>, vector<8x512xf32> -> vector<8x512xf32>
    %136 = arith.addf %132, %135 : vector<8x512xf32>
    %137 = vector.extract_strided_slice %136 {offsets = [0, 0], sizes = [8, 128], strides = [1, 1]} : vector<8x512xf32> to vector<8x128xf32>
    %138 = arith.negf %137 : vector<8x128xf32>
    %139 = math.exp %138 : vector<8x128xf32>
    %cst_76 = arith.constant 1.000000e+00 : f32
    %140 = vector.broadcast %cst_76 : f32 to vector<8x128xf32>
    %141 = arith.addf %140, %139 : vector<8x128xf32>
    %142 = arith.divf %140, %141 : vector<8x128xf32>
    %143 = vector.extract_strided_slice %136 {offsets = [0, 128], sizes = [8, 128], strides = [1, 1]} : vector<8x512xf32> to vector<8x128xf32>
    %144 = arith.negf %143 : vector<8x128xf32>
    %145 = math.exp %144 : vector<8x128xf32>
    %cst_77 = arith.constant 1.000000e+00 : f32
    %146 = vector.broadcast %cst_77 : f32 to vector<8x128xf32>
    %147 = arith.addf %146, %145 : vector<8x128xf32>
    %148 = arith.divf %146, %147 : vector<8x128xf32>
    %149 = vector.extract_strided_slice %136 {offsets = [0, 256], sizes = [8, 128], strides = [1, 1]} : vector<8x512xf32> to vector<8x128xf32>
    %150 = math.tanh %149 : vector<8x128xf32>
    %151 = vector.extract_strided_slice %136 {offsets = [0, 384], sizes = [8, 128], strides = [1, 1]} : vector<8x512xf32> to vector<8x128xf32>
    %152 = arith.negf %151 : vector<8x128xf32>
    %153 = math.exp %152 : vector<8x128xf32>
    %cst_78 = arith.constant 1.000000e+00 : f32
    %154 = vector.broadcast %cst_78 : f32 to vector<8x128xf32>
    %155 = arith.addf %154, %153 : vector<8x128xf32>
    %156 = arith.divf %154, %155 : vector<8x128xf32>
    %c0_79 = arith.constant 0 : index
    %c0_80 = arith.constant 0 : index
    %157 = vector.load %arg11[%c0_79, %c0_80] : memref<8x128xf32, #tpu.memory_space<vmem>>, vector<8x128xf32>
    %158 = arith.mulf %148, %157 : vector<8x128xf32>
    %159 = arith.mulf %142, %150 : vector<8x128xf32>
    %160 = arith.addf %158, %159 : vector<8x128xf32>
    %161 = math.tanh %160 : vector<8x128xf32>
    %162 = arith.mulf %156, %161 : vector<8x128xf32>
    %c0_81 = arith.constant 0 : index
    %c0_82 = arith.constant 0 : index
    %163 = vector.load %arg11[%c0_81, %c0_82] : memref<8x128xf32, #tpu.memory_space<vmem>>, vector<8x128xf32>
    tpu.vector_store %arg11[%c0_81, %c0_82], %160 {strides = array<i32>} : memref<8x128xf32, #tpu.memory_space<vmem>>, vector<8x128xf32>,
    %c0_83 = arith.constant 0 : index
    %c0_84 = arith.constant 0 : index
    %164 = vector.load %arg10[%c0_83, %c0_84] : memref<8x128xf32, #tpu.memory_space<vmem>>, vector<8x128xf32>
    tpu.vector_store %arg10[%c0_83, %c0_84], %162 {strides = array<i32>} : memref<8x128xf32, #tpu.memory_space<vmem>>, vector<8x128xf32>,
    %165 = arith.index_cast %c3_i32 : i32 to index
    %c0_85 = arith.constant 0 : index
    %c0_86 = arith.constant 0 : index
    %166 = vector.load %arg9[%165, %c0_85, %c0_86] : memref<8x8x128xf32, #tpu.memory_space<vmem>>, vector<1x8x128xf32>
    %167 = vector.shape_cast %166 : vector<1x8x128xf32> to vector<8x128xf32>
    %168 = vector.shape_cast %162 : vector<8x128xf32> to vector<1x8x128xf32>
    tpu.vector_store %arg9[%165, %c0_85, %c0_86], %168 {strides = array<i32>} : memref<8x8x128xf32, #tpu.memory_space<vmem>>, vector<1x8x128xf32>,
    %c4_i32 = arith.constant 4 : i32
    %169 = arith.index_cast %c4_i32 : i32 to index
    %c0_87 = arith.constant 0 : index
    %c0_88 = arith.constant 0 : index
    %170 = vector.load %arg8[%169, %c0_87, %c0_88] : memref<8x8x512xf32, #tpu.memory_space<vmem>>, vector<1x8x512xf32>
    %171 = vector.shape_cast %170 : vector<1x8x512xf32> to vector<8x512xf32>
    %c0_89 = arith.constant 0 : index
    %c0_90 = arith.constant 0 : index
    %172 = vector.load %arg10[%c0_89, %c0_90] : memref<8x128xf32, #tpu.memory_space<vmem>>, vector<8x128xf32>
    %c0_91 = arith.constant 0 : index
    %c0_92 = arith.constant 0 : index
    %173 = vector.load %arg2[%c0_91, %c0_92] : memref<128x512xf32, #tpu.memory_space<vmem>>, vector<128x512xf32>
    %cst_93 = arith.constant dense<0.000000e+00> : vector<8x512xf32>
    %174 = tpu.matmul %172, %173, %cst_93 {dimension_numbers = #tpu.dot_dimension_numbers<[1], [0], [0], [1], [0, 0, 1, 1], [], []>} : vector<8x128xf32>, vector<128x512xf32>, vector<8x512xf32> -> vector<8x512xf32>
    %175 = arith.addf %171, %174 : vector<8x512xf32>
    %176 = vector.extract_strided_slice %175 {offsets = [0, 0], sizes = [8, 128], strides = [1, 1]} : vector<8x512xf32> to vector<8x128xf32>
    %177 = arith.negf %176 : vector<8x128xf32>
    %178 = math.exp %177 : vector<8x128xf32>
    %cst_94 = arith.constant 1.000000e+00 : f32
    %179 = vector.broadcast %cst_94 : f32 to vector<8x128xf32>
    %180 = arith.addf %179, %178 : vector<8x128xf32>
    %181 = arith.divf %179, %180 : vector<8x128xf32>
    %182 = vector.extract_strided_slice %175 {offsets = [0, 128], sizes = [8, 128], strides = [1, 1]} : vector<8x512xf32> to vector<8x128xf32>
    %183 = arith.negf %182 : vector<8x128xf32>
    %184 = math.exp %183 : vector<8x128xf32>
    %cst_95 = arith.constant 1.000000e+00 : f32
    %185 = vector.broadcast %cst_95 : f32 to vector<8x128xf32>
    %186 = arith.addf %185, %184 : vector<8x128xf32>
    %187 = arith.divf %185, %186 : vector<8x128xf32>
    %188 = vector.extract_strided_slice %175 {offsets = [0, 256], sizes = [8, 128], strides = [1, 1]} : vector<8x512xf32> to vector<8x128xf32>
    %189 = math.tanh %188 : vector<8x128xf32>
    %190 = vector.extract_strided_slice %175 {offsets = [0, 384], sizes = [8, 128], strides = [1, 1]} : vector<8x512xf32> to vector<8x128xf32>
    %191 = arith.negf %190 : vector<8x128xf32>
    %192 = math.exp %191 : vector<8x128xf32>
    %cst_96 = arith.constant 1.000000e+00 : f32
    %193 = vector.broadcast %cst_96 : f32 to vector<8x128xf32>
    %194 = arith.addf %193, %192 : vector<8x128xf32>
    %195 = arith.divf %193, %194 : vector<8x128xf32>
    %c0_97 = arith.constant 0 : index
    %c0_98 = arith.constant 0 : index
    %196 = vector.load %arg11[%c0_97, %c0_98] : memref<8x128xf32, #tpu.memory_space<vmem>>, vector<8x128xf32>
    %197 = arith.mulf %187, %196 : vector<8x128xf32>
    %198 = arith.mulf %181, %189 : vector<8x128xf32>
    %199 = arith.addf %197, %198 : vector<8x128xf32>
    %200 = math.tanh %199 : vector<8x128xf32>
    %201 = arith.mulf %195, %200 : vector<8x128xf32>
    %c0_99 = arith.constant 0 : index
    %c0_100 = arith.constant 0 : index
    %202 = vector.load %arg11[%c0_99, %c0_100] : memref<8x128xf32, #tpu.memory_space<vmem>>, vector<8x128xf32>
    tpu.vector_store %arg11[%c0_99, %c0_100], %199 {strides = array<i32>} : memref<8x128xf32, #tpu.memory_space<vmem>>, vector<8x128xf32>,
    %c0_101 = arith.constant 0 : index
    %c0_102 = arith.constant 0 : index
    %203 = vector.load %arg10[%c0_101, %c0_102] : memref<8x128xf32, #tpu.memory_space<vmem>>, vector<8x128xf32>
    tpu.vector_store %arg10[%c0_101, %c0_102], %201 {strides = array<i32>} : memref<8x128xf32, #tpu.memory_space<vmem>>, vector<8x128xf32>,
    %204 = arith.index_cast %c4_i32 : i32 to index
    %c0_103 = arith.constant 0 : index
    %c0_104 = arith.constant 0 : index
    %205 = vector.load %arg9[%204, %c0_103, %c0_104] : memref<8x8x128xf32, #tpu.memory_space<vmem>>, vector<1x8x128xf32>
    %206 = vector.shape_cast %205 : vector<1x8x128xf32> to vector<8x128xf32>
    %207 = vector.shape_cast %201 : vector<8x128xf32> to vector<1x8x128xf32>
    tpu.vector_store %arg9[%204, %c0_103, %c0_104], %207 {strides = array<i32>} : memref<8x8x128xf32, #tpu.memory_space<vmem>>, vector<1x8x128xf32>,
    %c5_i32 = arith.constant 5 : i32
    %208 = arith.index_cast %c5_i32 : i32 to index
    %c0_105 = arith.constant 0 : index
    %c0_106 = arith.constant 0 : index
    %209 = vector.load %arg8[%208, %c0_105, %c0_106] : memref<8x8x512xf32, #tpu.memory_space<vmem>>, vector<1x8x512xf32>
    %210 = vector.shape_cast %209 : vector<1x8x512xf32> to vector<8x512xf32>
    %c0_107 = arith.constant 0 : index
    %c0_108 = arith.constant 0 : index
    %211 = vector.load %arg10[%c0_107, %c0_108] : memref<8x128xf32, #tpu.memory_space<vmem>>, vector<8x128xf32>
    %c0_109 = arith.constant 0 : index
    %c0_110 = arith.constant 0 : index
    %212 = vector.load %arg2[%c0_109, %c0_110] : memref<128x512xf32, #tpu.memory_space<vmem>>, vector<128x512xf32>
    %cst_111 = arith.constant dense<0.000000e+00> : vector<8x512xf32>
    %213 = tpu.matmul %211, %212, %cst_111 {dimension_numbers = #tpu.dot_dimension_numbers<[1], [0], [0], [1], [0, 0, 1, 1], [], []>} : vector<8x128xf32>, vector<128x512xf32>, vector<8x512xf32> -> vector<8x512xf32>
    %214 = arith.addf %210, %213 : vector<8x512xf32>
    %215 = vector.extract_strided_slice %214 {offsets = [0, 0], sizes = [8, 128], strides = [1, 1]} : vector<8x512xf32> to vector<8x128xf32>
    %216 = arith.negf %215 : vector<8x128xf32>
    %217 = math.exp %216 : vector<8x128xf32>
    %cst_112 = arith.constant 1.000000e+00 : f32
    %218 = vector.broadcast %cst_112 : f32 to vector<8x128xf32>
    %219 = arith.addf %218, %217 : vector<8x128xf32>
    %220 = arith.divf %218, %219 : vector<8x128xf32>
    %221 = vector.extract_strided_slice %214 {offsets = [0, 128], sizes = [8, 128], strides = [1, 1]} : vector<8x512xf32> to vector<8x128xf32>
    %222 = arith.negf %221 : vector<8x128xf32>
    %223 = math.exp %222 : vector<8x128xf32>
    %cst_113 = arith.constant 1.000000e+00 : f32
    %224 = vector.broadcast %cst_113 : f32 to vector<8x128xf32>
    %225 = arith.addf %224, %223 : vector<8x128xf32>
    %226 = arith.divf %224, %225 : vector<8x128xf32>
    %227 = vector.extract_strided_slice %214 {offsets = [0, 256], sizes = [8, 128], strides = [1, 1]} : vector<8x512xf32> to vector<8x128xf32>
    %228 = math.tanh %227 : vector<8x128xf32>
    %229 = vector.extract_strided_slice %214 {offsets = [0, 384], sizes = [8, 128], strides = [1, 1]} : vector<8x512xf32> to vector<8x128xf32>
    %230 = arith.negf %229 : vector<8x128xf32>
    %231 = math.exp %230 : vector<8x128xf32>
    %cst_114 = arith.constant 1.000000e+00 : f32
    %232 = vector.broadcast %cst_114 : f32 to vector<8x128xf32>
    %233 = arith.addf %232, %231 : vector<8x128xf32>
    %234 = arith.divf %232, %233 : vector<8x128xf32>
    %c0_115 = arith.constant 0 : index
    %c0_116 = arith.constant 0 : index
    %235 = vector.load %arg11[%c0_115, %c0_116] : memref<8x128xf32, #tpu.memory_space<vmem>>, vector<8x128xf32>
    %236 = arith.mulf %226, %235 : vector<8x128xf32>
    %237 = arith.mulf %220, %228 : vector<8x128xf32>
    %238 = arith.addf %236, %237 : vector<8x128xf32>
    %239 = math.tanh %238 : vector<8x128xf32>
    %240 = arith.mulf %234, %239 : vector<8x128xf32>
    %c0_117 = arith.constant 0 : index
    %c0_118 = arith.constant 0 : index
    %241 = vector.load %arg11[%c0_117, %c0_118] : memref<8x128xf32, #tpu.memory_space<vmem>>, vector<8x128xf32>
    tpu.vector_store %arg11[%c0_117, %c0_118], %238 {strides = array<i32>} : memref<8x128xf32, #tpu.memory_space<vmem>>, vector<8x128xf32>,
    %c0_119 = arith.constant 0 : index
    %c0_120 = arith.constant 0 : index
    %242 = vector.load %arg10[%c0_119, %c0_120] : memref<8x128xf32, #tpu.memory_space<vmem>>, vector<8x128xf32>
    tpu.vector_store %arg10[%c0_119, %c0_120], %240 {strides = array<i32>} : memref<8x128xf32, #tpu.memory_space<vmem>>, vector<8x128xf32>,
    %243 = arith.index_cast %c5_i32 : i32 to index
    %c0_121 = arith.constant 0 : index
    %c0_122 = arith.constant 0 : index
    %244 = vector.load %arg9[%243, %c0_121, %c0_122] : memref<8x8x128xf32, #tpu.memory_space<vmem>>, vector<1x8x128xf32>
    %245 = vector.shape_cast %244 : vector<1x8x128xf32> to vector<8x128xf32>
    %246 = vector.shape_cast %240 : vector<8x128xf32> to vector<1x8x128xf32>
    tpu.vector_store %arg9[%243, %c0_121, %c0_122], %246 {strides = array<i32>} : memref<8x8x128xf32, #tpu.memory_space<vmem>>, vector<1x8x128xf32>,
    %c6_i32 = arith.constant 6 : i32
    %247 = arith.index_cast %c6_i32 : i32 to index
    %c0_123 = arith.constant 0 : index
    %c0_124 = arith.constant 0 : index
    %248 = vector.load %arg8[%247, %c0_123, %c0_124] : memref<8x8x512xf32, #tpu.memory_space<vmem>>, vector<1x8x512xf32>
    %249 = vector.shape_cast %248 : vector<1x8x512xf32> to vector<8x512xf32>
    %c0_125 = arith.constant 0 : index
    %c0_126 = arith.constant 0 : index
    %250 = vector.load %arg10[%c0_125, %c0_126] : memref<8x128xf32, #tpu.memory_space<vmem>>, vector<8x128xf32>
    %c0_127 = arith.constant 0 : index
    %c0_128 = arith.constant 0 : index
    %251 = vector.load %arg2[%c0_127, %c0_128] : memref<128x512xf32, #tpu.memory_space<vmem>>, vector<128x512xf32>
    %cst_129 = arith.constant dense<0.000000e+00> : vector<8x512xf32>
    %252 = tpu.matmul %250, %251, %cst_129 {dimension_numbers = #tpu.dot_dimension_numbers<[1], [0], [0], [1], [0, 0, 1, 1], [], []>} : vector<8x128xf32>, vector<128x512xf32>, vector<8x512xf32> -> vector<8x512xf32>
    %253 = arith.addf %249, %252 : vector<8x512xf32>
    %254 = vector.extract_strided_slice %253 {offsets = [0, 0], sizes = [8, 128], strides = [1, 1]} : vector<8x512xf32> to vector<8x128xf32>
    %255 = arith.negf %254 : vector<8x128xf32>
    %256 = math.exp %255 : vector<8x128xf32>
    %cst_130 = arith.constant 1.000000e+00 : f32
    %257 = vector.broadcast %cst_130 : f32 to vector<8x128xf32>
    %258 = arith.addf %257, %256 : vector<8x128xf32>
    %259 = arith.divf %257, %258 : vector<8x128xf32>
    %260 = vector.extract_strided_slice %253 {offsets = [0, 128], sizes = [8, 128], strides = [1, 1]} : vector<8x512xf32> to vector<8x128xf32>
    %261 = arith.negf %260 : vector<8x128xf32>
    %262 = math.exp %261 : vector<8x128xf32>
    %cst_131 = arith.constant 1.000000e+00 : f32
    %263 = vector.broadcast %cst_131 : f32 to vector<8x128xf32>
    %264 = arith.addf %263, %262 : vector<8x128xf32>
    %265 = arith.divf %263, %264 : vector<8x128xf32>
    %266 = vector.extract_strided_slice %253 {offsets = [0, 256], sizes = [8, 128], strides = [1, 1]} : vector<8x512xf32> to vector<8x128xf32>
    %267 = math.tanh %266 : vector<8x128xf32>
    %268 = vector.extract_strided_slice %253 {offsets = [0, 384], sizes = [8, 128], strides = [1, 1]} : vector<8x512xf32> to vector<8x128xf32>
    %269 = arith.negf %268 : vector<8x128xf32>
    %270 = math.exp %269 : vector<8x128xf32>
    %cst_132 = arith.constant 1.000000e+00 : f32
    %271 = vector.broadcast %cst_132 : f32 to vector<8x128xf32>
    %272 = arith.addf %271, %270 : vector<8x128xf32>
    %273 = arith.divf %271, %272 : vector<8x128xf32>
    %c0_133 = arith.constant 0 : index
    %c0_134 = arith.constant 0 : index
    %274 = vector.load %arg11[%c0_133, %c0_134] : memref<8x128xf32, #tpu.memory_space<vmem>>, vector<8x128xf32>
    %275 = arith.mulf %265, %274 : vector<8x128xf32>
    %276 = arith.mulf %259, %267 : vector<8x128xf32>
    %277 = arith.addf %275, %276 : vector<8x128xf32>
    %278 = math.tanh %277 : vector<8x128xf32>
    %279 = arith.mulf %273, %278 : vector<8x128xf32>
    %c0_135 = arith.constant 0 : index
    %c0_136 = arith.constant 0 : index
    %280 = vector.load %arg11[%c0_135, %c0_136] : memref<8x128xf32, #tpu.memory_space<vmem>>, vector<8x128xf32>
    tpu.vector_store %arg11[%c0_135, %c0_136], %277 {strides = array<i32>} : memref<8x128xf32, #tpu.memory_space<vmem>>, vector<8x128xf32>,
    %c0_137 = arith.constant 0 : index
    %c0_138 = arith.constant 0 : index
    %281 = vector.load %arg10[%c0_137, %c0_138] : memref<8x128xf32, #tpu.memory_space<vmem>>, vector<8x128xf32>
    tpu.vector_store %arg10[%c0_137, %c0_138], %279 {strides = array<i32>} : memref<8x128xf32, #tpu.memory_space<vmem>>, vector<8x128xf32>,
    %282 = arith.index_cast %c6_i32 : i32 to index
    %c0_139 = arith.constant 0 : index
    %c0_140 = arith.constant 0 : index
    %283 = vector.load %arg9[%282, %c0_139, %c0_140] : memref<8x8x128xf32, #tpu.memory_space<vmem>>, vector<1x8x128xf32>
    %284 = vector.shape_cast %283 : vector<1x8x128xf32> to vector<8x128xf32>
    %285 = vector.shape_cast %279 : vector<8x128xf32> to vector<1x8x128xf32>
    tpu.vector_store %arg9[%282, %c0_139, %c0_140], %285 {strides = array<i32>} : memref<8x8x128xf32, #tpu.memory_space<vmem>>, vector<1x8x128xf32>,
    %c7_i32 = arith.constant 7 : i32
    %286 = arith.index_cast %c7_i32 : i32 to index
    %c0_141 = arith.constant 0 : index
    %c0_142 = arith.constant 0 : index
    %287 = vector.load %arg8[%286, %c0_141, %c0_142] : memref<8x8x512xf32, #tpu.memory_space<vmem>>, vector<1x8x512xf32>
    %288 = vector.shape_cast %287 : vector<1x8x512xf32> to vector<8x512xf32>
    %c0_143 = arith.constant 0 : index
    %c0_144 = arith.constant 0 : index
    %289 = vector.load %arg10[%c0_143, %c0_144] : memref<8x128xf32, #tpu.memory_space<vmem>>, vector<8x128xf32>
    %c0_145 = arith.constant 0 : index
    %c0_146 = arith.constant 0 : index
    %290 = vector.load %arg2[%c0_145, %c0_146] : memref<128x512xf32, #tpu.memory_space<vmem>>, vector<128x512xf32>
    %cst_147 = arith.constant dense<0.000000e+00> : vector<8x512xf32>
    %291 = tpu.matmul %289, %290, %cst_147 {dimension_numbers = #tpu.dot_dimension_numbers<[1], [0], [0], [1], [0, 0, 1, 1], [], []>} : vector<8x128xf32>, vector<128x512xf32>, vector<8x512xf32> -> vector<8x512xf32>
    %292 = arith.addf %288, %291 : vector<8x512xf32>
    %293 = vector.extract_strided_slice %292 {offsets = [0, 0], sizes = [8, 128], strides = [1, 1]} : vector<8x512xf32> to vector<8x128xf32>
    %294 = arith.negf %293 : vector<8x128xf32>
    %295 = math.exp %294 : vector<8x128xf32>
    %cst_148 = arith.constant 1.000000e+00 : f32
    %296 = vector.broadcast %cst_148 : f32 to vector<8x128xf32>
    %297 = arith.addf %296, %295 : vector<8x128xf32>
    %298 = arith.divf %296, %297 : vector<8x128xf32>
    %299 = vector.extract_strided_slice %292 {offsets = [0, 128], sizes = [8, 128], strides = [1, 1]} : vector<8x512xf32> to vector<8x128xf32>
    %300 = arith.negf %299 : vector<8x128xf32>
    %301 = math.exp %300 : vector<8x128xf32>
    %cst_149 = arith.constant 1.000000e+00 : f32
    %302 = vector.broadcast %cst_149 : f32 to vector<8x128xf32>
    %303 = arith.addf %302, %301 : vector<8x128xf32>
    %304 = arith.divf %302, %303 : vector<8x128xf32>
    %305 = vector.extract_strided_slice %292 {offsets = [0, 256], sizes = [8, 128], strides = [1, 1]} : vector<8x512xf32> to vector<8x128xf32>
    %306 = math.tanh %305 : vector<8x128xf32>
    %307 = vector.extract_strided_slice %292 {offsets = [0, 384], sizes = [8, 128], strides = [1, 1]} : vector<8x512xf32> to vector<8x128xf32>
    %308 = arith.negf %307 : vector<8x128xf32>
    %309 = math.exp %308 : vector<8x128xf32>
    %cst_150 = arith.constant 1.000000e+00 : f32
    %310 = vector.broadcast %cst_150 : f32 to vector<8x128xf32>
    %311 = arith.addf %310, %309 : vector<8x128xf32>
    %312 = arith.divf %310, %311 : vector<8x128xf32>
    %c0_151 = arith.constant 0 : index
    %c0_152 = arith.constant 0 : index
    %313 = vector.load %arg11[%c0_151, %c0_152] : memref<8x128xf32, #tpu.memory_space<vmem>>, vector<8x128xf32>
    %314 = arith.mulf %304, %313 : vector<8x128xf32>
    %315 = arith.mulf %298, %306 : vector<8x128xf32>
    %316 = arith.addf %314, %315 : vector<8x128xf32>
    %317 = math.tanh %316 : vector<8x128xf32>
    %318 = arith.mulf %312, %317 : vector<8x128xf32>
    %c0_153 = arith.constant 0 : index
    %c0_154 = arith.constant 0 : index
    %319 = vector.load %arg11[%c0_153, %c0_154] : memref<8x128xf32, #tpu.memory_space<vmem>>, vector<8x128xf32>
    tpu.vector_store %arg11[%c0_153, %c0_154], %316 {strides = array<i32>} : memref<8x128xf32, #tpu.memory_space<vmem>>, vector<8x128xf32>,
    %c0_155 = arith.constant 0 : index
    %c0_156 = arith.constant 0 : index
    %320 = vector.load %arg10[%c0_155, %c0_156] : memref<8x128xf32, #tpu.memory_space<vmem>>, vector<8x128xf32>
    tpu.vector_store %arg10[%c0_155, %c0_156], %318 {strides = array<i32>} : memref<8x128xf32, #tpu.memory_space<vmem>>, vector<8x128xf32>,
    %321 = arith.index_cast %c7_i32 : i32 to index
    %c0_157 = arith.constant 0 : index
    %c0_158 = arith.constant 0 : index
    %322 = vector.load %arg9[%321, %c0_157, %c0_158] : memref<8x8x128xf32, #tpu.memory_space<vmem>>, vector<1x8x128xf32>
    %323 = vector.shape_cast %322 : vector<1x8x128xf32> to vector<8x128xf32>
    %324 = vector.shape_cast %318 : vector<8x128xf32> to vector<1x8x128xf32>
    tpu.vector_store %arg9[%321, %c0_157, %c0_158], %324 {strides = array<i32>} : memref<8x8x128xf32, #tpu.memory_space<vmem>>, vector<1x8x128xf32>,
    %c8_i32 = arith.constant 8 : i32
    %c0_159 = arith.constant 0 : index
    %c0_160 = arith.constant 0 : index
    %c0_161 = arith.constant 0 : index
    %325 = vector.load %arg9[%c0_159, %c0_160, %c0_161] : memref<8x8x128xf32, #tpu.memory_space<vmem>>, vector<8x8x128xf32>
    %326 = vector.shape_cast %325 : vector<8x8x128xf32> to vector<64x128xf32>
    %c0_162 = arith.constant 0 : index
    %c0_163 = arith.constant 0 : index
    %327 = vector.load %arg4[%c0_162, %c0_163] : memref<128x512xf32, #tpu.memory_space<vmem>>, vector<128x512xf32>
    %cst_164 = arith.constant dense<0.000000e+00> : vector<64x512xf32>
    %328 = tpu.matmul %326, %327, %cst_164 {dimension_numbers = #tpu.dot_dimension_numbers<[1], [0], [0], [1], [0, 0, 1, 1], [], []>} : vector<64x128xf32>, vector<128x512xf32>, vector<64x512xf32> -> vector<64x512xf32>
    %c0_165 = arith.constant 0 : index
    %c0_166 = arith.constant 0 : index
    %329 = vector.load %arg6[%c0_165, %c0_166] : memref<1x512xf32, #tpu.memory_space<vmem>>, vector<1x512xf32>
    %330 = vector.broadcast %329 : vector<1x512xf32> to vector<64x512xf32>
    %331 = arith.addf %328, %330 : vector<64x512xf32>
    %332 = vector.shape_cast %331 : vector<64x512xf32> to vector<8x8x512xf32>
    %c0_167 = arith.constant 0 : index
    %c0_168 = arith.constant 0 : index
    %c0_169 = arith.constant 0 : index
    %333 = vector.load %arg8[%c0_167, %c0_168, %c0_169] : memref<8x8x512xf32, #tpu.memory_space<vmem>>, vector<8x8x512xf32>
    tpu.vector_store %arg8[%c0_167, %c0_168, %c0_169], %332 {strides = array<i32>} : memref<8x8x512xf32, #tpu.memory_space<vmem>>, vector<8x8x512xf32>,
    %cst_170 = arith.constant 0.000000e+00 : f32
    %334 = vector.broadcast %cst_170 : f32 to vector<8x128xf32>
    %c0_171 = arith.constant 0 : index
    %c0_172 = arith.constant 0 : index
    %335 = vector.load %arg10[%c0_171, %c0_172] : memref<8x128xf32, #tpu.memory_space<vmem>>, vector<8x128xf32>
    tpu.vector_store %arg10[%c0_171, %c0_172], %334 {strides = array<i32>} : memref<8x128xf32, #tpu.memory_space<vmem>>, vector<8x128xf32>,
    %cst_173 = arith.constant 0.000000e+00 : f32
    %336 = vector.broadcast %cst_173 : f32 to vector<8x128xf32>
    %c0_174 = arith.constant 0 : index
    %c0_175 = arith.constant 0 : index
    %337 = vector.load %arg11[%c0_174, %c0_175] : memref<8x128xf32, #tpu.memory_space<vmem>>, vector<8x128xf32>
    tpu.vector_store %arg11[%c0_174, %c0_175], %336 {strides = array<i32>} : memref<8x128xf32, #tpu.memory_space<vmem>>, vector<8x128xf32>,
    %c0_i32_176 = arith.constant 0 : i32
    %338 = arith.index_cast %c0_i32_176 : i32 to index
    %c0_177 = arith.constant 0 : index
    %c0_178 = arith.constant 0 : index
    %339 = vector.load %arg8[%338, %c0_177, %c0_178] : memref<8x8x512xf32, #tpu.memory_space<vmem>>, vector<1x8x512xf32>
    %340 = vector.shape_cast %339 : vector<1x8x512xf32> to vector<8x512xf32>
    %c0_179 = arith.constant 0 : index
    %c0_180 = arith.constant 0 : index
    %341 = vector.load %arg10[%c0_179, %c0_180] : memref<8x128xf32, #tpu.memory_space<vmem>>, vector<8x128xf32>
    %c0_181 = arith.constant 0 : index
    %c0_182 = arith.constant 0 : index
    %342 = vector.load %arg5[%c0_181, %c0_182] : memref<128x512xf32, #tpu.memory_space<vmem>>, vector<128x512xf32>
    %cst_183 = arith.constant dense<0.000000e+00> : vector<8x512xf32>
    %343 = tpu.matmul %341, %342, %cst_183 {dimension_numbers = #tpu.dot_dimension_numbers<[1], [0], [0], [1], [0, 0, 1, 1], [], []>} : vector<8x128xf32>, vector<128x512xf32>, vector<8x512xf32> -> vector<8x512xf32>
    %344 = arith.addf %340, %343 : vector<8x512xf32>
    %345 = vector.extract_strided_slice %344 {offsets = [0, 0], sizes = [8, 128], strides = [1, 1]} : vector<8x512xf32> to vector<8x128xf32>
    %346 = arith.negf %345 : vector<8x128xf32>
    %347 = math.exp %346 : vector<8x128xf32>
    %cst_184 = arith.constant 1.000000e+00 : f32
    %348 = vector.broadcast %cst_184 : f32 to vector<8x128xf32>
    %349 = arith.addf %348, %347 : vector<8x128xf32>
    %350 = arith.divf %348, %349 : vector<8x128xf32>
    %351 = vector.extract_strided_slice %344 {offsets = [0, 128], sizes = [8, 128], strides = [1, 1]} : vector<8x512xf32> to vector<8x128xf32>
    %352 = arith.negf %351 : vector<8x128xf32>
    %353 = math.exp %352 : vector<8x128xf32>
    %cst_185 = arith.constant 1.000000e+00 : f32
    %354 = vector.broadcast %cst_185 : f32 to vector<8x128xf32>
    %355 = arith.addf %354, %353 : vector<8x128xf32>
    %356 = arith.divf %354, %355 : vector<8x128xf32>
    %357 = vector.extract_strided_slice %344 {offsets = [0, 256], sizes = [8, 128], strides = [1, 1]} : vector<8x512xf32> to vector<8x128xf32>
    %358 = math.tanh %357 : vector<8x128xf32>
    %359 = vector.extract_strided_slice %344 {offsets = [0, 384], sizes = [8, 128], strides = [1, 1]} : vector<8x512xf32> to vector<8x128xf32>
    %360 = arith.negf %359 : vector<8x128xf32>
    %361 = math.exp %360 : vector<8x128xf32>
    %cst_186 = arith.constant 1.000000e+00 : f32
    %362 = vector.broadcast %cst_186 : f32 to vector<8x128xf32>
    %363 = arith.addf %362, %361 : vector<8x128xf32>
    %364 = arith.divf %362, %363 : vector<8x128xf32>
    %c0_187 = arith.constant 0 : index
    %c0_188 = arith.constant 0 : index
    %365 = vector.load %arg11[%c0_187, %c0_188] : memref<8x128xf32, #tpu.memory_space<vmem>>, vector<8x128xf32>
    %366 = arith.mulf %356, %365 : vector<8x128xf32>
    %367 = arith.mulf %350, %358 : vector<8x128xf32>
    %368 = arith.addf %366, %367 : vector<8x128xf32>
    %369 = math.tanh %368 : vector<8x128xf32>
    %370 = arith.mulf %364, %369 : vector<8x128xf32>
    %c0_189 = arith.constant 0 : index
    %c0_190 = arith.constant 0 : index
    %371 = vector.load %arg11[%c0_189, %c0_190] : memref<8x128xf32, #tpu.memory_space<vmem>>, vector<8x128xf32>
    tpu.vector_store %arg11[%c0_189, %c0_190], %368 {strides = array<i32>} : memref<8x128xf32, #tpu.memory_space<vmem>>, vector<8x128xf32>,
    %c0_191 = arith.constant 0 : index
    %c0_192 = arith.constant 0 : index
    %372 = vector.load %arg10[%c0_191, %c0_192] : memref<8x128xf32, #tpu.memory_space<vmem>>, vector<8x128xf32>
    tpu.vector_store %arg10[%c0_191, %c0_192], %370 {strides = array<i32>} : memref<8x128xf32, #tpu.memory_space<vmem>>, vector<8x128xf32>,
    %373 = arith.index_cast %c0_i32_176 : i32 to index
    %c0_193 = arith.constant 0 : index
    %c0_194 = arith.constant 0 : index
    %374 = vector.load %arg7[%373, %c0_193, %c0_194] : memref<8x8x128xf32, #tpu.memory_space<vmem>>, vector<1x8x128xf32>
    %375 = vector.shape_cast %374 : vector<1x8x128xf32> to vector<8x128xf32>
    %376 = vector.shape_cast %370 : vector<8x128xf32> to vector<1x8x128xf32>
    tpu.vector_store %arg7[%373, %c0_193, %c0_194], %376 {strides = array<i32>} : memref<8x8x128xf32, #tpu.memory_space<vmem>>, vector<1x8x128xf32>,
    %c1_i32_195 = arith.constant 1 : i32
    %377 = arith.index_cast %c1_i32_195 : i32 to index
    %c0_196 = arith.constant 0 : index
    %c0_197 = arith.constant 0 : index
    %378 = vector.load %arg8[%377, %c0_196, %c0_197] : memref<8x8x512xf32, #tpu.memory_space<vmem>>, vector<1x8x512xf32>
    %379 = vector.shape_cast %378 : vector<1x8x512xf32> to vector<8x512xf32>
    %c0_198 = arith.constant 0 : index
    %c0_199 = arith.constant 0 : index
    %380 = vector.load %arg10[%c0_198, %c0_199] : memref<8x128xf32, #tpu.memory_space<vmem>>, vector<8x128xf32>
    %c0_200 = arith.constant 0 : index
    %c0_201 = arith.constant 0 : index
    %381 = vector.load %arg5[%c0_200, %c0_201] : memref<128x512xf32, #tpu.memory_space<vmem>>, vector<128x512xf32>
    %cst_202 = arith.constant dense<0.000000e+00> : vector<8x512xf32>
    %382 = tpu.matmul %380, %381, %cst_202 {dimension_numbers = #tpu.dot_dimension_numbers<[1], [0], [0], [1], [0, 0, 1, 1], [], []>} : vector<8x128xf32>, vector<128x512xf32>, vector<8x512xf32> -> vector<8x512xf32>
    %383 = arith.addf %379, %382 : vector<8x512xf32>
    %384 = vector.extract_strided_slice %383 {offsets = [0, 0], sizes = [8, 128], strides = [1, 1]} : vector<8x512xf32> to vector<8x128xf32>
    %385 = arith.negf %384 : vector<8x128xf32>
    %386 = math.exp %385 : vector<8x128xf32>
    %cst_203 = arith.constant 1.000000e+00 : f32
    %387 = vector.broadcast %cst_203 : f32 to vector<8x128xf32>
    %388 = arith.addf %387, %386 : vector<8x128xf32>
    %389 = arith.divf %387, %388 : vector<8x128xf32>
    %390 = vector.extract_strided_slice %383 {offsets = [0, 128], sizes = [8, 128], strides = [1, 1]} : vector<8x512xf32> to vector<8x128xf32>
    %391 = arith.negf %390 : vector<8x128xf32>
    %392 = math.exp %391 : vector<8x128xf32>
    %cst_204 = arith.constant 1.000000e+00 : f32
    %393 = vector.broadcast %cst_204 : f32 to vector<8x128xf32>
    %394 = arith.addf %393, %392 : vector<8x128xf32>
    %395 = arith.divf %393, %394 : vector<8x128xf32>
    %396 = vector.extract_strided_slice %383 {offsets = [0, 256], sizes = [8, 128], strides = [1, 1]} : vector<8x512xf32> to vector<8x128xf32>
    %397 = math.tanh %396 : vector<8x128xf32>
    %398 = vector.extract_strided_slice %383 {offsets = [0, 384], sizes = [8, 128], strides = [1, 1]} : vector<8x512xf32> to vector<8x128xf32>
    %399 = arith.negf %398 : vector<8x128xf32>
    %400 = math.exp %399 : vector<8x128xf32>
    %cst_205 = arith.constant 1.000000e+00 : f32
    %401 = vector.broadcast %cst_205 : f32 to vector<8x128xf32>
    %402 = arith.addf %401, %400 : vector<8x128xf32>
    %403 = arith.divf %401, %402 : vector<8x128xf32>
    %c0_206 = arith.constant 0 : index
    %c0_207 = arith.constant 0 : index
    %404 = vector.load %arg11[%c0_206, %c0_207] : memref<8x128xf32, #tpu.memory_space<vmem>>, vector<8x128xf32>
    %405 = arith.mulf %395, %404 : vector<8x128xf32>
    %406 = arith.mulf %389, %397 : vector<8x128xf32>
    %407 = arith.addf %405, %406 : vector<8x128xf32>
    %408 = math.tanh %407 : vector<8x128xf32>
    %409 = arith.mulf %403, %408 : vector<8x128xf32>
    %c0_208 = arith.constant 0 : index
    %c0_209 = arith.constant 0 : index
    %410 = vector.load %arg11[%c0_208, %c0_209] : memref<8x128xf32, #tpu.memory_space<vmem>>, vector<8x128xf32>
    tpu.vector_store %arg11[%c0_208, %c0_209], %407 {strides = array<i32>} : memref<8x128xf32, #tpu.memory_space<vmem>>, vector<8x128xf32>,
    %c0_210 = arith.constant 0 : index
    %c0_211 = arith.constant 0 : index
    %411 = vector.load %arg10[%c0_210, %c0_211] : memref<8x128xf32, #tpu.memory_space<vmem>>, vector<8x128xf32>
    tpu.vector_store %arg10[%c0_210, %c0_211], %409 {strides = array<i32>} : memref<8x128xf32, #tpu.memory_space<vmem>>, vector<8x128xf32>,
    %412 = arith.index_cast %c1_i32_195 : i32 to index
    %c0_212 = arith.constant 0 : index
    %c0_213 = arith.constant 0 : index
    %413 = vector.load %arg7[%412, %c0_212, %c0_213] : memref<8x8x128xf32, #tpu.memory_space<vmem>>, vector<1x8x128xf32>
    %414 = vector.shape_cast %413 : vector<1x8x128xf32> to vector<8x128xf32>
    %415 = vector.shape_cast %409 : vector<8x128xf32> to vector<1x8x128xf32>
    tpu.vector_store %arg7[%412, %c0_212, %c0_213], %415 {strides = array<i32>} : memref<8x8x128xf32, #tpu.memory_space<vmem>>, vector<1x8x128xf32>,
    %c2_i32_214 = arith.constant 2 : i32
    %416 = arith.index_cast %c2_i32_214 : i32 to index
    %c0_215 = arith.constant 0 : index
    %c0_216 = arith.constant 0 : index
    %417 = vector.load %arg8[%416, %c0_215, %c0_216] : memref<8x8x512xf32, #tpu.memory_space<vmem>>, vector<1x8x512xf32>
    %418 = vector.shape_cast %417 : vector<1x8x512xf32> to vector<8x512xf32>
    %c0_217 = arith.constant 0 : index
    %c0_218 = arith.constant 0 : index
    %419 = vector.load %arg10[%c0_217, %c0_218] : memref<8x128xf32, #tpu.memory_space<vmem>>, vector<8x128xf32>
    %c0_219 = arith.constant 0 : index
    %c0_220 = arith.constant 0 : index
    %420 = vector.load %arg5[%c0_219, %c0_220] : memref<128x512xf32, #tpu.memory_space<vmem>>, vector<128x512xf32>
    %cst_221 = arith.constant dense<0.000000e+00> : vector<8x512xf32>
    %421 = tpu.matmul %419, %420, %cst_221 {dimension_numbers = #tpu.dot_dimension_numbers<[1], [0], [0], [1], [0, 0, 1, 1], [], []>} : vector<8x128xf32>, vector<128x512xf32>, vector<8x512xf32> -> vector<8x512xf32>
    %422 = arith.addf %418, %421 : vector<8x512xf32>
    %423 = vector.extract_strided_slice %422 {offsets = [0, 0], sizes = [8, 128], strides = [1, 1]} : vector<8x512xf32> to vector<8x128xf32>
    %424 = arith.negf %423 : vector<8x128xf32>
    %425 = math.exp %424 : vector<8x128xf32>
    %cst_222 = arith.constant 1.000000e+00 : f32
    %426 = vector.broadcast %cst_222 : f32 to vector<8x128xf32>
    %427 = arith.addf %426, %425 : vector<8x128xf32>
    %428 = arith.divf %426, %427 : vector<8x128xf32>
    %429 = vector.extract_strided_slice %422 {offsets = [0, 128], sizes = [8, 128], strides = [1, 1]} : vector<8x512xf32> to vector<8x128xf32>
    %430 = arith.negf %429 : vector<8x128xf32>
    %431 = math.exp %430 : vector<8x128xf32>
    %cst_223 = arith.constant 1.000000e+00 : f32
    %432 = vector.broadcast %cst_223 : f32 to vector<8x128xf32>
    %433 = arith.addf %432, %431 : vector<8x128xf32>
    %434 = arith.divf %432, %433 : vector<8x128xf32>
    %435 = vector.extract_strided_slice %422 {offsets = [0, 256], sizes = [8, 128], strides = [1, 1]} : vector<8x512xf32> to vector<8x128xf32>
    %436 = math.tanh %435 : vector<8x128xf32>
    %437 = vector.extract_strided_slice %422 {offsets = [0, 384], sizes = [8, 128], strides = [1, 1]} : vector<8x512xf32> to vector<8x128xf32>
    %438 = arith.negf %437 : vector<8x128xf32>
    %439 = math.exp %438 : vector<8x128xf32>
    %cst_224 = arith.constant 1.000000e+00 : f32
    %440 = vector.broadcast %cst_224 : f32 to vector<8x128xf32>
    %441 = arith.addf %440, %439 : vector<8x128xf32>
    %442 = arith.divf %440, %441 : vector<8x128xf32>
    %c0_225 = arith.constant 0 : index
    %c0_226 = arith.constant 0 : index
    %443 = vector.load %arg11[%c0_225, %c0_226] : memref<8x128xf32, #tpu.memory_space<vmem>>, vector<8x128xf32>
    %444 = arith.mulf %434, %443 : vector<8x128xf32>
    %445 = arith.mulf %428, %436 : vector<8x128xf32>
    %446 = arith.addf %444, %445 : vector<8x128xf32>
    %447 = math.tanh %446 : vector<8x128xf32>
    %448 = arith.mulf %442, %447 : vector<8x128xf32>
    %c0_227 = arith.constant 0 : index
    %c0_228 = arith.constant 0 : index
    %449 = vector.load %arg11[%c0_227, %c0_228] : memref<8x128xf32, #tpu.memory_space<vmem>>, vector<8x128xf32>
    tpu.vector_store %arg11[%c0_227, %c0_228], %446 {strides = array<i32>} : memref<8x128xf32, #tpu.memory_space<vmem>>, vector<8x128xf32>,
    %c0_229 = arith.constant 0 : index
    %c0_230 = arith.constant 0 : index
    %450 = vector.load %arg10[%c0_229, %c0_230] : memref<8x128xf32, #tpu.memory_space<vmem>>, vector<8x128xf32>
    tpu.vector_store %arg10[%c0_229, %c0_230], %448 {strides = array<i32>} : memref<8x128xf32, #tpu.memory_space<vmem>>, vector<8x128xf32>,
    %451 = arith.index_cast %c2_i32_214 : i32 to index
    %c0_231 = arith.constant 0 : index
    %c0_232 = arith.constant 0 : index
    %452 = vector.load %arg7[%451, %c0_231, %c0_232] : memref<8x8x128xf32, #tpu.memory_space<vmem>>, vector<1x8x128xf32>
    %453 = vector.shape_cast %452 : vector<1x8x128xf32> to vector<8x128xf32>
    %454 = vector.shape_cast %448 : vector<8x128xf32> to vector<1x8x128xf32>
    tpu.vector_store %arg7[%451, %c0_231, %c0_232], %454 {strides = array<i32>} : memref<8x8x128xf32, #tpu.memory_space<vmem>>, vector<1x8x128xf32>,
    %c3_i32_233 = arith.constant 3 : i32
    %455 = arith.index_cast %c3_i32_233 : i32 to index
    %c0_234 = arith.constant 0 : index
    %c0_235 = arith.constant 0 : index
    %456 = vector.load %arg8[%455, %c0_234, %c0_235] : memref<8x8x512xf32, #tpu.memory_space<vmem>>, vector<1x8x512xf32>
    %457 = vector.shape_cast %456 : vector<1x8x512xf32> to vector<8x512xf32>
    %c0_236 = arith.constant 0 : index
    %c0_237 = arith.constant 0 : index
    %458 = vector.load %arg10[%c0_236, %c0_237] : memref<8x128xf32, #tpu.memory_space<vmem>>, vector<8x128xf32>
    %c0_238 = arith.constant 0 : index
    %c0_239 = arith.constant 0 : index
    %459 = vector.load %arg5[%c0_238, %c0_239] : memref<128x512xf32, #tpu.memory_space<vmem>>, vector<128x512xf32>
    %cst_240 = arith.constant dense<0.000000e+00> : vector<8x512xf32>
    %460 = tpu.matmul %458, %459, %cst_240 {dimension_numbers = #tpu.dot_dimension_numbers<[1], [0], [0], [1], [0, 0, 1, 1], [], []>} : vector<8x128xf32>, vector<128x512xf32>, vector<8x512xf32> -> vector<8x512xf32>
    %461 = arith.addf %457, %460 : vector<8x512xf32>
    %462 = vector.extract_strided_slice %461 {offsets = [0, 0], sizes = [8, 128], strides = [1, 1]} : vector<8x512xf32> to vector<8x128xf32>
    %463 = arith.negf %462 : vector<8x128xf32>
    %464 = math.exp %463 : vector<8x128xf32>
    %cst_241 = arith.constant 1.000000e+00 : f32
    %465 = vector.broadcast %cst_241 : f32 to vector<8x128xf32>
    %466 = arith.addf %465, %464 : vector<8x128xf32>
    %467 = arith.divf %465, %466 : vector<8x128xf32>
    %468 = vector.extract_strided_slice %461 {offsets = [0, 128], sizes = [8, 128], strides = [1, 1]} : vector<8x512xf32> to vector<8x128xf32>
    %469 = arith.negf %468 : vector<8x128xf32>
    %470 = math.exp %469 : vector<8x128xf32>
    %cst_242 = arith.constant 1.000000e+00 : f32
    %471 = vector.broadcast %cst_242 : f32 to vector<8x128xf32>
    %472 = arith.addf %471, %470 : vector<8x128xf32>
    %473 = arith.divf %471, %472 : vector<8x128xf32>
    %474 = vector.extract_strided_slice %461 {offsets = [0, 256], sizes = [8, 128], strides = [1, 1]} : vector<8x512xf32> to vector<8x128xf32>
    %475 = math.tanh %474 : vector<8x128xf32>
    %476 = vector.extract_strided_slice %461 {offsets = [0, 384], sizes = [8, 128], strides = [1, 1]} : vector<8x512xf32> to vector<8x128xf32>
    %477 = arith.negf %476 : vector<8x128xf32>
    %478 = math.exp %477 : vector<8x128xf32>
    %cst_243 = arith.constant 1.000000e+00 : f32
    %479 = vector.broadcast %cst_243 : f32 to vector<8x128xf32>
    %480 = arith.addf %479, %478 : vector<8x128xf32>
    %481 = arith.divf %479, %480 : vector<8x128xf32>
    %c0_244 = arith.constant 0 : index
    %c0_245 = arith.constant 0 : index
    %482 = vector.load %arg11[%c0_244, %c0_245] : memref<8x128xf32, #tpu.memory_space<vmem>>, vector<8x128xf32>
    %483 = arith.mulf %473, %482 : vector<8x128xf32>
    %484 = arith.mulf %467, %475 : vector<8x128xf32>
    %485 = arith.addf %483, %484 : vector<8x128xf32>
    %486 = math.tanh %485 : vector<8x128xf32>
    %487 = arith.mulf %481, %486 : vector<8x128xf32>
    %c0_246 = arith.constant 0 : index
    %c0_247 = arith.constant 0 : index
    %488 = vector.load %arg11[%c0_246, %c0_247] : memref<8x128xf32, #tpu.memory_space<vmem>>, vector<8x128xf32>
    tpu.vector_store %arg11[%c0_246, %c0_247], %485 {strides = array<i32>} : memref<8x128xf32, #tpu.memory_space<vmem>>, vector<8x128xf32>,
    %c0_248 = arith.constant 0 : index
    %c0_249 = arith.constant 0 : index
    %489 = vector.load %arg10[%c0_248, %c0_249] : memref<8x128xf32, #tpu.memory_space<vmem>>, vector<8x128xf32>
    tpu.vector_store %arg10[%c0_248, %c0_249], %487 {strides = array<i32>} : memref<8x128xf32, #tpu.memory_space<vmem>>, vector<8x128xf32>,
    %490 = arith.index_cast %c3_i32_233 : i32 to index
    %c0_250 = arith.constant 0 : index
    %c0_251 = arith.constant 0 : index
    %491 = vector.load %arg7[%490, %c0_250, %c0_251] : memref<8x8x128xf32, #tpu.memory_space<vmem>>, vector<1x8x128xf32>
    %492 = vector.shape_cast %491 : vector<1x8x128xf32> to vector<8x128xf32>
    %493 = vector.shape_cast %487 : vector<8x128xf32> to vector<1x8x128xf32>
    tpu.vector_store %arg7[%490, %c0_250, %c0_251], %493 {strides = array<i32>} : memref<8x8x128xf32, #tpu.memory_space<vmem>>, vector<1x8x128xf32>,
    %c4_i32_252 = arith.constant 4 : i32
    %494 = arith.index_cast %c4_i32_252 : i32 to index
    %c0_253 = arith.constant 0 : index
    %c0_254 = arith.constant 0 : index
    %495 = vector.load %arg8[%494, %c0_253, %c0_254] : memref<8x8x512xf32, #tpu.memory_space<vmem>>, vector<1x8x512xf32>
    %496 = vector.shape_cast %495 : vector<1x8x512xf32> to vector<8x512xf32>
    %c0_255 = arith.constant 0 : index
    %c0_256 = arith.constant 0 : index
    %497 = vector.load %arg10[%c0_255, %c0_256] : memref<8x128xf32, #tpu.memory_space<vmem>>, vector<8x128xf32>
    %c0_257 = arith.constant 0 : index
    %c0_258 = arith.constant 0 : index
    %498 = vector.load %arg5[%c0_257, %c0_258] : memref<128x512xf32, #tpu.memory_space<vmem>>, vector<128x512xf32>
    %cst_259 = arith.constant dense<0.000000e+00> : vector<8x512xf32>
    %499 = tpu.matmul %497, %498, %cst_259 {dimension_numbers = #tpu.dot_dimension_numbers<[1], [0], [0], [1], [0, 0, 1, 1], [], []>} : vector<8x128xf32>, vector<128x512xf32>, vector<8x512xf32> -> vector<8x512xf32>
    %500 = arith.addf %496, %499 : vector<8x512xf32>
    %501 = vector.extract_strided_slice %500 {offsets = [0, 0], sizes = [8, 128], strides = [1, 1]} : vector<8x512xf32> to vector<8x128xf32>
    %502 = arith.negf %501 : vector<8x128xf32>
    %503 = math.exp %502 : vector<8x128xf32>
    %cst_260 = arith.constant 1.000000e+00 : f32
    %504 = vector.broadcast %cst_260 : f32 to vector<8x128xf32>
    %505 = arith.addf %504, %503 : vector<8x128xf32>
    %506 = arith.divf %504, %505 : vector<8x128xf32>
    %507 = vector.extract_strided_slice %500 {offsets = [0, 128], sizes = [8, 128], strides = [1, 1]} : vector<8x512xf32> to vector<8x128xf32>
    %508 = arith.negf %507 : vector<8x128xf32>
    %509 = math.exp %508 : vector<8x128xf32>
    %cst_261 = arith.constant 1.000000e+00 : f32
    %510 = vector.broadcast %cst_261 : f32 to vector<8x128xf32>
    %511 = arith.addf %510, %509 : vector<8x128xf32>
    %512 = arith.divf %510, %511 : vector<8x128xf32>
    %513 = vector.extract_strided_slice %500 {offsets = [0, 256], sizes = [8, 128], strides = [1, 1]} : vector<8x512xf32> to vector<8x128xf32>
    %514 = math.tanh %513 : vector<8x128xf32>
    %515 = vector.extract_strided_slice %500 {offsets = [0, 384], sizes = [8, 128], strides = [1, 1]} : vector<8x512xf32> to vector<8x128xf32>
    %516 = arith.negf %515 : vector<8x128xf32>
    %517 = math.exp %516 : vector<8x128xf32>
    %cst_262 = arith.constant 1.000000e+00 : f32
    %518 = vector.broadcast %cst_262 : f32 to vector<8x128xf32>
    %519 = arith.addf %518, %517 : vector<8x128xf32>
    %520 = arith.divf %518, %519 : vector<8x128xf32>
    %c0_263 = arith.constant 0 : index
    %c0_264 = arith.constant 0 : index
    %521 = vector.load %arg11[%c0_263, %c0_264] : memref<8x128xf32, #tpu.memory_space<vmem>>, vector<8x128xf32>
    %522 = arith.mulf %512, %521 : vector<8x128xf32>
    %523 = arith.mulf %506, %514 : vector<8x128xf32>
    %524 = arith.addf %522, %523 : vector<8x128xf32>
    %525 = math.tanh %524 : vector<8x128xf32>
    %526 = arith.mulf %520, %525 : vector<8x128xf32>
    %c0_265 = arith.constant 0 : index
    %c0_266 = arith.constant 0 : index
    %527 = vector.load %arg11[%c0_265, %c0_266] : memref<8x128xf32, #tpu.memory_space<vmem>>, vector<8x128xf32>
    tpu.vector_store %arg11[%c0_265, %c0_266], %524 {strides = array<i32>} : memref<8x128xf32, #tpu.memory_space<vmem>>, vector<8x128xf32>,
    %c0_267 = arith.constant 0 : index
    %c0_268 = arith.constant 0 : index
    %528 = vector.load %arg10[%c0_267, %c0_268] : memref<8x128xf32, #tpu.memory_space<vmem>>, vector<8x128xf32>
    tpu.vector_store %arg10[%c0_267, %c0_268], %526 {strides = array<i32>} : memref<8x128xf32, #tpu.memory_space<vmem>>, vector<8x128xf32>,
    %529 = arith.index_cast %c4_i32_252 : i32 to index
    %c0_269 = arith.constant 0 : index
    %c0_270 = arith.constant 0 : index
    %530 = vector.load %arg7[%529, %c0_269, %c0_270] : memref<8x8x128xf32, #tpu.memory_space<vmem>>, vector<1x8x128xf32>
    %531 = vector.shape_cast %530 : vector<1x8x128xf32> to vector<8x128xf32>
    %532 = vector.shape_cast %526 : vector<8x128xf32> to vector<1x8x128xf32>
    tpu.vector_store %arg7[%529, %c0_269, %c0_270], %532 {strides = array<i32>} : memref<8x8x128xf32, #tpu.memory_space<vmem>>, vector<1x8x128xf32>,
    %c5_i32_271 = arith.constant 5 : i32
    %533 = arith.index_cast %c5_i32_271 : i32 to index
    %c0_272 = arith.constant 0 : index
    %c0_273 = arith.constant 0 : index
    %534 = vector.load %arg8[%533, %c0_272, %c0_273] : memref<8x8x512xf32, #tpu.memory_space<vmem>>, vector<1x8x512xf32>
    %535 = vector.shape_cast %534 : vector<1x8x512xf32> to vector<8x512xf32>
    %c0_274 = arith.constant 0 : index
    %c0_275 = arith.constant 0 : index
    %536 = vector.load %arg10[%c0_274, %c0_275] : memref<8x128xf32, #tpu.memory_space<vmem>>, vector<8x128xf32>
    %c0_276 = arith.constant 0 : index
    %c0_277 = arith.constant 0 : index
    %537 = vector.load %arg5[%c0_276, %c0_277] : memref<128x512xf32, #tpu.memory_space<vmem>>, vector<128x512xf32>
    %cst_278 = arith.constant dense<0.000000e+00> : vector<8x512xf32>
    %538 = tpu.matmul %536, %537, %cst_278 {dimension_numbers = #tpu.dot_dimension_numbers<[1], [0], [0], [1], [0, 0, 1, 1], [], []>} : vector<8x128xf32>, vector<128x512xf32>, vector<8x512xf32> -> vector<8x512xf32>
    %539 = arith.addf %535, %538 : vector<8x512xf32>
    %540 = vector.extract_strided_slice %539 {offsets = [0, 0], sizes = [8, 128], strides = [1, 1]} : vector<8x512xf32> to vector<8x128xf32>
    %541 = arith.negf %540 : vector<8x128xf32>
    %542 = math.exp %541 : vector<8x128xf32>
    %cst_279 = arith.constant 1.000000e+00 : f32
    %543 = vector.broadcast %cst_279 : f32 to vector<8x128xf32>
    %544 = arith.addf %543, %542 : vector<8x128xf32>
    %545 = arith.divf %543, %544 : vector<8x128xf32>
    %546 = vector.extract_strided_slice %539 {offsets = [0, 128], sizes = [8, 128], strides = [1, 1]} : vector<8x512xf32> to vector<8x128xf32>
    %547 = arith.negf %546 : vector<8x128xf32>
    %548 = math.exp %547 : vector<8x128xf32>
    %cst_280 = arith.constant 1.000000e+00 : f32
    %549 = vector.broadcast %cst_280 : f32 to vector<8x128xf32>
    %550 = arith.addf %549, %548 : vector<8x128xf32>
    %551 = arith.divf %549, %550 : vector<8x128xf32>
    %552 = vector.extract_strided_slice %539 {offsets = [0, 256], sizes = [8, 128], strides = [1, 1]} : vector<8x512xf32> to vector<8x128xf32>
    %553 = math.tanh %552 : vector<8x128xf32>
    %554 = vector.extract_strided_slice %539 {offsets = [0, 384], sizes = [8, 128], strides = [1, 1]} : vector<8x512xf32> to vector<8x128xf32>
    %555 = arith.negf %554 : vector<8x128xf32>
    %556 = math.exp %555 : vector<8x128xf32>
    %cst_281 = arith.constant 1.000000e+00 : f32
    %557 = vector.broadcast %cst_281 : f32 to vector<8x128xf32>
    %558 = arith.addf %557, %556 : vector<8x128xf32>
    %559 = arith.divf %557, %558 : vector<8x128xf32>
    %c0_282 = arith.constant 0 : index
    %c0_283 = arith.constant 0 : index
    %560 = vector.load %arg11[%c0_282, %c0_283] : memref<8x128xf32, #tpu.memory_space<vmem>>, vector<8x128xf32>
    %561 = arith.mulf %551, %560 : vector<8x128xf32>
    %562 = arith.mulf %545, %553 : vector<8x128xf32>
    %563 = arith.addf %561, %562 : vector<8x128xf32>
    %564 = math.tanh %563 : vector<8x128xf32>
    %565 = arith.mulf %559, %564 : vector<8x128xf32>
    %c0_284 = arith.constant 0 : index
    %c0_285 = arith.constant 0 : index
    %566 = vector.load %arg11[%c0_284, %c0_285] : memref<8x128xf32, #tpu.memory_space<vmem>>, vector<8x128xf32>
    tpu.vector_store %arg11[%c0_284, %c0_285], %563 {strides = array<i32>} : memref<8x128xf32, #tpu.memory_space<vmem>>, vector<8x128xf32>,
    %c0_286 = arith.constant 0 : index
    %c0_287 = arith.constant 0 : index
    %567 = vector.load %arg10[%c0_286, %c0_287] : memref<8x128xf32, #tpu.memory_space<vmem>>, vector<8x128xf32>
    tpu.vector_store %arg10[%c0_286, %c0_287], %565 {strides = array<i32>} : memref<8x128xf32, #tpu.memory_space<vmem>>, vector<8x128xf32>,
    %568 = arith.index_cast %c5_i32_271 : i32 to index
    %c0_288 = arith.constant 0 : index
    %c0_289 = arith.constant 0 : index
    %569 = vector.load %arg7[%568, %c0_288, %c0_289] : memref<8x8x128xf32, #tpu.memory_space<vmem>>, vector<1x8x128xf32>
    %570 = vector.shape_cast %569 : vector<1x8x128xf32> to vector<8x128xf32>
    %571 = vector.shape_cast %565 : vector<8x128xf32> to vector<1x8x128xf32>
    tpu.vector_store %arg7[%568, %c0_288, %c0_289], %571 {strides = array<i32>} : memref<8x8x128xf32, #tpu.memory_space<vmem>>, vector<1x8x128xf32>,
    %c6_i32_290 = arith.constant 6 : i32
    %572 = arith.index_cast %c6_i32_290 : i32 to index
    %c0_291 = arith.constant 0 : index
    %c0_292 = arith.constant 0 : index
    %573 = vector.load %arg8[%572, %c0_291, %c0_292] : memref<8x8x512xf32, #tpu.memory_space<vmem>>, vector<1x8x512xf32>
    %574 = vector.shape_cast %573 : vector<1x8x512xf32> to vector<8x512xf32>
    %c0_293 = arith.constant 0 : index
    %c0_294 = arith.constant 0 : index
    %575 = vector.load %arg10[%c0_293, %c0_294] : memref<8x128xf32, #tpu.memory_space<vmem>>, vector<8x128xf32>
    %c0_295 = arith.constant 0 : index
    %c0_296 = arith.constant 0 : index
    %576 = vector.load %arg5[%c0_295, %c0_296] : memref<128x512xf32, #tpu.memory_space<vmem>>, vector<128x512xf32>
    %cst_297 = arith.constant dense<0.000000e+00> : vector<8x512xf32>
    %577 = tpu.matmul %575, %576, %cst_297 {dimension_numbers = #tpu.dot_dimension_numbers<[1], [0], [0], [1], [0, 0, 1, 1], [], []>} : vector<8x128xf32>, vector<128x512xf32>, vector<8x512xf32> -> vector<8x512xf32>
    %578 = arith.addf %574, %577 : vector<8x512xf32>
    %579 = vector.extract_strided_slice %578 {offsets = [0, 0], sizes = [8, 128], strides = [1, 1]} : vector<8x512xf32> to vector<8x128xf32>
    %580 = arith.negf %579 : vector<8x128xf32>
    %581 = math.exp %580 : vector<8x128xf32>
    %cst_298 = arith.constant 1.000000e+00 : f32
    %582 = vector.broadcast %cst_298 : f32 to vector<8x128xf32>
    %583 = arith.addf %582, %581 : vector<8x128xf32>
    %584 = arith.divf %582, %583 : vector<8x128xf32>
    %585 = vector.extract_strided_slice %578 {offsets = [0, 128], sizes = [8, 128], strides = [1, 1]} : vector<8x512xf32> to vector<8x128xf32>
    %586 = arith.negf %585 : vector<8x128xf32>
    %587 = math.exp %586 : vector<8x128xf32>
    %cst_299 = arith.constant 1.000000e+00 : f32
    %588 = vector.broadcast %cst_299 : f32 to vector<8x128xf32>
    %589 = arith.addf %588, %587 : vector<8x128xf32>
    %590 = arith.divf %588, %589 : vector<8x128xf32>
    %591 = vector.extract_strided_slice %578 {offsets = [0, 256], sizes = [8, 128], strides = [1, 1]} : vector<8x512xf32> to vector<8x128xf32>
    %592 = math.tanh %591 : vector<8x128xf32>
    %593 = vector.extract_strided_slice %578 {offsets = [0, 384], sizes = [8, 128], strides = [1, 1]} : vector<8x512xf32> to vector<8x128xf32>
    %594 = arith.negf %593 : vector<8x128xf32>
    %595 = math.exp %594 : vector<8x128xf32>
    %cst_300 = arith.constant 1.000000e+00 : f32
    %596 = vector.broadcast %cst_300 : f32 to vector<8x128xf32>
    %597 = arith.addf %596, %595 : vector<8x128xf32>
    %598 = arith.divf %596, %597 : vector<8x128xf32>
    %c0_301 = arith.constant 0 : index
    %c0_302 = arith.constant 0 : index
    %599 = vector.load %arg11[%c0_301, %c0_302] : memref<8x128xf32, #tpu.memory_space<vmem>>, vector<8x128xf32>
    %600 = arith.mulf %590, %599 : vector<8x128xf32>
    %601 = arith.mulf %584, %592 : vector<8x128xf32>
    %602 = arith.addf %600, %601 : vector<8x128xf32>
    %603 = math.tanh %602 : vector<8x128xf32>
    %604 = arith.mulf %598, %603 : vector<8x128xf32>
    %c0_303 = arith.constant 0 : index
    %c0_304 = arith.constant 0 : index
    %605 = vector.load %arg11[%c0_303, %c0_304] : memref<8x128xf32, #tpu.memory_space<vmem>>, vector<8x128xf32>
    tpu.vector_store %arg11[%c0_303, %c0_304], %602 {strides = array<i32>} : memref<8x128xf32, #tpu.memory_space<vmem>>, vector<8x128xf32>,
    %c0_305 = arith.constant 0 : index
    %c0_306 = arith.constant 0 : index
    %606 = vector.load %arg10[%c0_305, %c0_306] : memref<8x128xf32, #tpu.memory_space<vmem>>, vector<8x128xf32>
    tpu.vector_store %arg10[%c0_305, %c0_306], %604 {strides = array<i32>} : memref<8x128xf32, #tpu.memory_space<vmem>>, vector<8x128xf32>,
    %607 = arith.index_cast %c6_i32_290 : i32 to index
    %c0_307 = arith.constant 0 : index
    %c0_308 = arith.constant 0 : index
    %608 = vector.load %arg7[%607, %c0_307, %c0_308] : memref<8x8x128xf32, #tpu.memory_space<vmem>>, vector<1x8x128xf32>
    %609 = vector.shape_cast %608 : vector<1x8x128xf32> to vector<8x128xf32>
    %610 = vector.shape_cast %604 : vector<8x128xf32> to vector<1x8x128xf32>
    tpu.vector_store %arg7[%607, %c0_307, %c0_308], %610 {strides = array<i32>} : memref<8x8x128xf32, #tpu.memory_space<vmem>>, vector<1x8x128xf32>,
    %c7_i32_309 = arith.constant 7 : i32
    %611 = arith.index_cast %c7_i32_309 : i32 to index
    %c0_310 = arith.constant 0 : index
    %c0_311 = arith.constant 0 : index
    %612 = vector.load %arg8[%611, %c0_310, %c0_311] : memref<8x8x512xf32, #tpu.memory_space<vmem>>, vector<1x8x512xf32>
    %613 = vector.shape_cast %612 : vector<1x8x512xf32> to vector<8x512xf32>
    %c0_312 = arith.constant 0 : index
    %c0_313 = arith.constant 0 : index
    %614 = vector.load %arg10[%c0_312, %c0_313] : memref<8x128xf32, #tpu.memory_space<vmem>>, vector<8x128xf32>
    %c0_314 = arith.constant 0 : index
    %c0_315 = arith.constant 0 : index
    %615 = vector.load %arg5[%c0_314, %c0_315] : memref<128x512xf32, #tpu.memory_space<vmem>>, vector<128x512xf32>
    %cst_316 = arith.constant dense<0.000000e+00> : vector<8x512xf32>
    %616 = tpu.matmul %614, %615, %cst_316 {dimension_numbers = #tpu.dot_dimension_numbers<[1], [0], [0], [1], [0, 0, 1, 1], [], []>} : vector<8x128xf32>, vector<128x512xf32>, vector<8x512xf32> -> vector<8x512xf32>
    %617 = arith.addf %613, %616 : vector<8x512xf32>
    %618 = vector.extract_strided_slice %617 {offsets = [0, 0], sizes = [8, 128], strides = [1, 1]} : vector<8x512xf32> to vector<8x128xf32>
    %619 = arith.negf %618 : vector<8x128xf32>
    %620 = math.exp %619 : vector<8x128xf32>
    %cst_317 = arith.constant 1.000000e+00 : f32
    %621 = vector.broadcast %cst_317 : f32 to vector<8x128xf32>
    %622 = arith.addf %621, %620 : vector<8x128xf32>
    %623 = arith.divf %621, %622 : vector<8x128xf32>
    %624 = vector.extract_strided_slice %617 {offsets = [0, 128], sizes = [8, 128], strides = [1, 1]} : vector<8x512xf32> to vector<8x128xf32>
    %625 = arith.negf %624 : vector<8x128xf32>
    %626 = math.exp %625 : vector<8x128xf32>
    %cst_318 = arith.constant 1.000000e+00 : f32
    %627 = vector.broadcast %cst_318 : f32 to vector<8x128xf32>
    %628 = arith.addf %627, %626 : vector<8x128xf32>
    %629 = arith.divf %627, %628 : vector<8x128xf32>
    %630 = vector.extract_strided_slice %617 {offsets = [0, 256], sizes = [8, 128], strides = [1, 1]} : vector<8x512xf32> to vector<8x128xf32>
    %631 = math.tanh %630 : vector<8x128xf32>
    %632 = vector.extract_strided_slice %617 {offsets = [0, 384], sizes = [8, 128], strides = [1, 1]} : vector<8x512xf32> to vector<8x128xf32>
    %633 = arith.negf %632 : vector<8x128xf32>
    %634 = math.exp %633 : vector<8x128xf32>
    %cst_319 = arith.constant 1.000000e+00 : f32
    %635 = vector.broadcast %cst_319 : f32 to vector<8x128xf32>
    %636 = arith.addf %635, %634 : vector<8x128xf32>
    %637 = arith.divf %635, %636 : vector<8x128xf32>
    %c0_320 = arith.constant 0 : index
    %c0_321 = arith.constant 0 : index
    %638 = vector.load %arg11[%c0_320, %c0_321] : memref<8x128xf32, #tpu.memory_space<vmem>>, vector<8x128xf32>
    %639 = arith.mulf %629, %638 : vector<8x128xf32>
    %640 = arith.mulf %623, %631 : vector<8x128xf32>
    %641 = arith.addf %639, %640 : vector<8x128xf32>
    %642 = math.tanh %641 : vector<8x128xf32>
    %643 = arith.mulf %637, %642 : vector<8x128xf32>
    %c0_322 = arith.constant 0 : index
    %c0_323 = arith.constant 0 : index
    %644 = vector.load %arg11[%c0_322, %c0_323] : memref<8x128xf32, #tpu.memory_space<vmem>>, vector<8x128xf32>
    tpu.vector_store %arg11[%c0_322, %c0_323], %641 {strides = array<i32>} : memref<8x128xf32, #tpu.memory_space<vmem>>, vector<8x128xf32>,
    %c0_324 = arith.constant 0 : index
    %c0_325 = arith.constant 0 : index
    %645 = vector.load %arg10[%c0_324, %c0_325] : memref<8x128xf32, #tpu.memory_space<vmem>>, vector<8x128xf32>
    tpu.vector_store %arg10[%c0_324, %c0_325], %643 {strides = array<i32>} : memref<8x128xf32, #tpu.memory_space<vmem>>, vector<8x128xf32>,
    %646 = arith.index_cast %c7_i32_309 : i32 to index
    %c0_326 = arith.constant 0 : index
    %c0_327 = arith.constant 0 : index
    %647 = vector.load %arg7[%646, %c0_326, %c0_327] : memref<8x8x128xf32, #tpu.memory_space<vmem>>, vector<1x8x128xf32>
    %648 = vector.shape_cast %647 : vector<1x8x128xf32> to vector<8x128xf32>
    %649 = vector.shape_cast %643 : vector<8x128xf32> to vector<1x8x128xf32>
    tpu.vector_store %arg7[%646, %c0_326, %c0_327], %649 {strides = array<i32>} : memref<8x8x128xf32, #tpu.memory_space<vmem>>, vector<1x8x128xf32>,
    %c8_i32_328 = arith.constant 8 : i32
    return
  }
}

</mosaic_0001>

<bundles_post_ra>
// kernel: elmo_forward.3
= control target key start
LH: loop header
LB: loop body
LE: loop exit
PB: predicated region body
PF: predicated region fallthrough
CT: control target
= control target key end

     0   :  { %s453_s1 = inlined_call_operand.vmem [shape: f32[128,128], index: 1, kind: input, shape index: {}]   ;;  %s454_s0 = inlined_call_operand.vmem [shape: f32[64,128], index: 0, kind: input, shape index: {}]   ;;  %s455_s2 = inlined_call_operand.vmem [shape: f32[1,128], index: 2, kind: input, shape index: {}]   ;;  %s456_s3 = inlined_call_operand.vmem [shape: f32[64,128], index: 3, kind: output, shape index: {}]  }
   0x1   :  { %v42_v0 = vld [vmem:[%s453_s1] sm:$0xff]  ;;  %v43_v1 = vld [vmem:[%s453_s1 + $0x8] sm:$0xff]  ;;  %v44_v2 = vld [vmem:[%s453_s1 + $0x10] sm:$0xff] }
   0x2   :  { %v286_v3 = vpack.c.bf16 %v43_v1, %v42_v0  ;;  %v45_v4 = vld [vmem:[%s453_s1 + $0x18] sm:$0xff]  ;;  %v46_v6 = vld [vmem:[%s453_s1 + $0x20] sm:$0xff]  ;;  %v47_v7 = vld [vmem:[%s453_s1 + $0x28] sm:$0xff] }
   0x3   :  { %v290_v5 = vpack.c.bf16 %v45_v4, %v44_v2  ;;  %v294_v8 = vpack.c.bf16 %v47_v7, %v46_v6  ;;  %v34_v9 = vld [vmem:[%s454_s0] sm:$0xff]  ;;  %v48_v11 = vld [vmem:[%s453_s1 + $0x30] sm:$0xff]  ;;  %v49_v12 = vld [vmem:[%s453_s1 + $0x38] sm:$0xff] }
   0x4   :  { %287 = vmatprep.subr.bf16.mxu0 %v286_v3  ;;  %318 = vmatprep.subr.bf16.mxu1 %v286_v3  ;;  %v38_v10 = vld [vmem:[%s454_s0 + $0x20] sm:$0xff]  ;;  %v298_v13 = vpack.c.bf16 %v49_v12, %v48_v11  ;;  %v51_v15 = vld [vmem:[%s453_s1 + $0x48] sm:$0xff]  ;;  %v52_v17 = vld [vmem:[%s453_s1 + $0x50] sm:$0xff] }
   0x5   :  { %289 = vmatpush3.bf16.msra.mxu0 %v286_v3  ;;  %326 = vmatpush3.bf16.msra.mxu1 %v286_v3  ;;  %v50_v14 = vld [vmem:[%s453_s1 + $0x40] sm:$0xff]  ;;  %v53_v18 = vld [vmem:[%s453_s1 + $0x58] sm:$0xff]  ;;  %v55_v21 = vld [vmem:[%s453_s1 + $0x68] sm:$0xff] }
   0x6   :  { %291 = vmatprep.subr.bf16.mxu0 %v290_v5  ;;  %319 = vmatprep.subr.bf16.mxu1 %v290_v5  ;;  %v302_v16 = vpack.c.bf16 %v51_v15, %v50_v14  ;;  %v306_v19 = vpack.c.bf16 %v53_v18, %v52_v17  ;;  %v54_v20 = vld [vmem:[%s453_s1 + $0x60] sm:$0xff]  ;;  %v56_v23 = vld [vmem:[%s453_s1 + $0x70] sm:$0xff]  ;;  %v57_v24 = vld [vmem:[%s453_s1 + $0x78] sm:$0xff] }
   0x7   :  { %274 = vmatprep.mubr.f32.mxu0 %v34_v9  ;;  %280 = vmatprep.mubr.f32.mxu1 %v38_v10  ;;  %v310_v22 = vpack.c.bf16 %v55_v21, %v54_v20  ;;  %v314_v25 = vpack.c.bf16 %v57_v24, %v56_v23  ;;  %v35_v26 = vld [vmem:[%s454_s0 + $0x8] sm:$0xff]  ;;  %v36_v28 = vld [vmem:[%s454_s0 + $0x10] sm:$0xff]  ;;  %v37_v30 = vld [vmem:[%s454_s0 + $0x18] sm:$0xff] }
   0x8   :  { %v39_v27 = vld [vmem:[%s454_s0 + $0x28] sm:$0xff]  ;;  %v40_v29 = vld [vmem:[%s454_s0 + $0x30] sm:$0xff]  ;;  %v41_v31 = vld [vmem:[%s454_s0 + $0x38] sm:$0xff] }
   0x9   :  { %293 = vmatpush3.bf16.msra.mxu0 %v290_v5  ;;  %327 = vmatpush3.bf16.msra.mxu1 %v290_v5  ;;  %v217_v32 = vld [vmem:[%s455_s2] ss:$0 sm:$0xff] }
   0xa   :  { %295 = vmatprep.subr.bf16.mxu0 %v294_v8  ;;  %320 = vmatprep.subr.bf16.mxu1 %v294_v8 }
   0xd   :  { %297 = vmatpush3.bf16.msra.mxu0 %v294_v8  ;;  %328 = vmatpush3.bf16.msra.mxu1 %v294_v8 }
   0xe   :  { %299 = vmatprep.subr.bf16.mxu0 %v298_v13  ;;  %321 = vmatprep.subr.bf16.mxu1 %v298_v13 }
  0x11   :  { %301 = vmatpush3.bf16.msra.mxu0 %v298_v13  ;;  %329 = vmatpush3.bf16.msra.mxu1 %v298_v13 }
  0x12   :  { %303 = vmatprep.subr.bf16.mxu0 %v302_v16  ;;  %322 = vmatprep.subr.bf16.mxu1 %v302_v16 }
  0x15   :  { %305 = vmatpush3.bf16.msra.mxu0 %v302_v16  ;;  %330 = vmatpush3.bf16.msra.mxu1 %v302_v16 }
  0x16   :  { %307 = vmatprep.subr.bf16.mxu0 %v306_v19  ;;  %323 = vmatprep.subr.bf16.mxu1 %v306_v19 }
  0x19   :  { %309 = vmatpush3.bf16.msra.mxu0 %v306_v19  ;;  %331 = vmatpush3.bf16.msra.mxu1 %v306_v19 }
  0x1a   :  { %311 = vmatprep.subr.bf16.mxu0 %v310_v22  ;;  %324 = vmatprep.subr.bf16.mxu1 %v310_v22 }
  0x1d   :  { %313 = vmatpush3.bf16.msra.mxu0 %v310_v22  ;;  %332 = vmatpush3.bf16.msra.mxu1 %v310_v22 }
  0x1e   :  { %315 = vmatprep.subr.bf16.mxu0 %v314_v25  ;;  %325 = vmatprep.subr.bf16.mxu1 %v314_v25 }
  0x21   :  { %317 = vmatpush3.bf16.msra.mxu0 %v314_v25  ;;  %333 = vmatpush3.bf16.msra.mxu1 %v314_v25 }
  0x24   :  { %275 = vmatmul.mubr.f32.vlgmr.msra.gmra.mrb[0].mxu0 %v35_v26  ;;  %281 = vmatmul.mubr.f32.vlgmr.msra.gmra.mrb[0].mxu1 %v39_v27 }
  0x25   :  { %277 = vmatprep.mubr.f32.mxu0 %v36_v28  ;;  %283 = vmatprep.mubr.f32.mxu1 %v40_v29 }
  0x28   :  { %278 = vmatmul.mubr.f32.gmra.mrb[2].mxu0 %v37_v30  ;;  %284 = vmatmul.mubr.f32.gmra.mrb[2].mxu1 %v41_v31 }
  0xf7   :  { %v276_v33 = vpop.f32.mrb[0].mxu0  ;;  %v282_v34 = vpop.f32.mrb[0].mxu1 }
  0xf8   :  { %v198_v35 = vadd.f32 %v276_v33, %v217_v32  ;;  %v202_v36 = vadd.f32 %v282_v34, %v217_v32  ;;  %v124_v37 = vpop.f32.mrb[1].mxu0  ;;  %v144_v38 = vpop.f32.mrb[1].mxu1 }
  0xf9   :  { %v197_v39 = vadd.f32 %v217_v32, %v124_v37  ;;  %v201_v40 = vadd.f32 %v217_v32, %v144_v38 }
  0xfa   :  { %206 = vst [vmem:[%s456_s3 + $0x8] sm:$0xff] %v198_v35  ;;  %210 = vst [vmem:[%s456_s3 + $0x28] sm:$0xff] %v202_v36 }
  0xfb   :  { %205 = vst [vmem:[%s456_s3] sm:$0xff] %v197_v39  ;;  %209 = vst [vmem:[%s456_s3 + $0x20] sm:$0xff] %v201_v40  ;;  %v279_v41 = vpop.f32.mrb[2].mxu0  ;;  %v285_v42 = vpop.f32.mrb[2].mxu1 }
  0xfc   :  { %v200_v43 = vadd.f32 %v279_v41, %v217_v32  ;;  %v204_v44 = vadd.f32 %v285_v42, %v217_v32  ;;  %v134_v45 = vpop.f32.mrb[3].mxu0  ;;  %v154_v46 = vpop.f32.mrb[3].mxu1 }
  0xfd   :  { %v199_v47 = vadd.f32 %v217_v32, %v134_v45  ;;  %v203_v48 = vadd.f32 %v217_v32, %v154_v46 }
  0xfe   :  { %208 = vst [vmem:[%s456_s3 + $0x18] sm:$0xff] %v200_v43  ;;  %212 = vst [vmem:[%s456_s3 + $0x38] sm:$0xff] %v204_v44 }
  0xff   :  { %207 = vst [vmem:[%s456_s3 + $0x10] sm:$0xff] %v199_v47  ;;  %211 = vst [vmem:[%s456_s3 + $0x30] sm:$0xff] %v203_v48 }

// kernel: elmo_forward.2
= control target key start
LH: loop header
LB: loop body
LE: loop exit
PB: predicated region body
PF: predicated region fallthrough
CT: control target
= control target key end

     0   :  { %v6184_v3 = vmov 0.0   ;;  %vm72_vm0 = vcmask 261120   ;;  %s8375_s1 = inlined_call_operand.vmem [shape: f32[32,512], index: 1, kind: input, shape index: {}]   ;;  %s8376_s2 = inlined_call_operand.vmem [shape: f32[128,512], index: 2, kind: input, shape index: {}]   ;;  %s8377_s0 = inlined_call_operand.vmem [shape: f32[8,8,32], index: 0, kind: input, shape index: {}]   ;;  %s8378_s3 = inlined_call_operand.vmem [shape: f32[1,512], index: 3, kind: input, shape index: {}]   ;;  %s8379_s4 = inlined_call_operand.vmem [shape: f32[128,512], index: 4, kind: input, shape index: {}]   ;;  %s8380_s5 = inlined_call_operand.vmem [shape: f32[128,512], index: 5, kind: input, shape index: {}]   ;;  %s8381_s6 = inlined_call_operand.vmem [shape: f32[1,512], index: 6, kind: input, shape index: {}]   ;;  %s8382_s7 = inlined_call_operand.vmem [shape: f32[8,8,128], index: 7, kind: output, shape index: {}]  }
   0x1   :  { %v35_v0 = vld [vmem:[%s8375_s1 + $0x8] sm:$0xff]  ;;  %v37_v2 = vld [vmem:[%s8375_s1 + $0x18] sm:$0xff]  ;;  %161 = vmatprep.mubr.f32.mxu0 %v6184_v3  ;;  %274 = vmatprep.mubr.f32.mxu1 %v6184_v3  ;;  %v34_v6 = vld [vmem:[%s8375_s1] sm:$0xff] }
   0x2   :  { %v39_v1 = vld [vmem:[%s8375_s1 + $0x28] sm:$0xff]  ;;  %v41_v5 = vld [vmem:[%s8375_s1 + $0x38] sm:$0xff]  ;;  %v38_v7 = vld [vmem:[%s8375_s1 + $0x20] sm:$0xff] }
   0x3   :  { %v4695_v4 = vpack.c.bf16 %v39_v1, %v35_v0  ;;  %v4703_v8 = vpack.c.bf16 %v41_v5, %v37_v2  ;;  %v4697_v9 = vpack.c.bf16 %v38_v7, %v34_v6  ;;  %v36_v10 = vld [vmem:[%s8375_s1 + $0x10] sm:$0xff]  ;;  %v43_v12 = vld [vmem:[%s8375_s1 + $0x48] sm:$0xff]  ;;  %v45_v15 = vld [vmem:[%s8375_s1 + $0x58] sm:$0xff] }
   0x4   :  { %v40_v11 = vld [vmem:[%s8375_s1 + $0x30] sm:$0xff]  ;;  %v47_v14 = vld [vmem:[%s8375_s1 + $0x68] sm:$0xff]  ;;  %v49_v16 = vld [vmem:[%s8375_s1 + $0x78] sm:$0xff] }
   0x5   :  { %4696 = vmatprep.subr.bf16.mxu0 %v4695_v4  ;;  %v4705_v13 = vpack.c.bf16 %v40_v11, %v36_v10  ;;  %4704 = vmatprep.subr.bf16.mxu1 %v4703_v8  ;;  %v4699_v17 = vpack.c.bf16 %v47_v14, %v43_v12  ;;  %v4707_v18 = vpack.c.bf16 %v49_v16, %v45_v15  ;;  %v42_v19 = vld [vmem:[%s8375_s1 + $0x40] sm:$0xff]  ;;  %v44_v21 = vld [vmem:[%s8375_s1 + $0x50] sm:$0xff]  ;;  %v363_v24 = vld [vmem:[%s8376_s2 + $0x8] sm:$0xff] }
   0x6   :  { %4698 = vmatpush1.bf16.msra.mxu0 %v4697_v9  ;;  %v46_v20 = vld [vmem:[%s8375_s1 + $0x60] sm:$0xff]  ;;  %v48_v23 = vld [vmem:[%s8375_s1 + $0x70] sm:$0xff]  ;;  %v367_v26 = vld [vmem:[%s8376_s2 + $0x28] sm:$0xff] }
   0x7   :  { %4706 = vmatpush1.bf16.msra.mxu1 %v4705_v13  ;;  %v4701_v22 = vpack.c.bf16 %v46_v20, %v42_v19  ;;  %4700 = vmatprep.subr.bf16.mxu0 %v4699_v17  ;;  %v4709_v25 = vpack.c.bf16 %v48_v23, %v44_v21  ;;  %v365_v27 = vld [vmem:[%s8376_s2 + $0x18] sm:$0xff]  ;;  %v6287_v29 = vpack.c.bf16 %v367_v26, %v363_v24  ;;  %v362_v31 = vld [vmem:[%s8376_s2] sm:$0xff]  ;;  %v364_v33 = vld [vmem:[%s8376_s2 + $0x10] sm:$0xff] }
   0x8   :  { %4708 = vmatprep.subr.bf16.mxu1 %v4707_v18  ;;  %v369_v28 = vld [vmem:[%s8376_s2 + $0x38] sm:$0xff]  ;;  %v366_v32 = vld [vmem:[%s8376_s2 + $0x20] sm:$0xff]  ;;  %v368_v36 = vld [vmem:[%s8376_s2 + $0x30] sm:$0xff] }
   0x9   :  { %v6289_v30 = vpack.c.bf16 %v369_v28, %v365_v27  ;;  %v26_v34 = vld [vmem:[%s8377_s0] sm:$0xff]  ;;  %v6303_v35 = vpack.c.bf16 %v366_v32, %v362_v31  ;;  %v371_v37 = vld [vmem:[%s8376_s2 + $0x48] sm:$0xff]  ;;  %v6312_v38 = vpack.c.bf16 %v368_v36, %v364_v33  ;;  %v373_v40 = vld [vmem:[%s8376_s2 + $0x58] sm:$0xff] }
   0xa   :  { %4702 = vmatpush1.bf16.msra.mxu0 %v4701_v22  ;;  %v375_v39 = vld [vmem:[%s8376_s2 + $0x68] sm:$0xff]  ;;  %v377_v41 = vld [vmem:[%s8376_s2 + $0x78] sm:$0xff]  ;;  %v370_v43 = vld [vmem:[%s8376_s2 + $0x40] sm:$0xff] }
   0xb   :  { %4710 = vmatpush1.bf16.msra.mxu1 %v4709_v25  ;;  %4712 = vmatprep.subr.bf16.mxu0 %v6287_v29  ;;  %v6324_v42 = vpack.c.bf16 %v375_v39, %v371_v37  ;;  %v374_v44 = vld [vmem:[%s8376_s2 + $0x60] sm:$0xff]  ;;  %v372_v45 = vld [vmem:[%s8376_s2 + $0x50] sm:$0xff]  ;;  %v27_v46 = vld [vmem:[%s8377_s0 + $0x8] sm:$0xff]  ;;  %v6339_v47 = vpack.c.bf16 %v377_v41, %v373_v40 }
   0xc   :  { %4744 = vmatprep.subr.bf16.mxu1 %v6289_v30  ;;  %v376_v48 = vld [vmem:[%s8376_s2 + $0x70] sm:$0xff]  ;;  %v379_v49 = vld [vmem:[%s8376_s2 + $0x88] sm:$0xff]  ;;  %v6349_v50 = vpack.c.bf16 %v374_v44, %v370_v43  ;;  %v381_v52 = vld [vmem:[%s8376_s2 + $0x98] sm:$0xff] }
   0xd   :  { %4624 = vmatmul.mubr.msk.f32.vlgmr.msra.gmra.mrb[0].mxu0 %vm72_vm0, %v26_v34  ;;  %v383_v51 = vld [vmem:[%s8376_s2 + $0xa8] sm:$0xff]  ;;  %v385_v53 = vld [vmem:[%s8376_s2 + $0xb8] sm:$0xff]  ;;  %v6362_v54 = vpack.c.bf16 %v376_v48, %v372_v45  ;;  %v378_v55 = vld [vmem:[%s8376_s2 + $0x80] sm:$0xff] }
   0xe   :  { %4632 = vmatmul.mubr.msk.f32.vlgmr.msra.gmra.mrb[0].mxu1 %vm72_vm0, %v26_v34  ;;  %4714 = vmatpush1.bf16.msra.mxu0 %v6303_v35  ;;  %v382_v56 = vld [vmem:[%s8376_s2 + $0xa0] sm:$0xff]  ;;  %v6372_v57 = vpack.c.bf16 %v383_v51, %v379_v49  ;;  %v380_v58 = vld [vmem:[%s8376_s2 + $0x90] sm:$0xff]  ;;  %v6382_v60 = vpack.c.bf16 %v385_v53, %v381_v52  ;;  %v387_v61 = vld [vmem:[%s8376_s2 + $0xc8] sm:$0xff] }
   0xf   :  { %4746 = vmatpush1.bf16.msra.mxu1 %v6312_v38  ;;  %167 = vmatprep.mubr.f32.mxu0 %v6184_v3  ;;  %v384_v59 = vld [vmem:[%s8376_s2 + $0xb0] sm:$0xff]  ;;  %v391_v62 = vld [vmem:[%s8376_s2 + $0xe8] sm:$0xff]  ;;  %v6395_v0 = vpack.c.bf16 %v382_v56, %v378_v55  ;;  %v389_v1 = vld [vmem:[%s8376_s2 + $0xd8] sm:$0xff] }
  0x10   :  { %280 = vmatprep.mubr.f32.mxu1 %v6184_v3  ;;  %4716 = vmatprep.subr.bf16.mxu0 %v6324_v42  ;;  %v28_v63 = vld [vmem:[%s8377_s0 + $0x10] sm:$0xff]  ;;  %v393_v2 = vld [vmem:[%s8376_s2 + $0xf8] sm:$0xff]  ;;  %v6405_v4 = vpack.c.bf16 %v384_v59, %v380_v58  ;;  %v386_v5 = vld [vmem:[%s8376_s2 + $0xc0] sm:$0xff]  ;;  %v6415_v7 = vpack.c.bf16 %v391_v62, %v387_v61 }
  0x11   :  { %4625 = vmatmul.mubr.msk.f32.gmra.mrb[2].mxu0 %vm72_vm0, %v27_v46  ;;  %4748 = vmatprep.subr.bf16.mxu1 %v6339_v47  ;;  %v390_v6 = vld [vmem:[%s8376_s2 + $0xe0] sm:$0xff]  ;;  %v388_v8 = vld [vmem:[%s8376_s2 + $0xd0] sm:$0xff]  ;;  %v6425_v10 = vpack.c.bf16 %v393_v2, %v389_v1  ;;  %v395_v11 = vld [vmem:[%s8376_s2 + $0x108] sm:$0xff] }
  0x12   :  { %4633 = vmatmul.mubr.msk.f32.gmra.mrb[2].mxu1 %vm72_vm0, %v27_v46  ;;  %4718 = vmatpush1.bf16.msra.mxu0 %v6349_v50  ;;  %v392_v9 = vld [vmem:[%s8376_s2 + $0xf0] sm:$0xff]  ;;  %v399_v12 = vld [vmem:[%s8376_s2 + $0x128] sm:$0xff]  ;;  %v29_v13 = vld [vmem:[%s8377_s0 + $0x18] sm:$0xff]  ;;  %v6438_v14 = vpack.c.bf16 %v390_v6, %v386_v5 }
  0x13   :  { %4750 = vmatpush1.bf16.msra.mxu1 %v6362_v54  ;;  %173 = vmatprep.mubr.f32.mxu0 %v6184_v3  ;;  %v397_v15 = vld [vmem:[%s8376_s2 + $0x118] sm:$0xff]  ;;  %v6448_v17 = vpack.c.bf16 %v392_v9, %v388_v8  ;;  %v394_v18 = vld [vmem:[%s8376_s2 + $0x100] sm:$0xff]  ;;  %v6458_v20 = vpack.c.bf16 %v399_v12, %v395_v11  ;;  %v396_v21 = vld [vmem:[%s8376_s2 + $0x110] sm:$0xff] }
  0x14   :  { %286 = vmatprep.mubr.f32.mxu1 %v6184_v3  ;;  %4720 = vmatprep.subr.bf16.mxu0 %v6372_v57  ;;  %v401_v16 = vld [vmem:[%s8376_s2 + $0x138] sm:$0xff]  ;;  %v398_v19 = vld [vmem:[%s8376_s2 + $0x120] sm:$0xff]  ;;  %v400_v22 = vld [vmem:[%s8376_s2 + $0x130] sm:$0xff] }
  0x15   :  { %4626 = vmatmul.mubr.msk.f32.gmra.mrb[4].mxu0 %vm72_vm0, %v28_v63  ;;  %4752 = vmatprep.subr.bf16.mxu1 %v6382_v60  ;;  %v6468_v23 = vpack.c.bf16 %v401_v16, %v397_v15  ;;  %v403_v24 = vld [vmem:[%s8376_s2 + $0x148] sm:$0xff]  ;;  %v30_v26 = vld [vmem:[%s8377_s0 + $0x20] sm:$0xff]  ;;  %v6481_v27 = vpack.c.bf16 %v398_v19, %v394_v18  ;;  %v405_v28 = vld [vmem:[%s8376_s2 + $0x158] sm:$0xff]  ;;  %v6491_v32 = vpack.c.bf16 %v400_v22, %v396_v21  ;;  %v52_v19 = vlaneseq }
  0x16   :  { %4634 = vmatmul.mubr.msk.f32.gmra.mrb[4].mxu1 %vm72_vm0, %v28_v63  ;;  %4722 = vmatpush1.bf16.msra.mxu0 %v6395_v0  ;;  %v407_v25 = vld [vmem:[%s8376_s2 + $0x168] sm:$0xff]  ;;  %v409_v31 = vld [vmem:[%s8376_s2 + $0x178] sm:$0xff]  ;;  %v402_v33 = vld [vmem:[%s8376_s2 + $0x140] sm:$0xff] }
  0x17   :  { %4754 = vmatpush1.bf16.msra.mxu1 %v6405_v4  ;;  %179 = vmatprep.mubr.f32.mxu0 %v6184_v3  ;;  %v406_v34 = vld [vmem:[%s8376_s2 + $0x160] sm:$0xff]  ;;  %v6501_v36 = vpack.c.bf16 %v407_v25, %v403_v24  ;;  %v404_v37 = vld [vmem:[%s8376_s2 + $0x150] sm:$0xff]  ;;  %v6511_v40 = vpack.c.bf16 %v409_v31, %v405_v28  ;;  %v411_v41 = vld [vmem:[%s8376_s2 + $0x188] sm:$0xff]  ;;  %v6657_v21 = vshrl.u32 %v52_v19, 7 }
  0x18   :  { %292 = vmatprep.mubr.f32.mxu1 %v6184_v3  ;;  %4724 = vmatprep.subr.bf16.mxu0 %v6415_v7  ;;  %v408_v39 = vld [vmem:[%s8376_s2 + $0x170] sm:$0xff]  ;;  %v415_v43 = vld [vmem:[%s8376_s2 + $0x1a8] sm:$0xff]  ;;  %v6524_v45 = vpack.c.bf16 %v406_v34, %v402_v33  ;;  %v413_v46 = vld [vmem:[%s8376_s2 + $0x198] sm:$0xff] }
  0x19   :  { %4627 = vmatmul.mubr.msk.f32.gmra.mrb[6].mxu0 %vm72_vm0, %v29_v13  ;;  %4756 = vmatprep.subr.bf16.mxu1 %v6425_v10  ;;  %v31_v44 = vld [vmem:[%s8377_s0 + $0x28] sm:$0xff]  ;;  %v417_v48 = vld [vmem:[%s8376_s2 + $0x1b8] sm:$0xff]  ;;  %v6534_v49 = vpack.c.bf16 %v408_v39, %v404_v37  ;;  %v410_v51 = vld [vmem:[%s8376_s2 + $0x180] sm:$0xff]  ;;  %v6544_v53 = vpack.c.bf16 %v415_v43, %v411_v41  ;;  %v54_v22 = vsub.s32 0, %v6657_v21  ;;  %v58_v25 = vsub.s32 1, %v6657_v21 }
  0x1a   :  { %4635 = vmatmul.mubr.msk.f32.gmra.mrb[6].mxu1 %vm72_vm0, %v29_v13  ;;  %4726 = vmatpush1.bf16.msra.mxu0 %v6438_v14  ;;  %v414_v52 = vld [vmem:[%s8376_s2 + $0x1a0] sm:$0xff]  ;;  %v412_v55 = vld [vmem:[%s8376_s2 + $0x190] sm:$0xff]  ;;  %v6554_v58 = vpack.c.bf16 %v417_v48, %v413_v46  ;;  %v419_v59 = vld [vmem:[%s8376_s2 + $0x1c8] sm:$0xff]  ;;  %v66_v28 = vsub.s32 3, %v6657_v21  ;;  %v62_v46 = vsub.s32 2, %v6657_v21 }
  0x1b   :  { %4758 = vmatpush1.bf16.msra.mxu1 %v6448_v17  ;;  %185 = vmatprep.mubr.f32.mxu0 %v6184_v3  ;;  %v416_v56 = vld [vmem:[%s8376_s2 + $0x1b0] sm:$0xff]  ;;  %v423_v61 = vld [vmem:[%s8376_s2 + $0x1e8] sm:$0xff]  ;;  %v6567_v63 = vpack.c.bf16 %v414_v52, %v410_v51  ;;  %v421_v1 = vld [vmem:[%s8376_s2 + $0x1d8] sm:$0xff] }
  0x1c   :  { %298 = vmatprep.mubr.f32.mxu1 %v6184_v3  ;;  %4728 = vmatprep.subr.bf16.mxu0 %v6458_v20  ;;  %v32_v62 = vld [vmem:[%s8377_s0 + $0x30] sm:$0xff]  ;;  %v425_v2 = vld [vmem:[%s8376_s2 + $0x1f8] sm:$0xff]  ;;  %v6577_v5 = vpack.c.bf16 %v416_v56, %v412_v55  ;;  %v418_v6 = vld [vmem:[%s8376_s2 + $0x1c0] sm:$0xff]  ;;  %v6587_v9 = vpack.c.bf16 %v423_v61, %v419_v59 }
  0x1d   :  { %4628 = vmatmul.mubr.msk.f32.gmra.mrb[8].mxu0 %vm72_vm0, %v30_v26  ;;  %4760 = vmatprep.subr.bf16.mxu1 %v6468_v23  ;;  %v422_v8 = vld [vmem:[%s8376_s2 + $0x1e0] sm:$0xff]  ;;  %v420_v11 = vld [vmem:[%s8376_s2 + $0x1d0] sm:$0xff]  ;;  %v6597_v13 = vpack.c.bf16 %v425_v2, %v421_v1  ;;  %v33_v15 = vld [vmem:[%s8377_s0 + $0x38] sm:$0xff] }
  0x1e   :  { %4636 = vmatmul.mubr.msk.f32.gmra.mrb[8].mxu1 %vm72_vm0, %v30_v26  ;;  %4730 = vmatpush1.bf16.msra.mxu0 %v6481_v27  ;;  %v424_v12 = vld [vmem:[%s8376_s2 + $0x1f0] sm:$0xff]  ;;  %v6604_v16 = vpack.c.bf16 %v422_v8, %v418_v6  ;;  %v50_v24 = vld [vmem:[%s8378_s3] sm:$0xf] }
  0x1f   :  { %4762 = vmatpush1.bf16.msra.mxu1 %v6491_v32  ;;  %191 = vmatprep.mubr.f32.mxu0 %v6184_v3  ;;  %v6608_v18 = vpack.c.bf16 %v424_v12, %v420_v11  ;;  %v6666_v26 = vrot.slane %v50_v24, %v54_v22  ;;  %v6683_v51 = vrot.slane %v50_v24, %v62_v46 }
  0x20   :  { %304 = vmatprep.mubr.f32.mxu1 %v6184_v3  ;;  %4732 = vmatprep.subr.bf16.mxu0 %v6501_v36 }
  0x21   :  { %4629 = vmatmul.mubr.msk.f32.gmra.mrb[10].mxu0 %vm72_vm0, %v31_v44  ;;  %4764 = vmatprep.subr.bf16.mxu1 %v6511_v40 }
  0x22   :  { %4637 = vmatmul.mubr.msk.f32.gmra.mrb[10].mxu1 %vm72_vm0, %v31_v44  ;;  %4734 = vmatpush1.bf16.msra.mxu0 %v6524_v45  ;;  %v6677_v44 = vrot.slane %v50_v24, %v66_v28 }
  0x23   :  { %4766 = vmatpush1.bf16.msra.mxu1 %v6534_v49  ;;  %197 = vmatprep.mubr.f32.mxu0 %v6184_v3 }
  0x24   :  { %310 = vmatprep.mubr.f32.mxu1 %v6184_v3  ;;  %4736 = vmatprep.subr.bf16.mxu0 %v6544_v53 }
  0x25   :  { %4630 = vmatmul.mubr.msk.f32.gmra.mrb[12].mxu0 %vm72_vm0, %v32_v62  ;;  %4768 = vmatprep.subr.bf16.mxu1 %v6554_v58 }
  0x26   :  { %4638 = vmatmul.mubr.msk.f32.gmra.mrb[12].mxu1 %vm72_vm0, %v32_v62  ;;  %4738 = vmatpush1.bf16.msra.mxu0 %v6567_v63 }
  0x27   :  { %4770 = vmatpush1.bf16.msra.mxu1 %v6577_v5  ;;  %203 = vmatprep.mubr.f32.mxu0 %v6184_v3 }
  0x28   :  { %316 = vmatprep.mubr.f32.mxu1 %v6184_v3  ;;  %4740 = vmatprep.subr.bf16.mxu0 %v6587_v9 }
  0x29   :  { %4631 = vmatmul.mubr.msk.f32.gmra.mrb[14].mxu0 %vm72_vm0, %v33_v15  ;;  %4772 = vmatprep.subr.bf16.mxu1 %v6597_v13 }
  0x2a   :  { %4639 = vmatmul.mubr.msk.f32.gmra.mrb[14].mxu1 %vm72_vm0, %v33_v15  ;;  %4742 = vmatpush1.bf16.msra.mxu0 %v6604_v16 }
  0x2b   :  { %4774 = vmatpush1.bf16.msra.mxu1 %v6608_v18  ;;  %490 = vmatprep.mubr.f32.mxu0 %v6184_v3 }
  0x2c   :  { %561 = vmatprep.mubr.f32.mxu1 %v6184_v3  ;;  %4776 = vmatprep.subr.bf16.mxu0 %v6287_v29 }
  0x2d   :  { %491 = vmatmul.mubr.f32.vlgmr.msra.gmra.mrb[0].mxu0 %v6184_v3  ;;  %4808 = vmatprep.subr.bf16.mxu1 %v6289_v30 }
  0x2e   :  { %562 = vmatmul.mubr.f32.vlgmr.msra.gmra.mrb[0].mxu1 %v6184_v3  ;;  %4778 = vmatpush1.bf16.msra.mxu0 %v6303_v35 }
  0x2f   :  { %4810 = vmatpush1.bf16.msra.mxu1 %v6312_v38  ;;  %4780 = vmatprep.subr.bf16.mxu0 %v6324_v42 }
  0x30   :  { %4812 = vmatprep.subr.bf16.mxu1 %v6339_v47  ;;  %734 = vmatprep.mubr.f32.mxu0 %v6184_v3 }
  0x31   :  { %805 = vmatprep.mubr.f32.mxu1 %v6184_v3 }
  0x32   :  { %4782 = vmatpush1.bf16.msra.mxu0 %v6349_v50 }
  0x33   :  { %4814 = vmatpush1.bf16.msra.mxu1 %v6362_v54  ;;  %4784 = vmatprep.subr.bf16.mxu0 %v6372_v57 }
  0x34   :  { %4816 = vmatprep.subr.bf16.mxu1 %v6382_v60 }
  0x36   :  { %4786 = vmatpush1.bf16.msra.mxu0 %v6395_v0 }
  0x37   :  { %4818 = vmatpush1.bf16.msra.mxu1 %v6405_v4  ;;  %4788 = vmatprep.subr.bf16.mxu0 %v6415_v7 }
  0x38   :  { %4820 = vmatprep.subr.bf16.mxu1 %v6425_v10 }
  0x3a   :  { %4790 = vmatpush1.bf16.msra.mxu0 %v6438_v14 }
  0x3b   :  { %4822 = vmatpush1.bf16.msra.mxu1 %v6448_v17  ;;  %4792 = vmatprep.subr.bf16.mxu0 %v6458_v20 }
  0x3c   :  { %4824 = vmatprep.subr.bf16.mxu1 %v6468_v23 }
  0x3e   :  { %4794 = vmatpush1.bf16.msra.mxu0 %v6481_v27 }
  0x3f   :  { %4826 = vmatpush1.bf16.msra.mxu1 %v6491_v32  ;;  %4796 = vmatprep.subr.bf16.mxu0 %v6501_v36 }
  0x40   :  { %4828 = vmatprep.subr.bf16.mxu1 %v6511_v40 }
  0x42   :  { %4798 = vmatpush1.bf16.msra.mxu0 %v6524_v45 }
  0x43   :  { %4830 = vmatpush1.bf16.msra.mxu1 %v6534_v49  ;;  %4800 = vmatprep.subr.bf16.mxu0 %v6544_v53 }
  0x44   :  { %4832 = vmatprep.subr.bf16.mxu1 %v6554_v58 }
  0x46   :  { %4802 = vmatpush1.bf16.msra.mxu0 %v6567_v63 }
  0x47   :  { %4834 = vmatpush1.bf16.msra.mxu1 %v6577_v5  ;;  %4804 = vmatprep.subr.bf16.mxu0 %v6587_v9 }
  0x48   :  { %4836 = vmatprep.subr.bf16.mxu1 %v6597_v13 }
  0x4a   :  { %4806 = vmatpush1.bf16.msra.mxu0 %v6604_v16 }
  0x4b   :  { %4838 = vmatpush1.bf16.msra.mxu1 %v6608_v18  ;;  %4840 = vmatprep.subr.bf16.mxu0 %v6287_v29  ;;  %v6670_v29 = vrot.slane %v50_v24, %v58_v25 }
  0x4c   :  { %4872 = vmatprep.subr.bf16.mxu1 %v6289_v30 }
 0x100   :  { %v492_v30 = vpop.f32.mrb[0].mxu0 }
 0x101   :  { %v5799_v31 = vadd.f32 %v492_v30, %v6666_v26  ;;  %v563_v33 = vpop.f32.mrb[0].mxu1  ;;  %v494_v34 = vpop.f32.mrb[1].mxu0 }
 0x102   :  { %v5800_v37 = vadd.f32 %v494_v34, %v6670_v29  ;;  %v565_v39 = vpop.f32.mrb[1].mxu1  ;;  %v5815_v55 = vadd.f32 %v563_v33, %v6683_v51 }
 0x103   :  { %v4640_v41 = vmul.f32 -1.442695, %v5799_v31  ;;  %v5816_v48 = vadd.f32 %v565_v39, %v6677_v44 }
 0x104   :  { %v4641_v43 = vmul.f32 -1.442695, %v5800_v37 }
 0x105   :  { %5928 = vpow2.f32 %v4640_v41  ;;  %v4642_v52 = vmul.f32 -1.442695, %v5816_v48 }
 0x106   :  { %5930 = vpow2.f32 %v4641_v43 }
 0x107   :  { %5932 = vpow2.f32 %v4642_v52 }
 0x108   :  { %5934 = vtanh.f32 %v5815_v55 }
 0x10f   :  { %v5929_v56 = vpop.eup %5928 }
 0x110   :  { %v5931_v59 = vpop.eup %5930  ;;  %v575_v61 = vadd.f32 1.0, %v5929_v56 }
 0x111   :  { %v581_v62 = vadd.f32 1.0, %v5931_v59  ;;  %v5933_v1 = vpop.eup %5932 }
 0x112   :  { %5936 = vrcp.f32 %v575_v61  ;;  %v5935_v2 = vpop.eup %5934  ;;  %v588_v12 = vadd.f32 1.0, %v5933_v1 }
 0x113   :  { %5938 = vrcp.f32 %v581_v62 }
 0x114   :  { %5940 = vrcp.f32 %v588_v12 }
 0x11c   :  { %v5937_v6 = vpop.eup %5936 }
 0x11d   :  { %v5939_v8 = vpop.eup %5938  ;;  %v593_v11 = vmul.f32 %v5937_v6, %v5935_v2 }
 0x11e   :  { %v592_v15 = vmul.f32 0.0, %v5939_v8  ;;  %v5941_v24 = vpop.eup %5940 }
 0x120   :  { %v6686_v19 = vadd.f32 %v593_v11, %v592_v15 }
 0x122   :  { %5942 = vtanh.f32 %v6686_v19 }
 0x12c   :  { %v5943_v30 = vpop.eup %5942 }
 0x12d   :  { %v6689_v31 = vmul.f32 %v5943_v30, %v5941_v24  ;;  %v1101_v24 = vld [vmem:[%s8376_s2 + $0x28] sm:$0xff]  ;;  %v1099_v30 = vld [vmem:[%s8376_s2 + $0x18] sm:$0xff] }
 0x12f   :  { %735 = vmatmul.mubr.f32.vlgmr.msra.gmra.mrb[2].mxu0 %v6689_v31  ;;  %806 = vmatmul.mubr.f32.vlgmr.msra.gmra.mrb[2].mxu1 %v6689_v31 }
 0x130   :  { %4842 = vmatpush1.bf16.msra.mxu0 %v6303_v35  ;;  %4874 = vmatpush1.bf16.msra.mxu1 %v6312_v38 }
 0x131   :  { %4844 = vmatprep.subr.bf16.mxu0 %v6324_v42  ;;  %4876 = vmatprep.subr.bf16.mxu1 %v6339_v47 }
 0x132   :  { %979 = vmatprep.mubr.f32.mxu0 %v6184_v3  ;;  %1050 = vmatprep.mubr.f32.mxu1 %v6184_v3 }
 0x134   :  { %4846 = vmatpush1.bf16.msra.mxu0 %v6349_v50  ;;  %4878 = vmatpush1.bf16.msra.mxu1 %v6362_v54 }
 0x135   :  { %4848 = vmatprep.subr.bf16.mxu0 %v6372_v57  ;;  %4880 = vmatprep.subr.bf16.mxu1 %v6382_v60 }
 0x138   :  { %4850 = vmatpush1.bf16.msra.mxu0 %v6395_v0  ;;  %4882 = vmatpush1.bf16.msra.mxu1 %v6405_v4 }
 0x139   :  { %4852 = vmatprep.subr.bf16.mxu0 %v6415_v7  ;;  %4884 = vmatprep.subr.bf16.mxu1 %v6425_v10 }
 0x13c   :  { %4854 = vmatpush1.bf16.msra.mxu0 %v6438_v14  ;;  %4886 = vmatpush1.bf16.msra.mxu1 %v6448_v17 }
 0x13d   :  { %4856 = vmatprep.subr.bf16.mxu0 %v6458_v20  ;;  %4888 = vmatprep.subr.bf16.mxu1 %v6468_v23 }
 0x140   :  { %4858 = vmatpush1.bf16.msra.mxu0 %v6481_v27  ;;  %4890 = vmatpush1.bf16.msra.mxu1 %v6491_v32 }
 0x141   :  { %4860 = vmatprep.subr.bf16.mxu0 %v6501_v36  ;;  %4892 = vmatprep.subr.bf16.mxu1 %v6511_v40 }
 0x144   :  { %4862 = vmatpush1.bf16.msra.mxu0 %v6524_v45  ;;  %4894 = vmatpush1.bf16.msra.mxu1 %v6534_v49 }
 0x145   :  { %4864 = vmatprep.subr.bf16.mxu0 %v6544_v53  ;;  %4896 = vmatprep.subr.bf16.mxu1 %v6554_v58 }
 0x148   :  { %4866 = vmatpush1.bf16.msra.mxu0 %v6567_v63  ;;  %4898 = vmatpush1.bf16.msra.mxu1 %v6577_v5 }
 0x149   :  { %4868 = vmatprep.subr.bf16.mxu0 %v6587_v9  ;;  %4900 = vmatprep.subr.bf16.mxu1 %v6597_v13 }
 0x14c   :  { %4870 = vmatpush1.bf16.msra.mxu0 %v6604_v16  ;;  %4902 = vmatpush1.bf16.msra.mxu1 %v6608_v18 }
 0x202   :  { %v736_v35 = vpop.f32.mrb[2].mxu0  ;;  %v807_v38 = vpop.f32.mrb[2].mxu1 }
 0x203   :  { %v5801_v42 = vadd.f32 %v736_v35, %v6666_v26  ;;  %v738_v47 = vpop.f32.mrb[3].mxu0  ;;  %v809_v50 = vpop.f32.mrb[3].mxu1  ;;  %v5817_v41 = vadd.f32 %v807_v38, %v6683_v51  ;;  %v1103_v38 = vld [vmem:[%s8376_s2 + $0x38] sm:$0xff] }
 0x204   :  { %v5802_v54 = vadd.f32 %v738_v47, %v6670_v29  ;;  %v5818_v37 = vadd.f32 %v809_v50, %v6677_v44  ;;  %v1100_v47 = vld [vmem:[%s8376_s2 + $0x20] sm:$0xff]  ;;  %v6759_v50 = vpack.c.bf16 %v1103_v38, %v1099_v30  ;;  %v1364_v30 = vld [vmem:[%s8376_s2 + $0xb8] sm:$0xff] }
 0x205   :  { %v4643_v33 = vmul.f32 -1.442695, %v5801_v42  ;;  %v1096_v42 = vld [vmem:[%s8376_s2] sm:$0xff] }
 0x206   :  { %v4644_v34 = vmul.f32 -1.442695, %v5802_v54  ;;  %v4645_v39 = vmul.f32 -1.442695, %v5818_v37  ;;  %v6761_v54 = vpack.c.bf16 %v1100_v47, %v1096_v42  ;;  %4936 = vmatprep.subr.bf16.mxu1 %v6759_v50  ;;  %v1357_v38 = vld [vmem:[%s8376_s2 + $0x80] sm:$0xff] }
 0x207   :  { %5944 = vpow2.f32 %v4643_v33  ;;  %v1098_v33 = vld [vmem:[%s8376_s2 + $0x10] sm:$0xff]  ;;  %v1361_v42 = vld [vmem:[%s8376_s2 + $0xa0] sm:$0xff] }
 0x208   :  { %5946 = vpow2.f32 %v4644_v34  ;;  %v1102_v34 = vld [vmem:[%s8376_s2 + $0x30] sm:$0xff] }
 0x209   :  { %5948 = vpow2.f32 %v4645_v39  ;;  %v6770_v37 = vpack.c.bf16 %v1102_v34, %v1098_v33  ;;  %v1105_v39 = vld [vmem:[%s8376_s2 + $0x48] sm:$0xff]  ;;  %v6879_v33 = vpack.c.bf16 %v1361_v42, %v1357_v38  ;;  %v1359_v34 = vld [vmem:[%s8376_s2 + $0x90] sm:$0xff] }
 0x20a   :  { %5950 = vtanh.f32 %v5817_v41  ;;  %v1109_v41 = vld [vmem:[%s8376_s2 + $0x68] sm:$0xff]  ;;  %v1387_v38 = vld [vmem:[%s8376_s2 + $0x170] sm:$0xff] }
 0x20b   :  { %v1390_v42 = vld [vmem:[%s8376_s2 + $0x188] sm:$0xff] }
 0x211   :  { %v5945_v43 = vpop.eup %5944 }
 0x212   :  { %v5947_v48 = vpop.eup %5946  ;;  %v819_v52 = vadd.f32 1.0, %v5945_v43  ;;  %v1107_v43 = vld [vmem:[%s8376_s2 + $0x58] sm:$0xff] }
 0x213   :  { %v825_v55 = vadd.f32 1.0, %v5947_v48  ;;  %v5949_v56 = vpop.eup %5948  ;;  %v6784_v48 = vpack.c.bf16 %v1109_v41, %v1105_v39  ;;  %v1363_v39 = vld [vmem:[%s8376_s2 + $0xb0] sm:$0xff] }
 0x214   :  { %5952 = vrcp.f32 %v819_v52  ;;  %v5951_v59 = vpop.eup %5950  ;;  %v832_v2 = vadd.f32 1.0, %v5949_v56  ;;  %v1111_v52 = vld [vmem:[%s8376_s2 + $0x78] sm:$0xff]  ;;  %v1108_v56 = vld [vmem:[%s8376_s2 + $0x60] sm:$0xff]  ;;  %v6888_v41 = vpack.c.bf16 %v1363_v39, %v1359_v34  ;;  %v1394_v39 = vld [vmem:[%s8376_s2 + $0x1a8] sm:$0xff] }
 0x215   :  { %5954 = vrcp.f32 %v825_v55  ;;  %v1104_v55 = vld [vmem:[%s8376_s2 + $0x40] sm:$0xff] }
 0x216   :  { %5956 = vrcp.f32 %v832_v2 }
 0x21e   :  { %v5953_v61 = vpop.eup %5952 }
 0x21f   :  { %v5955_v62 = vpop.eup %5954  ;;  %v837_v1 = vmul.f32 %v5953_v61, %v5951_v59  ;;  %v6795_v59 = vpack.c.bf16 %v1111_v52, %v1107_v43  ;;  %v6797_v61 = vpack.c.bf16 %v1108_v56, %v1104_v55  ;;  %v1366_v43 = vld [vmem:[%s8376_s2 + $0xc8] sm:$0xff]  ;;  %v1368_v55 = vld [vmem:[%s8376_s2 + $0xd8] sm:$0xff] }
 0x220   :  { %v836_v6 = vmul.f32 %v5955_v62, %v6686_v19  ;;  %v5957_v11 = vpop.eup %5956  ;;  %v1097_v19 = vld [vmem:[%s8376_s2 + $0x8] sm:$0xff]  ;;  %v1106_v62 = vld [vmem:[%s8376_s2 + $0x50] sm:$0xff] }
 0x221   :  { %v6748_v35 = vpack.c.bf16 %v1101_v24, %v1097_v19  ;;  %v1360_v19 = vld [vmem:[%s8376_s2 + $0x98] sm:$0xff]  ;;  %v1370_v52 = vld [vmem:[%s8376_s2 + $0xe8] sm:$0xff] }
 0x222   :  { %v6730_v8 = vadd.f32 %v837_v1, %v836_v6  ;;  %v1110_v1 = vld [vmem:[%s8376_s2 + $0x70] sm:$0xff]  ;;  %v6877_v47 = vpack.c.bf16 %v1364_v30, %v1360_v19  ;;  %v6902_v56 = vpack.c.bf16 %v1370_v52, %v1366_v43  ;;  %v1392_v43 = vld [vmem:[%s8376_s2 + $0x198] sm:$0xff] }
 0x223   :  { %4904 = vmatprep.subr.bf16.mxu0 %v6748_v35  ;;  %v6806_v2 = vpack.c.bf16 %v1110_v1, %v1106_v62  ;;  %v1372_v62 = vld [vmem:[%s8376_s2 + $0xf8] sm:$0xff]  ;;  %v1365_v1 = vld [vmem:[%s8376_s2 + $0xc0] sm:$0xff]  ;;  %v1383_v30 = vld [vmem:[%s8376_s2 + $0x150] sm:$0xff] }
 0x224   :  { %5958 = vtanh.f32 %v6730_v8  ;;  %v6999_v34 = vpack.c.bf16 %v1387_v38, %v1383_v30  ;;  %v1396_v52 = vld [vmem:[%s8376_s2 + $0x1b8] sm:$0xff] }
 0x22e   :  { %v5959_v12 = vpop.eup %5958 }
 0x22f   :  { %v6733_v15 = vmul.f32 %v5959_v12, %v5957_v11  ;;  %v1362_v12 = vld [vmem:[%s8376_s2 + $0xa8] sm:$0xff] }
 0x231   :  { %980 = vmatmul.mubr.f32.vlgmr.msra.gmra.mrb[4].mxu0 %v6733_v15  ;;  %1051 = vmatmul.mubr.f32.vlgmr.msra.gmra.mrb[4].mxu1 %v6733_v15 }
 0x232   :  { %1224 = vmatprep.mubr.f32.mxu0 %v6184_v3  ;;  %1295 = vmatprep.mubr.f32.mxu1 %v6184_v3 }
 0x233   :  { %4906 = vmatpush1.bf16.msra.mxu0 %v6761_v54  ;;  %4938 = vmatpush1.bf16.msra.mxu1 %v6770_v37 }
 0x234   :  { %4908 = vmatprep.subr.bf16.mxu0 %v6784_v48  ;;  %4940 = vmatprep.subr.bf16.mxu1 %v6795_v59 }
 0x237   :  { %4910 = vmatpush1.bf16.msra.mxu0 %v6797_v61  ;;  %4942 = vmatpush1.bf16.msra.mxu1 %v6806_v2 }
 0x238   :  { %4912 = vmatprep.subr.bf16.mxu0 %v6372_v57  ;;  %4944 = vmatprep.subr.bf16.mxu1 %v6382_v60 }
 0x23b   :  { %4914 = vmatpush1.bf16.msra.mxu0 %v6395_v0  ;;  %4946 = vmatpush1.bf16.msra.mxu1 %v6405_v4 }
 0x23c   :  { %4916 = vmatprep.subr.bf16.mxu0 %v6415_v7  ;;  %4948 = vmatprep.subr.bf16.mxu1 %v6425_v10 }
 0x23f   :  { %4918 = vmatpush1.bf16.msra.mxu0 %v6438_v14  ;;  %4950 = vmatpush1.bf16.msra.mxu1 %v6448_v17 }
 0x240   :  { %4920 = vmatprep.subr.bf16.mxu0 %v6458_v20  ;;  %4952 = vmatprep.subr.bf16.mxu1 %v6468_v23 }
 0x243   :  { %4922 = vmatpush1.bf16.msra.mxu0 %v6481_v27  ;;  %4954 = vmatpush1.bf16.msra.mxu1 %v6491_v32 }
 0x244   :  { %4924 = vmatprep.subr.bf16.mxu0 %v6501_v36  ;;  %4956 = vmatprep.subr.bf16.mxu1 %v6511_v40 }
 0x247   :  { %4926 = vmatpush1.bf16.msra.mxu0 %v6524_v45  ;;  %4958 = vmatpush1.bf16.msra.mxu1 %v6534_v49 }
 0x248   :  { %4928 = vmatprep.subr.bf16.mxu0 %v6544_v53  ;;  %4960 = vmatprep.subr.bf16.mxu1 %v6554_v58 }
 0x24b   :  { %4930 = vmatpush1.bf16.msra.mxu0 %v6567_v63  ;;  %4962 = vmatpush1.bf16.msra.mxu1 %v6577_v5 }
 0x24c   :  { %4932 = vmatprep.subr.bf16.mxu0 %v6587_v9  ;;  %4964 = vmatprep.subr.bf16.mxu1 %v6597_v13 }
 0x24f   :  { %4934 = vmatpush1.bf16.msra.mxu0 %v6604_v16  ;;  %4966 = vmatpush1.bf16.msra.mxu1 %v6608_v18 }
 0x250   :  { %4968 = vmatprep.subr.bf16.mxu0 %v6748_v35  ;;  %5000 = vmatprep.subr.bf16.mxu1 %v6759_v50 }
 0x304   :  { %v981_v57 = vpop.f32.mrb[4].mxu0  ;;  %v1052_v60 = vpop.f32.mrb[4].mxu1 }
 0x305   :  { %v5803_v0 = vadd.f32 %v981_v57, %v6666_v26  ;;  %v983_v4 = vpop.f32.mrb[5].mxu0  ;;  %v1054_v7 = vpop.f32.mrb[5].mxu1  ;;  %v5819_v27 = vadd.f32 %v1052_v60, %v6683_v51  ;;  %v1369_v57 = vld [vmem:[%s8376_s2 + $0xe0] sm:$0xff]  ;;  %v6913_v60 = vpack.c.bf16 %v1372_v62, %v1368_v55  ;;  %v7011_v55 = vpack.c.bf16 %v1394_v39, %v1390_v42 }
 0x306   :  { %v5804_v10 = vadd.f32 %v983_v4, %v6670_v29  ;;  %v5820_v20 = vadd.f32 %v1054_v7, %v6677_v44  ;;  %v1367_v4 = vld [vmem:[%s8376_s2 + $0xd0] sm:$0xff]  ;;  %v7013_v62 = vpack.c.bf16 %v1396_v52, %v1392_v43 }
 0x307   :  { %v4646_v14 = vmul.f32 -1.442695, %v5803_v0  ;;  %v6915_v0 = vpack.c.bf16 %v1369_v57, %v1365_v1  ;;  %v1371_v7 = vld [vmem:[%s8376_s2 + $0xf0] sm:$0xff]  ;;  %v1389_v1 = vld [vmem:[%s8376_s2 + $0x180] sm:$0xff] }
 0x308   :  { %v4647_v17 = vmul.f32 -1.442695, %v5804_v10  ;;  %v4648_v23 = vmul.f32 -1.442695, %v5820_v20  ;;  %v6924_v10 = vpack.c.bf16 %v1371_v7, %v1367_v4  ;;  %v1376_v20 = vld [vmem:[%s8376_s2 + $0x118] sm:$0xff]  ;;  %v1393_v57 = vld [vmem:[%s8376_s2 + $0x1a0] sm:$0xff] }
 0x309   :  { %5960 = vpow2.f32 %v4646_v14  ;;  %v1374_v14 = vld [vmem:[%s8376_s2 + $0x108] sm:$0xff]  ;;  %v1391_v4 = vld [vmem:[%s8376_s2 + $0x190] sm:$0xff]  ;;  %v7025_v7 = vpack.c.bf16 %v1393_v57, %v1389_v1 }
 0x30a   :  { %5962 = vpow2.f32 %v4647_v17  ;;  %v1378_v17 = vld [vmem:[%s8376_s2 + $0x128] sm:$0xff] }
 0x30b   :  { %5964 = vpow2.f32 %v4648_v23  ;;  %v6938_v23 = vpack.c.bf16 %v1378_v17, %v1374_v14  ;;  %v1395_v14 = vld [vmem:[%s8376_s2 + $0x1b0] sm:$0xff]  ;;  %v1398_v17 = vld [vmem:[%s8376_s2 + $0x1c8] sm:$0xff] }
 0x30c   :  { %5966 = vtanh.f32 %v5819_v27  ;;  %v1380_v27 = vld [vmem:[%s8376_s2 + $0x138] sm:$0xff] }
 0x313   :  { %v5961_v32 = vpop.eup %5960 }
 0x314   :  { %v5963_v36 = vpop.eup %5962  ;;  %v1064_v40 = vadd.f32 1.0, %v5961_v32  ;;  %v1373_v32 = vld [vmem:[%s8376_s2 + $0x100] sm:$0xff] }
 0x315   :  { %v1070_v45 = vadd.f32 1.0, %v5963_v36  ;;  %v5965_v49 = vpop.eup %5964  ;;  %v1377_v36 = vld [vmem:[%s8376_s2 + $0x120] sm:$0xff] }
 0x316   :  { %5968 = vrcp.f32 %v1064_v40  ;;  %v5967_v53 = vpop.eup %5966  ;;  %v1077_v9 = vadd.f32 1.0, %v5965_v49  ;;  %v6949_v40 = vpack.c.bf16 %v1380_v27, %v1376_v20  ;;  %v1375_v49 = vld [vmem:[%s8376_s2 + $0x110] sm:$0xff]  ;;  %v1402_v20 = vld [vmem:[%s8376_s2 + $0x1e8] sm:$0xff]  ;;  %v7038_v27 = vpack.c.bf16 %v1395_v14, %v1391_v4 }
 0x317   :  { %5970 = vrcp.f32 %v1070_v45  ;;  %v6951_v45 = vpack.c.bf16 %v1377_v36, %v1373_v32  ;;  %v7040_v32 = vpack.c.bf16 %v1402_v20, %v1398_v17  ;;  %v1400_v36 = vld [vmem:[%s8376_s2 + $0x1d8] sm:$0xff] }
 0x318   :  { %5972 = vrcp.f32 %v1077_v9  ;;  %v1384_v9 = vld [vmem:[%s8376_s2 + $0x158] sm:$0xff] }
 0x320   :  { %v5969_v58 = vpop.eup %5968 }
 0x321   :  { %v5971_v63 = vpop.eup %5970  ;;  %v1082_v5 = vmul.f32 %v5969_v58, %v5967_v53  ;;  %v1379_v53 = vld [vmem:[%s8376_s2 + $0x130] sm:$0xff] }
 0x322   :  { %v1081_v13 = vmul.f32 %v5971_v63, %v6730_v8  ;;  %v5973_v18 = vpop.eup %5972  ;;  %v1358_v8 = vld [vmem:[%s8376_s2 + $0x88] sm:$0xff]  ;;  %v6960_v58 = vpack.c.bf16 %v1379_v53, %v1375_v49  ;;  %v1404_v49 = vld [vmem:[%s8376_s2 + $0x1f8] sm:$0xff]  ;;  %v1397_v53 = vld [vmem:[%s8376_s2 + $0x1c0] sm:$0xff] }
 0x323   :  { %v6866_v24 = vpack.c.bf16 %v1362_v12, %v1358_v8  ;;  %v1382_v63 = vld [vmem:[%s8376_s2 + $0x148] sm:$0xff]  ;;  %v1385_v8 = vld [vmem:[%s8376_s2 + $0x160] sm:$0xff] }
 0x324   :  { %v6842_v16 = vadd.f32 %v1082_v5, %v1081_v13  ;;  %v1386_v5 = vld [vmem:[%s8376_s2 + $0x168] sm:$0xff] }
 0x325   :  { %v6973_v13 = vpack.c.bf16 %v1386_v5, %v1382_v63  ;;  %v7052_v63 = vpack.c.bf16 %v1404_v49, %v1400_v36  ;;  %v1401_v5 = vld [vmem:[%s8376_s2 + $0x1e0] sm:$0xff] }
 0x326   :  { %5974 = vtanh.f32 %v6842_v16 }
 0x330   :  { %v5975_v6 = vpop.eup %5974 }
 0x331   :  { %v6845_v11 = vmul.f32 %v5975_v6, %v5973_v18  ;;  %v1388_v18 = vld [vmem:[%s8376_s2 + $0x178] sm:$0xff]  ;;  %v1381_v6 = vld [vmem:[%s8376_s2 + $0x140] sm:$0xff] }
 0x332   :  { %v6985_v12 = vpack.c.bf16 %v1388_v18, %v1384_v9  ;;  %v6987_v19 = vpack.c.bf16 %v1385_v8, %v1381_v6  ;;  %v1399_v9 = vld [vmem:[%s8376_s2 + $0x1d0] sm:$0xff]  ;;  %v7064_v6 = vpack.c.bf16 %v1401_v5, %v1397_v53 }
 0x333   :  { %1225 = vmatmul.mubr.f32.vlgmr.msra.gmra.mrb[6].mxu0 %v6845_v11  ;;  %1296 = vmatmul.mubr.f32.vlgmr.msra.gmra.mrb[6].mxu1 %v6845_v11  ;;  %v1403_v18 = vld [vmem:[%s8376_s2 + $0x1f0] sm:$0xff] }
 0x334   :  { %4970 = vmatpush1.bf16.msra.mxu0 %v6761_v54  ;;  %5002 = vmatpush1.bf16.msra.mxu1 %v6770_v37  ;;  %v7068_v8 = vpack.c.bf16 %v1403_v18, %v1399_v9 }
 0x335   :  { %4972 = vmatprep.subr.bf16.mxu0 %v6784_v48  ;;  %5004 = vmatprep.subr.bf16.mxu1 %v6795_v59 }
 0x336   :  { %1469 = vmatprep.mubr.f32.mxu0 %v6184_v3  ;;  %1540 = vmatprep.mubr.f32.mxu1 %v6184_v3 }
 0x338   :  { %4974 = vmatpush1.bf16.msra.mxu0 %v6797_v61  ;;  %5006 = vmatpush1.bf16.msra.mxu1 %v6806_v2 }
 0x339   :  { %4976 = vmatprep.subr.bf16.mxu0 %v6866_v24  ;;  %5008 = vmatprep.subr.bf16.mxu1 %v6877_v47 }
 0x33c   :  { %4978 = vmatpush1.bf16.msra.mxu0 %v6879_v33  ;;  %5010 = vmatpush1.bf16.msra.mxu1 %v6888_v41 }
 0x33d   :  { %4980 = vmatprep.subr.bf16.mxu0 %v6902_v56  ;;  %5012 = vmatprep.subr.bf16.mxu1 %v6913_v60 }
 0x340   :  { %4982 = vmatpush1.bf16.msra.mxu0 %v6915_v0  ;;  %5014 = vmatpush1.bf16.msra.mxu1 %v6924_v10 }
 0x341   :  { %4984 = vmatprep.subr.bf16.mxu0 %v6938_v23  ;;  %5016 = vmatprep.subr.bf16.mxu1 %v6949_v40 }
 0x344   :  { %4986 = vmatpush1.bf16.msra.mxu0 %v6951_v45  ;;  %5018 = vmatpush1.bf16.msra.mxu1 %v6960_v58 }
 0x345   :  { %4988 = vmatprep.subr.bf16.mxu0 %v6973_v13  ;;  %5020 = vmatprep.subr.bf16.mxu1 %v6985_v12 }
 0x348   :  { %4990 = vmatpush1.bf16.msra.mxu0 %v6987_v19  ;;  %5022 = vmatpush1.bf16.msra.mxu1 %v6999_v34 }
 0x349   :  { %4992 = vmatprep.subr.bf16.mxu0 %v7011_v55  ;;  %5024 = vmatprep.subr.bf16.mxu1 %v7013_v62 }
 0x34c   :  { %4994 = vmatpush1.bf16.msra.mxu0 %v7025_v7  ;;  %5026 = vmatpush1.bf16.msra.mxu1 %v7038_v27 }
 0x34d   :  { %4996 = vmatprep.subr.bf16.mxu0 %v7040_v32  ;;  %5028 = vmatprep.subr.bf16.mxu1 %v7052_v63 }
 0x350   :  { %4998 = vmatpush1.bf16.msra.mxu0 %v7064_v6  ;;  %5030 = vmatpush1.bf16.msra.mxu1 %v7068_v8 }
 0x351   :  { %5032 = vmatprep.subr.bf16.mxu0 %v6748_v35  ;;  %5064 = vmatprep.subr.bf16.mxu1 %v6759_v50 }
 0x406   :  { %v1226_v30 = vpop.f32.mrb[6].mxu0  ;;  %v1297_v38 = vpop.f32.mrb[6].mxu1 }
 0x407   :  { %v5805_v42 = vadd.f32 %v1226_v30, %v6666_v26  ;;  %v1228_v39 = vpop.f32.mrb[7].mxu0  ;;  %v1299_v43 = vpop.f32.mrb[7].mxu1  ;;  %v5821_v17 = vadd.f32 %v1297_v38, %v6683_v51 }
 0x408   :  { %v5806_v52 = vadd.f32 %v1228_v39, %v6670_v29  ;;  %v5822_v4 = vadd.f32 %v1299_v43, %v6677_v44 }
 0x409   :  { %v4649_v1 = vmul.f32 -1.442695, %v5805_v42 }
 0x40a   :  { %v4650_v57 = vmul.f32 -1.442695, %v5806_v52  ;;  %v4651_v14 = vmul.f32 -1.442695, %v5822_v4 }
 0x40b   :  { %5976 = vpow2.f32 %v4649_v1 }
 0x40c   :  { %5978 = vpow2.f32 %v4650_v57 }
 0x40d   :  { %5980 = vpow2.f32 %v4651_v14 }
 0x40e   :  { %5982 = vtanh.f32 %v5821_v17 }
 0x415   :  { %v5977_v20 = vpop.eup %5976 }
 0x416   :  { %v5979_v36 = vpop.eup %5978  ;;  %v1309_v49 = vadd.f32 1.0, %v5977_v20 }
 0x417   :  { %v1315_v53 = vadd.f32 1.0, %v5979_v36  ;;  %v5981_v5 = vpop.eup %5980 }
 0x418   :  { %5984 = vrcp.f32 %v1309_v49  ;;  %v5983_v9 = vpop.eup %5982  ;;  %v1322_v39 = vadd.f32 1.0, %v5981_v5 }
 0x419   :  { %5986 = vrcp.f32 %v1315_v53 }
 0x41a   :  { %5988 = vrcp.f32 %v1322_v39 }
 0x422   :  { %v5985_v18 = vpop.eup %5984 }
 0x423   :  { %v5987_v30 = vpop.eup %5986  ;;  %v1327_v42 = vmul.f32 %v5985_v18, %v5983_v9 }
 0x424   :  { %v1326_v52 = vmul.f32 %v5987_v30, %v6842_v16  ;;  %v5989_v38 = vpop.eup %5988 }
 0x426   :  { %v7080_v43 = vadd.f32 %v1327_v42, %v1326_v52 }
 0x428   :  { %5990 = vtanh.f32 %v7080_v43 }
 0x432   :  { %v5991_v1 = vpop.eup %5990 }
 0x433   :  { %v7083_v57 = vmul.f32 %v5991_v1, %v5989_v38 }
 0x435   :  { %1470 = vmatmul.mubr.f32.vlgmr.msra.gmra.mrb[8].mxu0 %v7083_v57  ;;  %1541 = vmatmul.mubr.f32.vlgmr.msra.gmra.mrb[8].mxu1 %v7083_v57 }
 0x436   :  { %5034 = vmatpush1.bf16.msra.mxu0 %v6761_v54  ;;  %5066 = vmatpush1.bf16.msra.mxu1 %v6770_v37 }
 0x437   :  { %5036 = vmatprep.subr.bf16.mxu0 %v6784_v48  ;;  %5068 = vmatprep.subr.bf16.mxu1 %v6795_v59 }
 0x438   :  { %1714 = vmatprep.mubr.f32.mxu0 %v6184_v3  ;;  %1785 = vmatprep.mubr.f32.mxu1 %v6184_v3 }
 0x43a   :  { %5038 = vmatpush1.bf16.msra.mxu0 %v6797_v61  ;;  %5070 = vmatpush1.bf16.msra.mxu1 %v6806_v2 }
 0x43b   :  { %5040 = vmatprep.subr.bf16.mxu0 %v6866_v24  ;;  %5072 = vmatprep.subr.bf16.mxu1 %v6877_v47 }
 0x43e   :  { %5042 = vmatpush1.bf16.msra.mxu0 %v6879_v33  ;;  %5074 = vmatpush1.bf16.msra.mxu1 %v6888_v41 }
 0x43f   :  { %5044 = vmatprep.subr.bf16.mxu0 %v6902_v56  ;;  %5076 = vmatprep.subr.bf16.mxu1 %v6913_v60 }
 0x442   :  { %5046 = vmatpush1.bf16.msra.mxu0 %v6915_v0  ;;  %5078 = vmatpush1.bf16.msra.mxu1 %v6924_v10 }
 0x443   :  { %5048 = vmatprep.subr.bf16.mxu0 %v6938_v23  ;;  %5080 = vmatprep.subr.bf16.mxu1 %v6949_v40 }
 0x446   :  { %5050 = vmatpush1.bf16.msra.mxu0 %v6951_v45  ;;  %5082 = vmatpush1.bf16.msra.mxu1 %v6960_v58 }
 0x447   :  { %5052 = vmatprep.subr.bf16.mxu0 %v6973_v13  ;;  %5084 = vmatprep.subr.bf16.mxu1 %v6985_v12 }
 0x44a   :  { %5054 = vmatpush1.bf16.msra.mxu0 %v6987_v19  ;;  %5086 = vmatpush1.bf16.msra.mxu1 %v6999_v34 }
 0x44b   :  { %5056 = vmatprep.subr.bf16.mxu0 %v7011_v55  ;;  %5088 = vmatprep.subr.bf16.mxu1 %v7013_v62 }
 0x44e   :  { %5058 = vmatpush1.bf16.msra.mxu0 %v7025_v7  ;;  %5090 = vmatpush1.bf16.msra.mxu1 %v7038_v27 }
 0x44f   :  { %5060 = vmatprep.subr.bf16.mxu0 %v7040_v32  ;;  %5092 = vmatprep.subr.bf16.mxu1 %v7052_v63 }
 0x452   :  { %5062 = vmatpush1.bf16.msra.mxu0 %v7064_v6  ;;  %5094 = vmatpush1.bf16.msra.mxu1 %v7068_v8 }
 0x453   :  { %5096 = vmatprep.subr.bf16.mxu0 %v6748_v35  ;;  %5128 = vmatprep.subr.bf16.mxu1 %v6759_v50 }
 0x508   :  { %v1471_v16 = vpop.f32.mrb[8].mxu0  ;;  %v1542_v4 = vpop.f32.mrb[8].mxu1 }
 0x509   :  { %v5807_v14 = vadd.f32 %v1471_v16, %v6666_v26  ;;  %v1473_v17 = vpop.f32.mrb[9].mxu0  ;;  %v1544_v20 = vpop.f32.mrb[9].mxu1  ;;  %v5823_v18 = vadd.f32 %v1542_v4, %v6683_v51 }
 0x50a   :  { %v5808_v36 = vadd.f32 %v1473_v17, %v6670_v29  ;;  %v5824_v5 = vadd.f32 %v1544_v20, %v6677_v44 }
 0x50b   :  { %v4652_v49 = vmul.f32 -1.442695, %v5807_v14 }
 0x50c   :  { %v4653_v53 = vmul.f32 -1.442695, %v5808_v36  ;;  %v4654_v9 = vmul.f32 -1.442695, %v5824_v5 }
 0x50d   :  { %5992 = vpow2.f32 %v4652_v49 }
 0x50e   :  { %5994 = vpow2.f32 %v4653_v53 }
 0x50f   :  { %5996 = vpow2.f32 %v4654_v9 }
 0x510   :  { %5998 = vtanh.f32 %v5823_v18 }
 0x517   :  { %v5993_v35 = vpop.eup %5992 }
 0x518   :  { %v5995_v30 = vpop.eup %5994  ;;  %v1554_v50 = vadd.f32 1.0, %v5993_v35 }
 0x519   :  { %v1560_v42 = vadd.f32 1.0, %v5995_v30  ;;  %v5997_v39 = vpop.eup %5996 }
 0x51a   :  { %6000 = vrcp.f32 %v1554_v50  ;;  %v5999_v52 = vpop.eup %5998  ;;  %v1567_v14 = vadd.f32 1.0, %v5997_v39 }
 0x51b   :  { %6002 = vrcp.f32 %v1560_v42 }
 0x51c   :  { %6004 = vrcp.f32 %v1567_v14 }
 0x524   :  { %v6001_v38 = vpop.eup %6000 }
 0x525   :  { %v6003_v1 = vpop.eup %6002  ;;  %v1572_v16 = vmul.f32 %v6001_v38, %v5999_v52 }
 0x526   :  { %v1571_v17 = vmul.f32 %v6003_v1, %v7080_v43  ;;  %v6005_v4 = vpop.eup %6004 }
 0x528   :  { %v7126_v20 = vadd.f32 %v1572_v16, %v1571_v17 }
 0x52a   :  { %6006 = vtanh.f32 %v7126_v20 }
 0x534   :  { %v6007_v36 = vpop.eup %6006 }
 0x535   :  { %v7129_v49 = vmul.f32 %v6007_v36, %v6005_v4 }
 0x537   :  { %1715 = vmatmul.mubr.f32.vlgmr.msra.gmra.mrb[10].mxu0 %v7129_v49  ;;  %1786 = vmatmul.mubr.f32.vlgmr.msra.gmra.mrb[10].mxu1 %v7129_v49 }
 0x538   :  { %5098 = vmatpush1.bf16.msra.mxu0 %v6761_v54  ;;  %5130 = vmatpush1.bf16.msra.mxu1 %v6770_v37 }
 0x539   :  { %5100 = vmatprep.subr.bf16.mxu0 %v6784_v48  ;;  %5132 = vmatprep.subr.bf16.mxu1 %v6795_v59 }
 0x53a   :  { %1959 = vmatprep.mubr.f32.mxu0 %v6184_v3  ;;  %2030 = vmatprep.mubr.f32.mxu1 %v6184_v3 }
 0x53c   :  { %5102 = vmatpush1.bf16.msra.mxu0 %v6797_v61  ;;  %5134 = vmatpush1.bf16.msra.mxu1 %v6806_v2 }
 0x53d   :  { %5104 = vmatprep.subr.bf16.mxu0 %v6866_v24  ;;  %5136 = vmatprep.subr.bf16.mxu1 %v6877_v47 }
 0x540   :  { %5106 = vmatpush1.bf16.msra.mxu0 %v6879_v33  ;;  %5138 = vmatpush1.bf16.msra.mxu1 %v6888_v41 }
 0x541   :  { %5108 = vmatprep.subr.bf16.mxu0 %v6902_v56  ;;  %5140 = vmatprep.subr.bf16.mxu1 %v6913_v60 }
 0x544   :  { %5110 = vmatpush1.bf16.msra.mxu0 %v6915_v0  ;;  %5142 = vmatpush1.bf16.msra.mxu1 %v6924_v10 }
 0x545   :  { %5112 = vmatprep.subr.bf16.mxu0 %v6938_v23  ;;  %5144 = vmatprep.subr.bf16.mxu1 %v6949_v40 }
 0x548   :  { %5114 = vmatpush1.bf16.msra.mxu0 %v6951_v45  ;;  %5146 = vmatpush1.bf16.msra.mxu1 %v6960_v58 }
 0x549   :  { %5116 = vmatprep.subr.bf16.mxu0 %v6973_v13  ;;  %5148 = vmatprep.subr.bf16.mxu1 %v6985_v12 }
 0x54c   :  { %5118 = vmatpush1.bf16.msra.mxu0 %v6987_v19  ;;  %5150 = vmatpush1.bf16.msra.mxu1 %v6999_v34 }
 0x54d   :  { %5120 = vmatprep.subr.bf16.mxu0 %v7011_v55  ;;  %5152 = vmatprep.subr.bf16.mxu1 %v7013_v62 }
 0x550   :  { %5122 = vmatpush1.bf16.msra.mxu0 %v7025_v7  ;;  %5154 = vmatpush1.bf16.msra.mxu1 %v7038_v27 }
 0x551   :  { %5124 = vmatprep.subr.bf16.mxu0 %v7040_v32  ;;  %5156 = vmatprep.subr.bf16.mxu1 %v7052_v63 }
 0x554   :  { %5126 = vmatpush1.bf16.msra.mxu0 %v7064_v6  ;;  %5158 = vmatpush1.bf16.msra.mxu1 %v7068_v8 }
 0x60a   :  { %v1716_v54 = vpop.f32.mrb[10].mxu0  ;;  %v1787_v37 = vpop.f32.mrb[10].mxu1 }
 0x60b   :  { %v5809_v48 = vadd.f32 %v1716_v54, %v6666_v26  ;;  %v1718_v59 = vpop.f32.mrb[11].mxu0  ;;  %v1789_v61 = vpop.f32.mrb[11].mxu1  ;;  %v5825_v18 = vadd.f32 %v1787_v37, %v6683_v51 }
 0x60c   :  { %v5810_v2 = vadd.f32 %v1718_v59, %v6670_v29  ;;  %v5826_v5 = vadd.f32 %v1789_v61, %v6677_v44  ;;  %v2079_v59 = vld [vmem:[%s8376_s2 + $0x18] sm:$0xff] }
 0x60d   :  { %v4655_v43 = vmul.f32 -1.442695, %v5809_v48  ;;  %v2081_v48 = vld [vmem:[%s8376_s2 + $0x28] sm:$0xff] }
 0x60e   :  { %v4656_v53 = vmul.f32 -1.442695, %v5810_v2  ;;  %v4657_v9 = vmul.f32 -1.442695, %v5826_v5  ;;  %v2083_v2 = vld [vmem:[%s8376_s2 + $0x38] sm:$0xff] }
 0x60f   :  { %6008 = vpow2.f32 %v4655_v43  ;;  %v2076_v43 = vld [vmem:[%s8376_s2] sm:$0xff]  ;;  %v5191_v5 = vpack.c.bf16 %v2083_v2, %v2079_v59 }
 0x610   :  { %6010 = vpow2.f32 %v4656_v53  ;;  %v2080_v53 = vld [vmem:[%s8376_s2 + $0x20] sm:$0xff] }
 0x611   :  { %6012 = vpow2.f32 %v4657_v9  ;;  %v5161_v9 = vpack.c.bf16 %v2080_v53, %v2076_v43  ;;  %5192 = vmatprep.subr.bf16.mxu1 %v5191_v5  ;;  %v2323_v53 = vld [vmem:[%s8379_s4] sm:$0xff] }
 0x612   :  { %6014 = vtanh.f32 %v5825_v18  ;;  %v2078_v18 = vld [vmem:[%s8376_s2 + $0x10] sm:$0xff]  ;;  %v2327_v5 = vld [vmem:[%s8379_s4 + $0x20] sm:$0xff] }
 0x619   :  { %v6009_v35 = vpop.eup %6008 }
 0x61a   :  { %v6011_v30 = vpop.eup %6010  ;;  %v1799_v50 = vadd.f32 1.0, %v6009_v35  ;;  %v2082_v35 = vld [vmem:[%s8376_s2 + $0x30] sm:$0xff] }
 0x61b   :  { %v1805_v42 = vadd.f32 1.0, %v6011_v30  ;;  %v6013_v39 = vpop.eup %6012  ;;  %v5193_v30 = vpack.c.bf16 %v2082_v35, %v2078_v18  ;;  %v2332_v18 = vld [vmem:[%s8379_s4 + $0x48] sm:$0xff] }
 0x61c   :  { %6016 = vrcp.f32 %v1799_v50  ;;  %v6015_v52 = vpop.eup %6014  ;;  %v1812_v14 = vadd.f32 1.0, %v6013_v39  ;;  %v2085_v50 = vld [vmem:[%s8376_s2 + $0x48] sm:$0xff]  ;;  %v2087_v39 = vld [vmem:[%s8376_s2 + $0x58] sm:$0xff] }
 0x61d   :  { %6018 = vrcp.f32 %v1805_v42  ;;  %v2089_v42 = vld [vmem:[%s8376_s2 + $0x68] sm:$0xff] }
 0x61e   :  { %6020 = vrcp.f32 %v1812_v14  ;;  %v2336_v35 = vld [vmem:[%s8379_s4 + $0x68] sm:$0xff] }
 0x626   :  { %v6017_v38 = vpop.eup %6016 }
 0x627   :  { %v6019_v1 = vpop.eup %6018  ;;  %v1817_v16 = vmul.f32 %v6017_v38, %v6015_v52  ;;  %v5163_v52 = vpack.c.bf16 %v2089_v42, %v2085_v50  ;;  %v2091_v38 = vld [vmem:[%s8376_s2 + $0x78] sm:$0xff] }
 0x628   :  { %v1816_v17 = vmul.f32 %v6019_v1, %v7126_v20  ;;  %v6021_v36 = vpop.eup %6020  ;;  %v2077_v20 = vld [vmem:[%s8376_s2 + $0x8] sm:$0xff]  ;;  %v2084_v1 = vld [vmem:[%s8376_s2 + $0x40] sm:$0xff]  ;;  %v5195_v14 = vpack.c.bf16 %v2091_v38, %v2087_v39  ;;  %v2338_v50 = vld [vmem:[%s8379_s4 + $0x78] sm:$0xff] }
 0x629   :  { %v5159_v61 = vpack.c.bf16 %v2081_v48, %v2077_v20 }
 0x62a   :  { %v7170_v4 = vadd.f32 %v1817_v16, %v1816_v17  ;;  %v2088_v16 = vld [vmem:[%s8376_s2 + $0x60] sm:$0xff] }
 0x62b   :  { %5160 = vmatprep.subr.bf16.mxu0 %v5159_v61  ;;  %v5165_v17 = vpack.c.bf16 %v2088_v16, %v2084_v1  ;;  %v2331_v1 = vld [vmem:[%s8379_s4 + $0x40] sm:$0xff] }
 0x62c   :  { %6022 = vtanh.f32 %v7170_v4  ;;  %v2335_v16 = vld [vmem:[%s8379_s4 + $0x60] sm:$0xff] }
 0x636   :  { %v6023_v54 = vpop.eup %6022 }
 0x637   :  { %v7173_v37 = vmul.f32 %v6023_v54, %v6021_v36  ;;  %v2086_v36 = vld [vmem:[%s8376_s2 + $0x50] sm:$0xff] }
 0x638   :  { %v2090_v54 = vld [vmem:[%s8376_s2 + $0x70] sm:$0xff] }
 0x639   :  { %1960 = vmatmul.mubr.f32.vlgmr.msra.gmra.mrb[12].mxu0 %v7173_v37  ;;  %2031 = vmatmul.mubr.f32.vlgmr.msra.gmra.mrb[12].mxu1 %v7173_v37  ;;  %v5197_v20 = vpack.c.bf16 %v2090_v54, %v2086_v36  ;;  %v2333_v54 = vld [vmem:[%s8379_s4 + $0x50] sm:$0xff] }
 0x63a   :  { %2204 = vmatprep.mubr.f32.mxu0 %v6184_v3  ;;  %2275 = vmatprep.mubr.f32.mxu1 %v6184_v3 }
 0x63b   :  { %5162 = vmatpush1.bf16.msra.mxu0 %v5161_v9  ;;  %5194 = vmatpush1.bf16.msra.mxu1 %v5193_v30  ;;  %v2325_v9 = vld [vmem:[%s8379_s4 + $0x10] sm:$0xff]  ;;  %v2334_v30 = vld [vmem:[%s8379_s4 + $0x58] sm:$0xff] }
 0x63c   :  { %5164 = vmatprep.subr.bf16.mxu0 %v5163_v52  ;;  %5196 = vmatprep.subr.bf16.mxu1 %v5195_v14  ;;  %v5225_v52 = vpack.c.bf16 %v2327_v5, %v2323_v53  ;;  %v5259_v36 = vpack.c.bf16 %v2338_v50, %v2334_v30  ;;  %v2357_v30 = vld [vmem:[%s8379_s4 + $0x110] sm:$0xff] }
 0x63d   :  { %v2361_v50 = vld [vmem:[%s8379_s4 + $0x130] sm:$0xff] }
 0x63f   :  { %5166 = vmatpush1.bf16.msra.mxu0 %v5165_v17  ;;  %5198 = vmatpush1.bf16.msra.mxu1 %v5197_v20  ;;  %v5227_v17 = vpack.c.bf16 %v2336_v35, %v2332_v18  ;;  %v2337_v20 = vld [vmem:[%s8379_s4 + $0x70] sm:$0xff] }
 0x640   :  { %5168 = vmatprep.subr.bf16.mxu0 %v6866_v24  ;;  %5200 = vmatprep.subr.bf16.mxu1 %v6877_v47  ;;  %v2324_v24 = vld [vmem:[%s8379_s4 + $0x8] sm:$0xff] }
 0x641   :  { %v2328_v47 = vld [vmem:[%s8379_s4 + $0x28] sm:$0xff] }
 0x643   :  { %5170 = vmatpush1.bf16.msra.mxu0 %v6879_v33  ;;  %5202 = vmatpush1.bf16.msra.mxu1 %v6888_v41  ;;  %v2326_v33 = vld [vmem:[%s8379_s4 + $0x18] sm:$0xff] }
 0x644   :  { %5172 = vmatprep.subr.bf16.mxu0 %v6902_v56  ;;  %5204 = vmatprep.subr.bf16.mxu1 %v6913_v60  ;;  %v2330_v41 = vld [vmem:[%s8379_s4 + $0x38] sm:$0xff]  ;;  %v5223_v56 = vpack.c.bf16 %v2328_v47, %v2324_v24  ;;  %v2340_v24 = vld [vmem:[%s8379_s4 + $0x88] sm:$0xff] }
 0x645   :  { %v5255_v60 = vpack.c.bf16 %v2330_v41, %v2326_v33  ;;  %v2344_v47 = vld [vmem:[%s8379_s4 + $0xa8] sm:$0xff]  ;;  %v2342_v33 = vld [vmem:[%s8379_s4 + $0x98] sm:$0xff] }
 0x646   :  { %v2346_v41 = vld [vmem:[%s8379_s4 + $0xb8] sm:$0xff] }
 0x647   :  { %5174 = vmatpush1.bf16.msra.mxu0 %v6915_v0  ;;  %5206 = vmatpush1.bf16.msra.mxu1 %v6924_v10 }
 0x648   :  { %5176 = vmatprep.subr.bf16.mxu0 %v6938_v23  ;;  %5208 = vmatprep.subr.bf16.mxu1 %v6949_v40 }
 0x64b   :  { %5178 = vmatpush1.bf16.msra.mxu0 %v6951_v45  ;;  %5210 = vmatpush1.bf16.msra.mxu1 %v6960_v58 }
 0x64c   :  { %5180 = vmatprep.subr.bf16.mxu0 %v6973_v13  ;;  %5212 = vmatprep.subr.bf16.mxu1 %v6985_v12 }
 0x64f   :  { %5182 = vmatpush1.bf16.msra.mxu0 %v6987_v19  ;;  %5214 = vmatpush1.bf16.msra.mxu1 %v6999_v34 }
 0x650   :  { %5184 = vmatprep.subr.bf16.mxu0 %v7011_v55  ;;  %5216 = vmatprep.subr.bf16.mxu1 %v7013_v62 }
 0x653   :  { %5186 = vmatpush1.bf16.msra.mxu0 %v7025_v7  ;;  %5218 = vmatpush1.bf16.msra.mxu1 %v7038_v27 }
 0x654   :  { %5188 = vmatprep.subr.bf16.mxu0 %v7040_v32  ;;  %5220 = vmatprep.subr.bf16.mxu1 %v7052_v63 }
 0x657   :  { %5190 = vmatpush1.bf16.msra.mxu0 %v7064_v6  ;;  %5222 = vmatpush1.bf16.msra.mxu1 %v7068_v8 }
 0x658   :  { %5224 = vmatprep.subr.bf16.mxu0 %v5223_v56  ;;  %5256 = vmatprep.subr.bf16.mxu1 %v5255_v60  ;;  %v5229_v56 = vpack.c.bf16 %v2335_v16, %v2331_v1  ;;  %v5261_v60 = vpack.c.bf16 %v2337_v20, %v2333_v54  ;;  %v5273_v16 = vpack.c.bf16 %v2361_v50, %v2357_v30  ;;  %v2687_v30 = vld [vmem:[%s8380_s5 + $0x68] sm:$0xff]  ;;  %v2685_v50 = vld [vmem:[%s8380_s5 + $0x58] sm:$0xff] }
 0x70c   :  { %v1961_v0 = vpop.f32.mrb[12].mxu0  ;;  %v2032_v10 = vpop.f32.mrb[12].mxu1 }
 0x70d   :  { %v5811_v23 = vadd.f32 %v1961_v0, %v6666_v26  ;;  %v1963_v40 = vpop.f32.mrb[13].mxu0  ;;  %v2034_v45 = vpop.f32.mrb[13].mxu1  ;;  %v5827_v55 = vadd.f32 %v2032_v10, %v6683_v51  ;;  %v2339_v0 = vld [vmem:[%s8379_s4 + $0x80] sm:$0xff] }
 0x70e   :  { %v5812_v58 = vadd.f32 %v1963_v40, %v6670_v29  ;;  %v5828_v19 = vadd.f32 %v2034_v45, %v6677_v44  ;;  %v2343_v10 = vld [vmem:[%s8379_s4 + $0xa0] sm:$0xff]  ;;  %v5263_v40 = vpack.c.bf16 %v2346_v41, %v2342_v33  ;;  %v2341_v45 = vld [vmem:[%s8379_s4 + $0x90] sm:$0xff]  ;;  %v2372_v33 = vld [vmem:[%s8379_s4 + $0x188] sm:$0xff] }
 0x70f   :  { %v4658_v13 = vmul.f32 -1.442695, %v5811_v23  ;;  %v5231_v23 = vpack.c.bf16 %v2344_v47, %v2340_v24  ;;  %v2365_v24 = vld [vmem:[%s8379_s4 + $0x150] sm:$0xff]  ;;  %v2376_v41 = vld [vmem:[%s8379_s4 + $0x1a8] sm:$0xff] }
 0x710   :  { %v4659_v12 = vmul.f32 -1.442695, %v5812_v58  ;;  %v4660_v34 = vmul.f32 -1.442695, %v5828_v19  ;;  %v2345_v58 = vld [vmem:[%s8379_s4 + $0xb0] sm:$0xff]  ;;  %v2350_v19 = vld [vmem:[%s8379_s4 + $0xd8] sm:$0xff] }
 0x711   :  { %6024 = vpow2.f32 %v4658_v13  ;;  %v2348_v13 = vld [vmem:[%s8379_s4 + $0xc8] sm:$0xff]  ;;  %v2369_v47 = vld [vmem:[%s8379_s4 + $0x170] sm:$0xff] }
 0x712   :  { %6026 = vpow2.f32 %v4659_v12  ;;  %v2352_v12 = vld [vmem:[%s8379_s4 + $0xe8] sm:$0xff] }
 0x713   :  { %6028 = vpow2.f32 %v4660_v34  ;;  %v2354_v34 = vld [vmem:[%s8379_s4 + $0xf8] sm:$0xff] }
 0x714   :  { %6030 = vtanh.f32 %v5827_v55  ;;  %v5233_v55 = vpack.c.bf16 %v2343_v10, %v2339_v0  ;;  %v5277_v10 = vpack.c.bf16 %v2369_v47, %v2365_v24  ;;  %v2695_v24 = vld [vmem:[%s8380_s5 + $0xa8] sm:$0xff]  ;;  %v2693_v47 = vld [vmem:[%s8380_s5 + $0x98] sm:$0xff] }
 0x71b   :  { %v6025_v62 = vpop.eup %6024 }
 0x71c   :  { %v6027_v7 = vpop.eup %6026  ;;  %v2044_v27 = vadd.f32 1.0, %v6025_v62  ;;  %v5265_v62 = vpack.c.bf16 %v2345_v58, %v2341_v45  ;;  %v5247_v45 = vpack.c.bf16 %v2376_v41, %v2372_v33  ;;  %v2697_v41 = vld [vmem:[%s8380_s5 + $0xb8] sm:$0xff] }
 0x71d   :  { %v2050_v32 = vadd.f32 1.0, %v6027_v7  ;;  %v6029_v63 = vpop.eup %6028  ;;  %v2347_v7 = vld [vmem:[%s8379_s4 + $0xc0] sm:$0xff] }
 0x71e   :  { %6032 = vrcp.f32 %v2044_v27  ;;  %v6031_v6 = vpop.eup %6030  ;;  %v2057_v61 = vadd.f32 1.0, %v6029_v63  ;;  %v2351_v27 = vld [vmem:[%s8379_s4 + $0xe0] sm:$0xff]  ;;  %v5267_v63 = vpack.c.bf16 %v2354_v34, %v2350_v19  ;;  %v2380_v19 = vld [vmem:[%s8379_s4 + $0x1c8] sm:$0xff] }
 0x71f   :  { %6034 = vrcp.f32 %v2050_v32  ;;  %v5235_v32 = vpack.c.bf16 %v2352_v12, %v2348_v13  ;;  %v5237_v53 = vpack.c.bf16 %v2351_v27, %v2347_v7  ;;  %v2373_v13 = vld [vmem:[%s8379_s4 + $0x190] sm:$0xff]  ;;  %v2384_v34 = vld [vmem:[%s8379_s4 + $0x1e8] sm:$0xff] }
 0x720   :  { %6036 = vrcp.f32 %v2057_v61  ;;  %v2358_v61 = vld [vmem:[%s8379_s4 + $0x118] sm:$0xff]  ;;  %v2377_v12 = vld [vmem:[%s8379_s4 + $0x1b0] sm:$0xff] }
 0x721   :  { %v5281_v27 = vpack.c.bf16 %v2377_v12, %v2373_v13  ;;  %v2703_v13 = vld [vmem:[%s8380_s5 + $0xe8] sm:$0xff]  ;;  %v2701_v12 = vld [vmem:[%s8380_s5 + $0xd8] sm:$0xff] }
 0x728   :  { %v6033_v8 = vpop.eup %6032 }
 0x729   :  { %v6035_v48 = vpop.eup %6034  ;;  %v2062_v59 = vmul.f32 %v6033_v8, %v6031_v6  ;;  %v2349_v6 = vld [vmem:[%s8379_s4 + $0xd0] sm:$0xff] }
 0x72a   :  { %v2061_v2 = vmul.f32 %v6035_v48, %v7170_v4  ;;  %v2329_v4 = vld [vmem:[%s8379_s4 + $0x30] sm:$0xff]  ;;  %v6037_v42 = vpop.eup %6036  ;;  %v2356_v48 = vld [vmem:[%s8379_s4 + $0x108] sm:$0xff] }
 0x72b   :  { %v5257_v38 = vpack.c.bf16 %v2329_v4, %v2325_v9  ;;  %v2353_v8 = vld [vmem:[%s8379_s4 + $0xf0] sm:$0xff]  ;;  %v2355_v9 = vld [vmem:[%s8379_s4 + $0x100] sm:$0xff] }
 0x72c   :  { %v7268_v43 = vadd.f32 %v2062_v59, %v2061_v2  ;;  %v2360_v59 = vld [vmem:[%s8379_s4 + $0x128] sm:$0xff]  ;;  %v2362_v2 = vld [vmem:[%s8379_s4 + $0x138] sm:$0xff]  ;;  %v5269_v5 = vpack.c.bf16 %v2353_v8, %v2349_v6  ;;  %v2359_v4 = vld [vmem:[%s8379_s4 + $0x120] sm:$0xff] }
 0x72d   :  { %v5239_v18 = vpack.c.bf16 %v2360_v59, %v2356_v48  ;;  %v5271_v35 = vpack.c.bf16 %v2362_v2, %v2358_v61  ;;  %v5241_v1 = vpack.c.bf16 %v2359_v4, %v2355_v9  ;;  %v2383_v8 = vld [vmem:[%s8379_s4 + $0x1e0] sm:$0xff]  ;;  %v2381_v48 = vld [vmem:[%s8379_s4 + $0x1d0] sm:$0xff] }
 0x72e   :  { %6038 = vtanh.f32 %v7268_v43  ;;  %v2385_v59 = vld [vmem:[%s8379_s4 + $0x1f0] sm:$0xff] }
 0x72f   :  { %v5285_v2 = vpack.c.bf16 %v2385_v59, %v2381_v48  ;;  %v2676_v9 = vld [vmem:[%s8380_s5 + $0x10] sm:$0xff]  ;;  %v2711_v48 = vld [vmem:[%s8380_s5 + $0x128] sm:$0xff]  ;;  %v2709_v59 = vld [vmem:[%s8380_s5 + $0x118] sm:$0xff] }
 0x730   :  { %v2680_v4 = vld [vmem:[%s8380_s5 + $0x30] sm:$0xff] }
 0x738   :  { %v6039_v39 = vpop.eup %6038 }
 0x739   :  { %v7301_v14 = vmul.f32 %v6039_v39, %v6037_v42  ;;  %v2364_v42 = vld [vmem:[%s8379_s4 + $0x148] sm:$0xff] }
 0x73a   :  { %v2368_v39 = vld [vmem:[%s8379_s4 + $0x168] sm:$0xff] }
 0x73b   :  { %2205 = vmatmul.mubr.f32.vlgmr.msra.gmra.mrb[14].mxu0 %v7301_v14  ;;  %2276 = vmatmul.mubr.f32.vlgmr.msra.gmra.mrb[14].mxu1 %v7301_v14  ;;  %v5243_v54 = vpack.c.bf16 %v2368_v39, %v2364_v42  ;;  %v2689_v39 = vld [vmem:[%s8380_s5 + $0x78] sm:$0xff] }
 0x73c   :  { %5226 = vmatpush1.bf16.msra.mxu0 %v5225_v52  ;;  %5258 = vmatpush1.bf16.msra.mxu1 %v5257_v38  ;;  %v2366_v52 = vld [vmem:[%s8379_s4 + $0x158] sm:$0xff] }
 0x73d   :  { %5228 = vmatprep.subr.bf16.mxu0 %v5227_v17  ;;  %5260 = vmatprep.subr.bf16.mxu1 %v5259_v36  ;;  %v2370_v38 = vld [vmem:[%s8379_s4 + $0x178] sm:$0xff]  ;;  %v2363_v17 = vld [vmem:[%s8379_s4 + $0x140] sm:$0xff] }
 0x73e   :  { %2473 = vmatprep.mubr.f32.mxu0 %v6184_v3  ;;  %2586 = vmatprep.mubr.f32.mxu1 %v6184_v3  ;;  %v2367_v36 = vld [vmem:[%s8379_s4 + $0x160] sm:$0xff]  ;;  %v5275_v20 = vpack.c.bf16 %v2370_v38, %v2366_v52 }
 0x73f   :  { %v5245_v0 = vpack.c.bf16 %v2367_v36, %v2363_v17  ;;  %v2682_v52 = vld [vmem:[%s8380_s5 + $0x40] sm:$0xff]  ;;  %v2684_v17 = vld [vmem:[%s8380_s5 + $0x50] sm:$0xff] }
 0x740   :  { %5230 = vmatpush1.bf16.msra.mxu0 %v5229_v56  ;;  %5262 = vmatpush1.bf16.msra.mxu1 %v5261_v60  ;;  %v2374_v56 = vld [vmem:[%s8379_s4 + $0x198] sm:$0xff]  ;;  %v2686_v38 = vld [vmem:[%s8380_s5 + $0x60] sm:$0xff]  ;;  %v2688_v36 = vld [vmem:[%s8380_s5 + $0x70] sm:$0xff] }
 0x741   :  { %5232 = vmatprep.subr.bf16.mxu0 %v5231_v23  ;;  %5264 = vmatprep.subr.bf16.mxu1 %v5263_v40  ;;  %v2378_v60 = vld [vmem:[%s8379_s4 + $0x1b8] sm:$0xff]  ;;  %v2371_v23 = vld [vmem:[%s8379_s4 + $0x180] sm:$0xff] }
 0x742   :  { %v2375_v40 = vld [vmem:[%s8379_s4 + $0x1a0] sm:$0xff]  ;;  %v5279_v58 = vpack.c.bf16 %v2378_v60, %v2374_v56 }
 0x743   :  { %v5249_v7 = vpack.c.bf16 %v2375_v40, %v2371_v23  ;;  %v2690_v56 = vld [vmem:[%s8380_s5 + $0x80] sm:$0xff]  ;;  %v2692_v23 = vld [vmem:[%s8380_s5 + $0x90] sm:$0xff] }
 0x744   :  { %5234 = vmatpush1.bf16.msra.mxu0 %v5233_v55  ;;  %5266 = vmatpush1.bf16.msra.mxu1 %v5265_v62  ;;  %v2382_v55 = vld [vmem:[%s8379_s4 + $0x1d8] sm:$0xff]  ;;  %v2694_v60 = vld [vmem:[%s8380_s5 + $0xa0] sm:$0xff]  ;;  %v2696_v40 = vld [vmem:[%s8380_s5 + $0xb0] sm:$0xff] }
 0x745   :  { %5236 = vmatprep.subr.bf16.mxu0 %v5235_v32  ;;  %5268 = vmatprep.subr.bf16.mxu1 %v5267_v63  ;;  %v2386_v62 = vld [vmem:[%s8379_s4 + $0x1f8] sm:$0xff]  ;;  %v2379_v32 = vld [vmem:[%s8379_s4 + $0x1c0] sm:$0xff]  ;;  %v5251_v63 = vpack.c.bf16 %v2384_v34, %v2380_v19 }
 0x746   :  { %v5283_v6 = vpack.c.bf16 %v2386_v62, %v2382_v55  ;;  %v5253_v61 = vpack.c.bf16 %v2383_v8, %v2379_v32  ;;  %v2705_v34 = vld [vmem:[%s8380_s5 + $0xf8] sm:$0xff]  ;;  %v2698_v55 = vld [vmem:[%s8380_s5 + $0xc0] sm:$0xff]  ;;  %v2700_v32 = vld [vmem:[%s8380_s5 + $0xd0] sm:$0xff] }
 0x747   :  { %v2702_v62 = vld [vmem:[%s8380_s5 + $0xe0] sm:$0xff] }
 0x748   :  { %5238 = vmatpush1.bf16.msra.mxu0 %v5237_v53  ;;  %5270 = vmatpush1.bf16.msra.mxu1 %v5269_v5 }
 0x749   :  { %5240 = vmatprep.subr.bf16.mxu0 %v5239_v18  ;;  %5272 = vmatprep.subr.bf16.mxu1 %v5271_v35  ;;  %v7516_v18 = vpack.c.bf16 %v2680_v4, %v2676_v9  ;;  %v2683_v35 = vld [vmem:[%s8380_s5 + $0x48] sm:$0xff] }
 0x74a   :  { %v7530_v42 = vpack.c.bf16 %v2687_v30, %v2683_v35  ;;  %v2715_v9 = vld [vmem:[%s8380_s5 + $0x148] sm:$0xff] }
 0x74b   :  { %v2719_v4 = vld [vmem:[%s8380_s5 + $0x168] sm:$0xff] }
 0x74c   :  { %5242 = vmatpush1.bf16.msra.mxu0 %v5241_v1  ;;  %5274 = vmatpush1.bf16.msra.mxu1 %v5273_v16  ;;  %v7541_v1 = vpack.c.bf16 %v2689_v39, %v2685_v50  ;;  %v7543_v16 = vpack.c.bf16 %v2686_v38, %v2682_v52  ;;  %v7669_v30 = vpack.c.bf16 %v2719_v4, %v2715_v9  ;;  %v2717_v50 = vld [vmem:[%s8380_s5 + $0x158] sm:$0xff]  ;;  %v2714_v52 = vld [vmem:[%s8380_s5 + $0x140] sm:$0xff]  ;;  %v2732_v9 = vld [vmem:[%s8380_s5 + $0x1d0] sm:$0xff] }
 0x74d   :  { %5244 = vmatprep.subr.bf16.mxu0 %v5243_v54  ;;  %5276 = vmatprep.subr.bf16.mxu1 %v5275_v20  ;;  %v7552_v54 = vpack.c.bf16 %v2688_v36, %v2684_v17  ;;  %v2691_v20 = vld [vmem:[%s8380_s5 + $0x88] sm:$0xff]  ;;  %v2721_v39 = vld [vmem:[%s8380_s5 + $0x178] sm:$0xff]  ;;  %v2718_v17 = vld [vmem:[%s8380_s5 + $0x160] sm:$0xff] }
 0x74e   :  { %v7566_v33 = vpack.c.bf16 %v2695_v24, %v2691_v20  ;;  %v7680_v38 = vpack.c.bf16 %v2721_v39, %v2717_v50  ;;  %v2716_v36 = vld [vmem:[%s8380_s5 + $0x150] sm:$0xff]  ;;  %v7692_v24 = vpack.c.bf16 %v2718_v17, %v2714_v52 }
 0x74f   :  { %v2720_v20 = vld [vmem:[%s8380_s5 + $0x170] sm:$0xff] }
 0x750   :  { %5246 = vmatpush1.bf16.msra.mxu0 %v5245_v0  ;;  %5278 = vmatpush1.bf16.msra.mxu1 %v5277_v10  ;;  %v7577_v0 = vpack.c.bf16 %v2697_v41, %v2693_v47  ;;  %v7579_v10 = vpack.c.bf16 %v2694_v60, %v2690_v56  ;;  %v2723_v47 = vld [vmem:[%s8380_s5 + $0x188] sm:$0xff]  ;;  %v2725_v56 = vld [vmem:[%s8380_s5 + $0x198] sm:$0xff]  ;;  %v7705_v60 = vpack.c.bf16 %v2720_v20, %v2716_v36  ;;  %v2736_v4 = vld [vmem:[%s8380_s5 + $0x1f0] sm:$0xff] }
 0x751   :  { %5248 = vmatprep.subr.bf16.mxu0 %v5247_v45  ;;  %5280 = vmatprep.subr.bf16.mxu1 %v5279_v58  ;;  %v7588_v45 = vpack.c.bf16 %v2696_v40, %v2692_v23  ;;  %v2699_v58 = vld [vmem:[%s8380_s5 + $0xc8] sm:$0xff]  ;;  %v2729_v40 = vld [vmem:[%s8380_s5 + $0x1b8] sm:$0xff]  ;;  %v7768_v50 = vpack.c.bf16 %v2736_v4, %v2732_v9 }
 0x752   :  { %v7602_v19 = vpack.c.bf16 %v2703_v13, %v2699_v58  ;;  %v2727_v41 = vld [vmem:[%s8380_s5 + $0x1a8] sm:$0xff]  ;;  %v2722_v58 = vld [vmem:[%s8380_s5 + $0x180] sm:$0xff] }
 0x753   :  { %v7707_v23 = vpack.c.bf16 %v2727_v41, %v2723_v47  ;;  %v2726_v13 = vld [vmem:[%s8380_s5 + $0x1a0] sm:$0xff] }
 0x754   :  { %5250 = vmatpush1.bf16.msra.mxu0 %v5249_v7  ;;  %5282 = vmatpush1.bf16.msra.mxu1 %v5281_v27  ;;  %v7613_v7 = vpack.c.bf16 %v2705_v34, %v2701_v12  ;;  %v7615_v27 = vpack.c.bf16 %v2702_v62, %v2698_v55  ;;  %v7719_v12 = vpack.c.bf16 %v2729_v40, %v2725_v56  ;;  %v2724_v34 = vld [vmem:[%s8380_s5 + $0x190] sm:$0xff] }
 0x755   :  { %5252 = vmatprep.subr.bf16.mxu0 %v5251_v63  ;;  %5284 = vmatprep.subr.bf16.mxu1 %v5283_v6  ;;  %v2704_v63 = vld [vmem:[%s8380_s5 + $0xf0] sm:$0xff]  ;;  %v2707_v6 = vld [vmem:[%s8380_s5 + $0x108] sm:$0xff]  ;;  %v7728_v62 = vpack.c.bf16 %v2726_v13, %v2722_v58 }
 0x756   :  { %v7627_v8 = vpack.c.bf16 %v2704_v63, %v2700_v32  ;;  %v2728_v55 = vld [vmem:[%s8380_s5 + $0x1b0] sm:$0xff]  ;;  %v2731_v63 = vld [vmem:[%s8380_s5 + $0x1c8] sm:$0xff] }
 0x757   :  { %v7732_v32 = vpack.c.bf16 %v2728_v55, %v2724_v34 }
 0x758   :  { %5254 = vmatpush1.bf16.msra.mxu0 %v5253_v61  ;;  %5286 = vmatpush1.bf16.msra.mxu1 %v5285_v2  ;;  %v2713_v61 = vld [vmem:[%s8380_s5 + $0x138] sm:$0xff]  ;;  %v7640_v2 = vpack.c.bf16 %v2711_v48, %v2707_v6  ;;  %v2735_v6 = vld [vmem:[%s8380_s5 + $0x1e8] sm:$0xff] }
 0x759   :  { %v2733_v48 = vld [vmem:[%s8380_s5 + $0x1d8] sm:$0xff] }
 0x75b   :  { %2474 = vmatmul.mubr.f32.vlgmr.msra.gmra.mrb[16].mxu0 %v6689_v31  ;;  %2587 = vmatmul.mubr.f32.vlgmr.msra.gmra.mrb[16].mxu1 %v6689_v31  ;;  %v2675_v31 = vld [vmem:[%s8380_s5 + $0x8] sm:$0xff] }
 0x75c   :  { %2479 = vmatprep.mubr.f32.mxu0 %v6184_v3  ;;  %2592 = vmatprep.mubr.f32.mxu1 %v6184_v3 }
 0x75f   :  { %2480 = vmatmul.mubr.f32.gmra.mrb[18].mxu0 %v6733_v15  ;;  %2593 = vmatmul.mubr.f32.gmra.mrb[18].mxu1 %v6733_v15  ;;  %v2679_v15 = vld [vmem:[%s8380_s5 + $0x28] sm:$0xff] }
 0x760   :  { %2485 = vmatprep.mubr.f32.mxu0 %v6184_v3  ;;  %2598 = vmatprep.mubr.f32.mxu1 %v6184_v3 }
 0x763   :  { %2486 = vmatmul.mubr.f32.gmra.mrb[20].mxu0 %v6845_v11  ;;  %2599 = vmatmul.mubr.f32.gmra.mrb[20].mxu1 %v6845_v11  ;;  %v2677_v11 = vld [vmem:[%s8380_s5 + $0x18] sm:$0xff] }
 0x764   :  { %2491 = vmatprep.mubr.f32.mxu0 %v6184_v3  ;;  %2604 = vmatprep.mubr.f32.mxu1 %v6184_v3 }
 0x767   :  { %2492 = vmatmul.mubr.f32.gmra.mrb[22].mxu0 %v7083_v57  ;;  %2605 = vmatmul.mubr.f32.gmra.mrb[22].mxu1 %v7083_v57  ;;  %v7494_v57 = vpack.c.bf16 %v2679_v15, %v2675_v31  ;;  %v7642_v31 = vpack.c.bf16 %v2713_v61, %v2709_v59  ;;  %v2706_v15 = vld [vmem:[%s8380_s5 + $0x100] sm:$0xff]  ;;  %v7746_v59 = vpack.c.bf16 %v2735_v6, %v2731_v63  ;;  %v2737_v61 = vld [vmem:[%s8380_s5 + $0x1f8] sm:$0xff] }
 0x768   :  { %2497 = vmatprep.mubr.f32.mxu0 %v6184_v3  ;;  %2610 = vmatprep.mubr.f32.mxu1 %v6184_v3 }
 0x769   :  { %5288 = vmatprep.subr.bf16.mxu0 %v7494_v57 }
 0x76b   :  { %2498 = vmatmul.mubr.f32.gmra.mrb[24].mxu0 %v7129_v49  ;;  %2611 = vmatmul.mubr.f32.gmra.mrb[24].mxu1 %v7129_v49  ;;  %v2681_v49 = vld [vmem:[%s8380_s5 + $0x38] sm:$0xff] }
 0x76c   :  { %2503 = vmatprep.mubr.f32.mxu0 %v6184_v3  ;;  %2616 = vmatprep.mubr.f32.mxu1 %v6184_v3  ;;  %v7505_v53 = vpack.c.bf16 %v2681_v49, %v2677_v11  ;;  %v2710_v11 = vld [vmem:[%s8380_s5 + $0x120] sm:$0xff]  ;;  %v2708_v49 = vld [vmem:[%s8380_s5 + $0x110] sm:$0xff] }
 0x76e   :  { %5320 = vmatprep.subr.bf16.mxu1 %v7505_v53 }
 0x76f   :  { %2504 = vmatmul.mubr.f32.gmra.mrb[26].mxu0 %v7173_v37  ;;  %2617 = vmatmul.mubr.f32.gmra.mrb[26].mxu1 %v7173_v37  ;;  %v2674_v37 = vld [vmem:[%s8380_s5] sm:$0xff] }
 0x770   :  { %2509 = vmatprep.mubr.f32.mxu0 %v6184_v3  ;;  %2622 = vmatprep.mubr.f32.mxu1 %v6184_v3 }
 0x771   :  { %5322 = vmatpush1.bf16.msra.mxu1 %v7516_v18 }
 0x772   :  { %5324 = vmatprep.subr.bf16.mxu1 %v7541_v1 }
 0x773   :  { %2510 = vmatmul.mubr.f32.gmra.mrb[28].mxu0 %v7301_v14  ;;  %2623 = vmatmul.mubr.f32.gmra.mrb[28].mxu1 %v7301_v14  ;;  %v2678_v14 = vld [vmem:[%s8380_s5 + $0x20] sm:$0xff] }
 0x774   :  { %2515 = vmatprep.mubr.f32.mxu0 %v6184_v3  ;;  %2628 = vmatprep.mubr.f32.mxu1 %v6184_v3  ;;  %v7507_v5 = vpack.c.bf16 %v2678_v14, %v2674_v37  ;;  %v7654_v37 = vpack.c.bf16 %v2710_v11, %v2706_v15  ;;  %v2712_v14 = vld [vmem:[%s8380_s5 + $0x130] sm:$0xff]  ;;  %v2730_v15 = vld [vmem:[%s8380_s5 + $0x1c0] sm:$0xff] }
 0x775   :  { %5326 = vmatpush1.bf16.msra.mxu1 %v7552_v54  ;;  %v7667_v35 = vpack.c.bf16 %v2712_v14, %v2708_v49  ;;  %v2734_v11 = vld [vmem:[%s8380_s5 + $0x1e0] sm:$0xff]  ;;  %v7757_v49 = vpack.c.bf16 %v2737_v61, %v2733_v48 }
 0x776   :  { %5290 = vmatpush1.bf16.msra.mxu0 %v7507_v5  ;;  %5328 = vmatprep.subr.bf16.mxu1 %v7577_v0  ;;  %v7759_v14 = vpack.c.bf16 %v2734_v11, %v2730_v15 }
 0x777   :  { %5292 = vmatprep.subr.bf16.mxu0 %v7530_v42 }
 0x779   :  { %5330 = vmatpush1.bf16.msra.mxu1 %v7588_v45 }
 0x77a   :  { %5294 = vmatpush1.bf16.msra.mxu0 %v7543_v16  ;;  %5332 = vmatprep.subr.bf16.mxu1 %v7613_v7 }
 0x77b   :  { %5296 = vmatprep.subr.bf16.mxu0 %v7566_v33 }
 0x77d   :  { %5334 = vmatpush1.bf16.msra.mxu1 %v7627_v8 }
 0x77e   :  { %5298 = vmatpush1.bf16.msra.mxu0 %v7579_v10  ;;  %5336 = vmatprep.subr.bf16.mxu1 %v7642_v31 }
 0x77f   :  { %5300 = vmatprep.subr.bf16.mxu0 %v7602_v19 }
 0x781   :  { %5338 = vmatpush1.bf16.msra.mxu1 %v7667_v35 }
 0x782   :  { %5302 = vmatpush1.bf16.msra.mxu0 %v7615_v27  ;;  %5340 = vmatprep.subr.bf16.mxu1 %v7680_v38 }
 0x783   :  { %5304 = vmatprep.subr.bf16.mxu0 %v7640_v2 }
 0x785   :  { %5342 = vmatpush1.bf16.msra.mxu1 %v7705_v60 }
 0x786   :  { %5306 = vmatpush1.bf16.msra.mxu0 %v7654_v37  ;;  %5344 = vmatprep.subr.bf16.mxu1 %v7719_v12 }
 0x787   :  { %5308 = vmatprep.subr.bf16.mxu0 %v7669_v30 }
 0x789   :  { %5346 = vmatpush1.bf16.msra.mxu1 %v7732_v32 }
 0x78a   :  { %5310 = vmatpush1.bf16.msra.mxu0 %v7692_v24  ;;  %5348 = vmatprep.subr.bf16.mxu1 %v7757_v49 }
 0x78b   :  { %5312 = vmatprep.subr.bf16.mxu0 %v7707_v23 }
 0x78d   :  { %5350 = vmatpush1.bf16.msra.mxu1 %v7768_v50 }
 0x78e   :  { %5314 = vmatpush1.bf16.msra.mxu0 %v7728_v62  ;;  %5384 = vmatprep.subr.bf16.mxu1 %v7505_v53 }
 0x78f   :  { %5316 = vmatprep.subr.bf16.mxu0 %v7746_v59 }
 0x792   :  { %5318 = vmatpush1.bf16.msra.mxu0 %v7759_v14 }
 0x793   :  { %5352 = vmatprep.subr.bf16.mxu0 %v7494_v57 }
 0x80e   :  { %v2206_v39 = vpop.f32.mrb[14].mxu0  ;;  %v2277_v52 = vpop.f32.mrb[14].mxu1 }
 0x80f   :  { %v5813_v17 = vadd.f32 %v2206_v39, %v6666_v26  ;;  %v2208_v36 = vpop.f32.mrb[15].mxu0  ;;  %v2279_v20 = vpop.f32.mrb[15].mxu1  ;;  %v5829_v13 = vadd.f32 %v2277_v52, %v6683_v51 }
 0x810   :  { %v5814_v47 = vadd.f32 %v2208_v36, %v6670_v29  ;;  %v5830_v40 = vadd.f32 %v2279_v20, %v6677_v44 }
 0x811   :  { %v4661_v41 = vmul.f32 -1.442695, %v5813_v17 }
 0x812   :  { %v4662_v56 = vmul.f32 -1.442695, %v5814_v47  ;;  %v4663_v58 = vmul.f32 -1.442695, %v5830_v40 }
 0x813   :  { %6040 = vpow2.f32 %v4661_v41 }
 0x814   :  { %6042 = vpow2.f32 %v4662_v56 }
 0x815   :  { %6044 = vpow2.f32 %v4663_v58 }
 0x816   :  { %6046 = vtanh.f32 %v5829_v13 }
 0x81d   :  { %v6041_v34 = vpop.eup %6040 }
 0x81e   :  { %v6043_v55 = vpop.eup %6042  ;;  %v2289_v63 = vadd.f32 1.0, %v6041_v34 }
 0x81f   :  { %v2295_v6 = vadd.f32 1.0, %v6043_v55  ;;  %v6045_v26 = vpop.eup %6044 }
 0x820   :  { %6048 = vrcp.f32 %v2289_v63  ;;  %v6047_v48 = vpop.eup %6046  ;;  %v2302_v11 = vadd.f32 1.0, %v6045_v26 }
 0x821   :  { %6050 = vrcp.f32 %v2295_v6 }
 0x822   :  { %6052 = vrcp.f32 %v2302_v11 }
 0x82a   :  { %v6049_v29 = vpop.eup %6048 }
 0x82b   :  { %v6051_v61 = vpop.eup %6050  ;;  %v2307_v15 = vmul.f32 %v6049_v29, %v6047_v48 }
 0x82c   :  { %v2306_v9 = vmul.f32 %v6051_v61, %v7268_v43  ;;  %v6053_v51 = vpop.eup %6052  ;;  %v2387_v43 = vld [vmem:[%s8381_s6] sm:$0xf] }
 0x82d   :  { %v7823_v52 = vrot.slane %v2387_v43, %v54_v22  ;;  %v7827_v17 = vrot.slane %v2387_v43, %v58_v25  ;;  %v7833_v34 = vrot.slane %v2387_v43, %v66_v28  ;;  %v7838_v25 = vrot.slane %v2387_v43, %v62_v46 }
 0x82e   :  { %v2308_v44 = vadd.f32 %v2307_v15, %v2306_v9 }
 0x830   :  { %6054 = vtanh.f32 %v2308_v44 }
 0x83a   :  { %v6055_v4 = vpop.eup %6054 }
 0x83b   :  { %v2310_v39 = vmul.f32 %v6055_v4, %v6053_v51 }
 0x83d   :  { %2516 = vmatmul.mubr.f32.gmra.mrb[30].mxu0 %v2310_v39  ;;  %2629 = vmatmul.mubr.f32.gmra.mrb[30].mxu1 %v2310_v39 }
 0x83e   :  { %2802 = vmatprep.mubr.f32.mxu0 %v6184_v3  ;;  %2873 = vmatprep.mubr.f32.mxu1 %v6184_v3 }
 0x841   :  { %2803 = vmatmul.mubr.f32.vlgmr.msra.gmra.mrb[16].mxu0 %v6184_v3  ;;  %2874 = vmatmul.mubr.f32.vlgmr.msra.gmra.mrb[16].mxu1 %v6184_v3 }
 0x842   :  { %5354 = vmatpush1.bf16.msra.mxu0 %v7507_v5  ;;  %5386 = vmatpush1.bf16.msra.mxu1 %v7516_v18 }
 0x843   :  { %5356 = vmatprep.subr.bf16.mxu0 %v7530_v42  ;;  %5388 = vmatprep.subr.bf16.mxu1 %v7541_v1 }
 0x844   :  { %3045 = vmatprep.mubr.f32.mxu0 %v6184_v3  ;;  %3116 = vmatprep.mubr.f32.mxu1 %v6184_v3 }
 0x846   :  { %5358 = vmatpush1.bf16.msra.mxu0 %v7543_v16  ;;  %5390 = vmatpush1.bf16.msra.mxu1 %v7552_v54 }
 0x847   :  { %5360 = vmatprep.subr.bf16.mxu0 %v7566_v33  ;;  %5392 = vmatprep.subr.bf16.mxu1 %v7577_v0 }
 0x84a   :  { %5362 = vmatpush1.bf16.msra.mxu0 %v7579_v10  ;;  %5394 = vmatpush1.bf16.msra.mxu1 %v7588_v45 }
 0x84b   :  { %5364 = vmatprep.subr.bf16.mxu0 %v7602_v19  ;;  %5396 = vmatprep.subr.bf16.mxu1 %v7613_v7 }
 0x84e   :  { %5366 = vmatpush1.bf16.msra.mxu0 %v7615_v27  ;;  %5398 = vmatpush1.bf16.msra.mxu1 %v7627_v8 }
 0x84f   :  { %5368 = vmatprep.subr.bf16.mxu0 %v7640_v2  ;;  %5400 = vmatprep.subr.bf16.mxu1 %v7642_v31 }
 0x852   :  { %5370 = vmatpush1.bf16.msra.mxu0 %v7654_v37  ;;  %5402 = vmatpush1.bf16.msra.mxu1 %v7667_v35 }
 0x853   :  { %5372 = vmatprep.subr.bf16.mxu0 %v7669_v30  ;;  %5404 = vmatprep.subr.bf16.mxu1 %v7680_v38 }
 0x856   :  { %5374 = vmatpush1.bf16.msra.mxu0 %v7692_v24  ;;  %5406 = vmatpush1.bf16.msra.mxu1 %v7705_v60 }
 0x857   :  { %5376 = vmatprep.subr.bf16.mxu0 %v7707_v23  ;;  %5408 = vmatprep.subr.bf16.mxu1 %v7719_v12 }
 0x85a   :  { %5378 = vmatpush1.bf16.msra.mxu0 %v7728_v62  ;;  %5410 = vmatpush1.bf16.msra.mxu1 %v7732_v32 }
 0x85b   :  { %5380 = vmatprep.subr.bf16.mxu0 %v7746_v59  ;;  %5412 = vmatprep.subr.bf16.mxu1 %v7757_v49 }
 0x85e   :  { %5382 = vmatpush1.bf16.msra.mxu0 %v7759_v14  ;;  %5414 = vmatpush1.bf16.msra.mxu1 %v7768_v50 }
 0x85f   :  { %5416 = vmatprep.subr.bf16.mxu0 %v7494_v57  ;;  %5448 = vmatprep.subr.bf16.mxu1 %v7505_v53 }
 0x914   :  { %v2804_v36 = vpop.f32.mrb[16].mxu0  ;;  %v2875_v20 = vpop.f32.mrb[16].mxu1 }
 0x915   :  { %v5831_v47 = vadd.f32 %v2804_v36, %v7823_v52  ;;  %v2806_v41 = vpop.f32.mrb[17].mxu0  ;;  %v2877_v56 = vpop.f32.mrb[17].mxu1  ;;  %v5847_v63 = vadd.f32 %v2875_v20, %v7838_v25 }
 0x916   :  { %v5832_v40 = vadd.f32 %v2806_v41, %v7827_v17  ;;  %v5848_v22 = vadd.f32 %v2877_v56, %v7833_v34 }
 0x917   :  { %v4664_v58 = vmul.f32 -1.442695, %v5831_v47 }
 0x918   :  { %v4665_v13 = vmul.f32 -1.442695, %v5832_v40  ;;  %v4666_v55 = vmul.f32 -1.442695, %v5848_v22 }
 0x919   :  { %6056 = vpow2.f32 %v4664_v58 }
 0x91a   :  { %6058 = vpow2.f32 %v4665_v13 }
 0x91b   :  { %6060 = vpow2.f32 %v4666_v55 }
 0x91c   :  { %6062 = vtanh.f32 %v5847_v63 }
 0x923   :  { %v6057_v6 = vpop.eup %6056 }
 0x924   :  { %v6059_v26 = vpop.eup %6058  ;;  %v2887_v48 = vadd.f32 1.0, %v6057_v6 }
 0x925   :  { %v2893_v29 = vadd.f32 1.0, %v6059_v26  ;;  %v6061_v28 = vpop.eup %6060 }
 0x926   :  { %6064 = vrcp.f32 %v2887_v48  ;;  %v6063_v61 = vpop.eup %6062  ;;  %v2900_v44 = vadd.f32 1.0, %v6061_v28 }
 0x927   :  { %6066 = vrcp.f32 %v2893_v29 }
 0x928   :  { %6068 = vrcp.f32 %v2900_v44 }
 0x930   :  { %v6065_v15 = vpop.eup %6064 }
 0x931   :  { %v6067_v11 = vpop.eup %6066  ;;  %v2905_v9 = vmul.f32 %v6065_v15, %v6063_v61 }
 0x932   :  { %v2904_v21 = vmul.f32 0.0, %v6067_v11  ;;  %v6069_v51 = vpop.eup %6068 }
 0x934   :  { %v7841_v46 = vadd.f32 %v2905_v9, %v2904_v21 }
 0x936   :  { %6070 = vtanh.f32 %v7841_v46 }
 0x940   :  { %v6071_v4 = vpop.eup %6070 }
 0x941   :  { %v2908_v39 = vmul.f32 %v6071_v4, %v6069_v51  ;;  %v3649_v4 = vld [vmem:[%s8380_s5] sm:$0xff] }
 0x943   :  { %2911 = vst [vmem:[%s8382_s7] sm:$0xff] %v2908_v39  ;;  %3046 = vmatmul.mubr.f32.vlgmr.msra.gmra.mrb[18].mxu0 %v2908_v39  ;;  %3117 = vmatmul.mubr.f32.vlgmr.msra.gmra.mrb[18].mxu1 %v2908_v39  ;;  %v3653_v39 = vld [vmem:[%s8380_s5 + $0x20] sm:$0xff] }
 0x944   :  { %5418 = vmatpush1.bf16.msra.mxu0 %v7507_v5  ;;  %5450 = vmatpush1.bf16.msra.mxu1 %v7516_v18 }
 0x945   :  { %5420 = vmatprep.subr.bf16.mxu0 %v7530_v42  ;;  %5452 = vmatprep.subr.bf16.mxu1 %v7541_v1 }
 0x946   :  { %3289 = vmatprep.mubr.f32.mxu0 %v6184_v3  ;;  %3360 = vmatprep.mubr.f32.mxu1 %v6184_v3 }
 0x948   :  { %5422 = vmatpush1.bf16.msra.mxu0 %v7543_v16  ;;  %5454 = vmatpush1.bf16.msra.mxu1 %v7552_v54 }
 0x949   :  { %5424 = vmatprep.subr.bf16.mxu0 %v7566_v33  ;;  %5456 = vmatprep.subr.bf16.mxu1 %v7577_v0 }
 0x94c   :  { %5426 = vmatpush1.bf16.msra.mxu0 %v7579_v10  ;;  %5458 = vmatpush1.bf16.msra.mxu1 %v7588_v45 }
 0x94d   :  { %5428 = vmatprep.subr.bf16.mxu0 %v7602_v19  ;;  %5460 = vmatprep.subr.bf16.mxu1 %v7613_v7 }
 0x950   :  { %5430 = vmatpush1.bf16.msra.mxu0 %v7615_v27  ;;  %5462 = vmatpush1.bf16.msra.mxu1 %v7627_v8 }
 0x951   :  { %5432 = vmatprep.subr.bf16.mxu0 %v7640_v2  ;;  %5464 = vmatprep.subr.bf16.mxu1 %v7642_v31 }
 0x954   :  { %5434 = vmatpush1.bf16.msra.mxu0 %v7654_v37  ;;  %5466 = vmatpush1.bf16.msra.mxu1 %v7667_v35 }
 0x955   :  { %5436 = vmatprep.subr.bf16.mxu0 %v7669_v30  ;;  %5468 = vmatprep.subr.bf16.mxu1 %v7680_v38 }
 0x958   :  { %5438 = vmatpush1.bf16.msra.mxu0 %v7692_v24  ;;  %5470 = vmatpush1.bf16.msra.mxu1 %v7705_v60 }
 0x959   :  { %5440 = vmatprep.subr.bf16.mxu0 %v7707_v23  ;;  %5472 = vmatprep.subr.bf16.mxu1 %v7719_v12 }
 0x95c   :  { %5442 = vmatpush1.bf16.msra.mxu0 %v7728_v62  ;;  %5474 = vmatpush1.bf16.msra.mxu1 %v7732_v32 }
 0x95d   :  { %5444 = vmatprep.subr.bf16.mxu0 %v7746_v59  ;;  %5476 = vmatprep.subr.bf16.mxu1 %v7757_v49 }
 0x960   :  { %5446 = vmatpush1.bf16.msra.mxu0 %v7759_v14  ;;  %5478 = vmatpush1.bf16.msra.mxu1 %v7768_v50 }
 0x961   :  { %5480 = vmatprep.subr.bf16.mxu0 %v7494_v57  ;;  %5512 = vmatprep.subr.bf16.mxu1 %v7505_v53 }
 0xa16   :  { %v3047_v43 = vpop.f32.mrb[18].mxu0  ;;  %v3118_v36 = vpop.f32.mrb[18].mxu1 }
 0xa17   :  { %v5833_v20 = vadd.f32 %v3047_v43, %v7823_v52  ;;  %v3049_v47 = vpop.f32.mrb[19].mxu0  ;;  %v3120_v41 = vpop.f32.mrb[19].mxu1  ;;  %v5849_v55 = vadd.f32 %v3118_v36, %v7838_v25  ;;  %v7959_v36 = vpack.c.bf16 %v3653_v39, %v3649_v4  ;;  %v3692_v4 = vld [vmem:[%s8380_s5 + $0x158] sm:$0xff] }
 0xa18   :  { %v5834_v56 = vadd.f32 %v3049_v47, %v7827_v17  ;;  %v5850_v13 = vadd.f32 %v3120_v41, %v7833_v34  ;;  %v3655_v47 = vld [vmem:[%s8380_s5 + $0x30] sm:$0xff] }
 0xa19   :  { %v4667_v40 = vmul.f32 -1.442695, %v5833_v20  ;;  %v3651_v20 = vld [vmem:[%s8380_s5 + $0x10] sm:$0xff] }
 0xa1a   :  { %v4668_v58 = vmul.f32 -1.442695, %v5834_v56  ;;  %v4669_v22 = vmul.f32 -1.442695, %v5850_v13  ;;  %v7968_v41 = vpack.c.bf16 %v3655_v47, %v3651_v20  ;;  %v3658_v56 = vld [vmem:[%s8380_s5 + $0x48] sm:$0xff]  ;;  %v3696_v20 = vld [vmem:[%s8380_s5 + $0x178] sm:$0xff] }
 0xa1b   :  { %6072 = vpow2.f32 %v4667_v40  ;;  %v3662_v40 = vld [vmem:[%s8380_s5 + $0x68] sm:$0xff]  ;;  %v3689_v47 = vld [vmem:[%s8380_s5 + $0x140] sm:$0xff] }
 0xa1c   :  { %6074 = vpow2.f32 %v4668_v58  ;;  %v3660_v58 = vld [vmem:[%s8380_s5 + $0x58] sm:$0xff]  ;;  %v7982_v13 = vpack.c.bf16 %v3662_v40, %v3658_v56  ;;  %v3693_v56 = vld [vmem:[%s8380_s5 + $0x160] sm:$0xff]  ;;  %v8137_v40 = vpack.c.bf16 %v3696_v20, %v3692_v4 }
 0xa1d   :  { %6076 = vpow2.f32 %v4669_v22  ;;  %v3664_v22 = vld [vmem:[%s8380_s5 + $0x78] sm:$0xff] }
 0xa1e   :  { %6078 = vtanh.f32 %v5849_v55  ;;  %v3657_v55 = vld [vmem:[%s8380_s5 + $0x40] sm:$0xff] }
 0xa25   :  { %v6073_v57 = vpop.eup %6072 }
 0xa26   :  { %v6075_v63 = vpop.eup %6074  ;;  %v3130_v53 = vadd.f32 1.0, %v6073_v57  ;;  %v3661_v57 = vld [vmem:[%s8380_s5 + $0x60] sm:$0xff] }
 0xa27   :  { %v3136_v6 = vadd.f32 1.0, %v6075_v63  ;;  %v6077_v26 = vpop.eup %6076  ;;  %v7993_v63 = vpack.c.bf16 %v3664_v22, %v3660_v58  ;;  %v8139_v58 = vpack.c.bf16 %v3693_v56, %v3689_v47  ;;  %v3691_v22 = vld [vmem:[%s8380_s5 + $0x150] sm:$0xff] }
 0xa28   :  { %6080 = vrcp.f32 %v3130_v53  ;;  %v6079_v48 = vpop.eup %6078  ;;  %v3143_v15 = vadd.f32 1.0, %v6077_v26  ;;  %v7995_v53 = vpack.c.bf16 %v3661_v57, %v3657_v55  ;;  %v3663_v26 = vld [vmem:[%s8380_s5 + $0x70] sm:$0xff]  ;;  %v3698_v57 = vld [vmem:[%s8380_s5 + $0x188] sm:$0xff] }
 0xa29   :  { %6082 = vrcp.f32 %v3136_v6  ;;  %v3659_v6 = vld [vmem:[%s8380_s5 + $0x50] sm:$0xff] }
 0xa2a   :  { %6084 = vrcp.f32 %v3143_v15  ;;  %v3695_v55 = vld [vmem:[%s8380_s5 + $0x170] sm:$0xff] }
 0xa32   :  { %v6081_v29 = vpop.eup %6080 }
 0xa33   :  { %v6083_v28 = vpop.eup %6082  ;;  %v3148_v61 = vmul.f32 %v6081_v29, %v6079_v48  ;;  %v8004_v48 = vpack.c.bf16 %v3663_v26, %v3659_v6  ;;  %v3666_v29 = vld [vmem:[%s8380_s5 + $0x88] sm:$0xff]  ;;  %v8151_v6 = vpack.c.bf16 %v3695_v55, %v3691_v22 }
 0xa34   :  { %v3147_v11 = vmul.f32 %v6083_v28, %v7841_v46  ;;  %v6085_v44 = vpop.eup %6084  ;;  %v3656_v46 = vld [vmem:[%s8380_s5 + $0x38] sm:$0xff]  ;;  %v3670_v28 = vld [vmem:[%s8380_s5 + $0xa8] sm:$0xff] }
 0xa35   :  { %v8018_v15 = vpack.c.bf16 %v3670_v28, %v3666_v29  ;;  %v3702_v26 = vld [vmem:[%s8380_s5 + $0x1a8] sm:$0xff]  ;;  %v3700_v29 = vld [vmem:[%s8380_s5 + $0x198] sm:$0xff] }
 0xa36   :  { %v7886_v9 = vadd.f32 %v3148_v61, %v3147_v11  ;;  %v3668_v61 = vld [vmem:[%s8380_s5 + $0x98] sm:$0xff] }
 0xa37   :  { %v3672_v11 = vld [vmem:[%s8380_s5 + $0xb8] sm:$0xff] }
 0xa38   :  { %6086 = vtanh.f32 %v7886_v9  ;;  %v3704_v28 = vld [vmem:[%s8380_s5 + $0x1b8] sm:$0xff] }
 0xa42   :  { %v6087_v21 = vpop.eup %6086 }
 0xa43   :  { %v3151_v51 = vmul.f32 %v6087_v21, %v6085_v44  ;;  %v3669_v44 = vld [vmem:[%s8380_s5 + $0xa0] sm:$0xff]  ;;  %v8029_v21 = vpack.c.bf16 %v3672_v11, %v3668_v61  ;;  %v8163_v61 = vpack.c.bf16 %v3702_v26, %v3698_v57  ;;  %v8165_v11 = vpack.c.bf16 %v3704_v28, %v3700_v29 }
 0xa45   :  { %4670 = vst [vmem:[%s8382_s7 + $0x8] sm:$0xff] %v3151_v51  ;;  %3290 = vmatmul.mubr.f32.vlgmr.msra.gmra.mrb[20].mxu0 %v3151_v51  ;;  %3361 = vmatmul.mubr.f32.vlgmr.msra.gmra.mrb[20].mxu1 %v3151_v51 }
 0xa46   :  { %5482 = vmatpush1.bf16.msra.mxu0 %v7507_v5  ;;  %5514 = vmatpush1.bf16.msra.mxu1 %v7516_v18 }
 0xa47   :  { %5484 = vmatprep.subr.bf16.mxu0 %v7530_v42  ;;  %5516 = vmatprep.subr.bf16.mxu1 %v7541_v1 }
 0xa48   :  { %3533 = vmatprep.mubr.f32.mxu0 %v6184_v3  ;;  %3604 = vmatprep.mubr.f32.mxu1 %v6184_v3 }
 0xa4a   :  { %5486 = vmatpush1.bf16.msra.mxu0 %v7543_v16  ;;  %5518 = vmatpush1.bf16.msra.mxu1 %v7552_v54 }
 0xa4b   :  { %5488 = vmatprep.subr.bf16.mxu0 %v7566_v33  ;;  %5520 = vmatprep.subr.bf16.mxu1 %v7577_v0 }
 0xa4e   :  { %5490 = vmatpush1.bf16.msra.mxu0 %v7579_v10  ;;  %5522 = vmatpush1.bf16.msra.mxu1 %v7588_v45 }
 0xa4f   :  { %5492 = vmatprep.subr.bf16.mxu0 %v7602_v19  ;;  %5524 = vmatprep.subr.bf16.mxu1 %v7613_v7 }
 0xa52   :  { %5494 = vmatpush1.bf16.msra.mxu0 %v7615_v27  ;;  %5526 = vmatpush1.bf16.msra.mxu1 %v7627_v8 }
 0xa53   :  { %5496 = vmatprep.subr.bf16.mxu0 %v7640_v2  ;;  %5528 = vmatprep.subr.bf16.mxu1 %v7642_v31 }
 0xa56   :  { %5498 = vmatpush1.bf16.msra.mxu0 %v7654_v37  ;;  %5530 = vmatpush1.bf16.msra.mxu1 %v7667_v35 }
 0xa57   :  { %5500 = vmatprep.subr.bf16.mxu0 %v7669_v30  ;;  %5532 = vmatprep.subr.bf16.mxu1 %v7680_v38 }
 0xa5a   :  { %5502 = vmatpush1.bf16.msra.mxu0 %v7692_v24  ;;  %5534 = vmatpush1.bf16.msra.mxu1 %v7705_v60 }
 0xa5b   :  { %5504 = vmatprep.subr.bf16.mxu0 %v7707_v23  ;;  %5536 = vmatprep.subr.bf16.mxu1 %v7719_v12 }
 0xa5e   :  { %5506 = vmatpush1.bf16.msra.mxu0 %v7728_v62  ;;  %5538 = vmatpush1.bf16.msra.mxu1 %v7732_v32 }
 0xa5f   :  { %5508 = vmatprep.subr.bf16.mxu0 %v7746_v59  ;;  %5540 = vmatprep.subr.bf16.mxu1 %v7757_v49  ;;  %v3650_v59 = vld [vmem:[%s8380_s5 + $0x8] sm:$0xff] }
 0xa60   :  { %v3654_v49 = vld [vmem:[%s8380_s5 + $0x28] sm:$0xff] }
 0xa62   :  { %5510 = vmatpush1.bf16.msra.mxu0 %v7759_v14  ;;  %5542 = vmatpush1.bf16.msra.mxu1 %v7768_v50  ;;  %v3652_v14 = vld [vmem:[%s8380_s5 + $0x18] sm:$0xff]  ;;  %v7946_v50 = vpack.c.bf16 %v3654_v49, %v3650_v59  ;;  %v3687_v59 = vld [vmem:[%s8380_s5 + $0x130] sm:$0xff] }
 0xa63   :  { %v7957_v43 = vpack.c.bf16 %v3656_v46, %v3652_v14  ;;  %v3690_v14 = vld [vmem:[%s8380_s5 + $0x148] sm:$0xff] }
 0xa64   :  { %5544 = vmatprep.subr.bf16.mxu0 %v7946_v50  ;;  %v3694_v46 = vld [vmem:[%s8380_s5 + $0x168] sm:$0xff] }
 0xa65   :  { %5576 = vmatprep.subr.bf16.mxu1 %v7957_v43  ;;  %v8125_v39 = vpack.c.bf16 %v3694_v46, %v3690_v14 }
 0xb18   :  { %v3291_v5 = vpop.f32.mrb[20].mxu0  ;;  %v3362_v18 = vpop.f32.mrb[20].mxu1 }
 0xb19   :  { %v5835_v42 = vadd.f32 %v3291_v5, %v7823_v52  ;;  %v3293_v1 = vpop.f32.mrb[21].mxu0  ;;  %v3364_v16 = vpop.f32.mrb[21].mxu1  ;;  %v5851_v19 = vadd.f32 %v3362_v18, %v7838_v25  ;;  %v3667_v5 = vld [vmem:[%s8380_s5 + $0x90] sm:$0xff] }
 0xb1a   :  { %v5836_v54 = vadd.f32 %v3293_v1, %v7827_v17  ;;  %v5852_v10 = vadd.f32 %v3364_v16, %v7833_v34  ;;  %v3671_v18 = vld [vmem:[%s8380_s5 + $0xb0] sm:$0xff]  ;;  %v3674_v1 = vld [vmem:[%s8380_s5 + $0xc8] sm:$0xff] }
 0xb1b   :  { %v4671_v33 = vmul.f32 -1.442695, %v5835_v42  ;;  %v8040_v42 = vpack.c.bf16 %v3671_v18, %v3667_v5  ;;  %v3678_v16 = vld [vmem:[%s8380_s5 + $0xe8] sm:$0xff]  ;;  %v3699_v5 = vld [vmem:[%s8380_s5 + $0x190] sm:$0xff] }
 0xb1c   :  { %v4672_v0 = vmul.f32 -1.442695, %v5836_v54  ;;  %v4673_v45 = vmul.f32 -1.442695, %v5852_v10  ;;  %v3676_v54 = vld [vmem:[%s8380_s5 + $0xd8] sm:$0xff]  ;;  %v3673_v10 = vld [vmem:[%s8380_s5 + $0xc0] sm:$0xff] }
 0xb1d   :  { %6088 = vpow2.f32 %v4671_v33  ;;  %v8054_v33 = vpack.c.bf16 %v3678_v16, %v3674_v1  ;;  %v3703_v1 = vld [vmem:[%s8380_s5 + $0x1b0] sm:$0xff]  ;;  %v3706_v16 = vld [vmem:[%s8380_s5 + $0x1c8] sm:$0xff] }
 0xb1e   :  { %6090 = vpow2.f32 %v4672_v0  ;;  %v3680_v0 = vld [vmem:[%s8380_s5 + $0xf8] sm:$0xff] }
 0xb1f   :  { %6092 = vpow2.f32 %v4673_v45  ;;  %v3677_v45 = vld [vmem:[%s8380_s5 + $0xe0] sm:$0xff] }
 0xb20   :  { %6094 = vtanh.f32 %v5851_v19  ;;  %v8065_v19 = vpack.c.bf16 %v3680_v0, %v3676_v54  ;;  %v3710_v54 = vld [vmem:[%s8380_s5 + $0x1e8] sm:$0xff]  ;;  %v8190_v0 = vpack.c.bf16 %v3703_v1, %v3699_v5 }
 0xb27   :  { %v6089_v7 = vpop.eup %6088 }
 0xb28   :  { %v6091_v27 = vpop.eup %6090  ;;  %v3374_v8 = vadd.f32 1.0, %v6089_v7  ;;  %v8067_v7 = vpack.c.bf16 %v3677_v45, %v3673_v10  ;;  %v8192_v10 = vpack.c.bf16 %v3710_v54, %v3706_v16  ;;  %v3708_v45 = vld [vmem:[%s8380_s5 + $0x1d8] sm:$0xff] }
 0xb29   :  { %v3380_v2 = vadd.f32 1.0, %v6091_v27  ;;  %v6093_v31 = vpop.eup %6092  ;;  %v3675_v27 = vld [vmem:[%s8380_s5 + $0xd0] sm:$0xff] }
 0xb2a   :  { %6096 = vrcp.f32 %v3374_v8  ;;  %v6095_v37 = vpop.eup %6094  ;;  %v3387_v24 = vadd.f32 1.0, %v6093_v31  ;;  %v3679_v8 = vld [vmem:[%s8380_s5 + $0xf0] sm:$0xff]  ;;  %v3682_v31 = vld [vmem:[%s8380_s5 + $0x108] sm:$0xff] }
 0xb2b   :  { %6098 = vrcp.f32 %v3380_v2  ;;  %v8076_v2 = vpack.c.bf16 %v3679_v8, %v3675_v27  ;;  %v3712_v27 = vld [vmem:[%s8380_s5 + $0x1f8] sm:$0xff]  ;;  %v3705_v8 = vld [vmem:[%s8380_s5 + $0x1c0] sm:$0xff] }
 0xb2c   :  { %6100 = vrcp.f32 %v3387_v24  ;;  %v3681_v24 = vld [vmem:[%s8380_s5 + $0x100] sm:$0xff] }
 0xb34   :  { %v6097_v35 = vpop.eup %6096 }
 0xb35   :  { %v6099_v30 = vpop.eup %6098  ;;  %v3392_v38 = vmul.f32 %v6097_v35, %v6095_v37  ;;  %v3686_v37 = vld [vmem:[%s8380_s5 + $0x128] sm:$0xff]  ;;  %v3684_v35 = vld [vmem:[%s8380_s5 + $0x118] sm:$0xff] }
 0xb36   :  { %v3391_v60 = vmul.f32 %v6099_v30, %v7886_v9  ;;  %v6101_v12 = vpop.eup %6100  ;;  %v3665_v9 = vld [vmem:[%s8380_s5 + $0x80] sm:$0xff]  ;;  %v8090_v30 = vpack.c.bf16 %v3686_v37, %v3682_v31  ;;  %v8204_v31 = vpack.c.bf16 %v3712_v27, %v3708_v45 }
 0xb37   :  { %v8031_v51 = vpack.c.bf16 %v3669_v44, %v3665_v9  ;;  %v3697_v9 = vld [vmem:[%s8380_s5 + $0x180] sm:$0xff] }
 0xb38   :  { %v7929_v23 = vadd.f32 %v3392_v38, %v3391_v60  ;;  %v3688_v38 = vld [vmem:[%s8380_s5 + $0x138] sm:$0xff]  ;;  %v3685_v60 = vld [vmem:[%s8380_s5 + $0x120] sm:$0xff] }
 0xb39   :  { %v3701_v44 = vld [vmem:[%s8380_s5 + $0x1a0] sm:$0xff] }
 0xb3a   :  { %6102 = vtanh.f32 %v7929_v23  ;;  %v8177_v18 = vpack.c.bf16 %v3701_v44, %v3697_v9  ;;  %v3709_v37 = vld [vmem:[%s8380_s5 + $0x1e0] sm:$0xff] }
 0xb44   :  { %v6103_v62 = vpop.eup %6102 }
 0xb45   :  { %v3395_v32 = vmul.f32 %v6103_v62, %v6101_v12  ;;  %v8101_v12 = vpack.c.bf16 %v3688_v38, %v3684_v35  ;;  %v8103_v62 = vpack.c.bf16 %v3685_v60, %v3681_v24  ;;  %v3707_v35 = vld [vmem:[%s8380_s5 + $0x1d0] sm:$0xff]  ;;  %v8216_v24 = vpack.c.bf16 %v3709_v37, %v3705_v8 }
 0xb46   :  { %v3711_v38 = vld [vmem:[%s8380_s5 + $0x1f0] sm:$0xff] }
 0xb47   :  { %4674 = vst [vmem:[%s8382_s7 + $0x10] sm:$0xff] %v3395_v32  ;;  %3534 = vmatmul.mubr.f32.vlgmr.msra.gmra.mrb[22].mxu0 %v3395_v32  ;;  %3605 = vmatmul.mubr.f32.vlgmr.msra.gmra.mrb[22].mxu1 %v3395_v32  ;;  %v3683_v32 = vld [vmem:[%s8380_s5 + $0x110] sm:$0xff]  ;;  %v8220_v60 = vpack.c.bf16 %v3711_v38, %v3707_v35 }
 0xb48   :  { %3777 = vmatprep.mubr.f32.mxu0 %v6184_v3  ;;  %3848 = vmatprep.mubr.f32.mxu1 %v6184_v3  ;;  %v8112_v49 = vpack.c.bf16 %v3687_v59, %v3683_v32 }
 0xb49   :  { %5546 = vmatpush1.bf16.msra.mxu0 %v7959_v36  ;;  %5578 = vmatpush1.bf16.msra.mxu1 %v7968_v41 }
 0xb4a   :  { %5548 = vmatprep.subr.bf16.mxu0 %v7982_v13  ;;  %5580 = vmatprep.subr.bf16.mxu1 %v7993_v63 }
 0xb4d   :  { %5550 = vmatpush1.bf16.msra.mxu0 %v7995_v53  ;;  %5582 = vmatpush1.bf16.msra.mxu1 %v8004_v48 }
 0xb4e   :  { %5552 = vmatprep.subr.bf16.mxu0 %v8018_v15  ;;  %5584 = vmatprep.subr.bf16.mxu1 %v8029_v21 }
 0xb51   :  { %5554 = vmatpush1.bf16.msra.mxu0 %v8031_v51  ;;  %5586 = vmatpush1.bf16.msra.mxu1 %v8040_v42 }
 0xb52   :  { %5556 = vmatprep.subr.bf16.mxu0 %v8054_v33  ;;  %5588 = vmatprep.subr.bf16.mxu1 %v8065_v19 }
 0xb55   :  { %5558 = vmatpush1.bf16.msra.mxu0 %v8067_v7  ;;  %5590 = vmatpush1.bf16.msra.mxu1 %v8076_v2 }
 0xb56   :  { %5560 = vmatprep.subr.bf16.mxu0 %v8090_v30  ;;  %5592 = vmatprep.subr.bf16.mxu1 %v8101_v12 }
 0xb59   :  { %5562 = vmatpush1.bf16.msra.mxu0 %v8103_v62  ;;  %5594 = vmatpush1.bf16.msra.mxu1 %v8112_v49 }
 0xb5a   :  { %5564 = vmatprep.subr.bf16.mxu0 %v8125_v39  ;;  %5596 = vmatprep.subr.bf16.mxu1 %v8137_v40 }
 0xb5d   :  { %5566 = vmatpush1.bf16.msra.mxu0 %v8139_v58  ;;  %5598 = vmatpush1.bf16.msra.mxu1 %v8151_v6 }
 0xb5e   :  { %5568 = vmatprep.subr.bf16.mxu0 %v8163_v61  ;;  %5600 = vmatprep.subr.bf16.mxu1 %v8165_v11 }
 0xb61   :  { %5570 = vmatpush1.bf16.msra.mxu0 %v8177_v18  ;;  %5602 = vmatpush1.bf16.msra.mxu1 %v8190_v0 }
 0xb62   :  { %5572 = vmatprep.subr.bf16.mxu0 %v8192_v10  ;;  %5604 = vmatprep.subr.bf16.mxu1 %v8204_v31 }
 0xb65   :  { %5574 = vmatpush1.bf16.msra.mxu0 %v8216_v24  ;;  %5606 = vmatpush1.bf16.msra.mxu1 %v8220_v60 }
 0xb66   :  { %5608 = vmatprep.subr.bf16.mxu0 %v7946_v50  ;;  %5640 = vmatprep.subr.bf16.mxu1 %v7957_v43 }
 0xc1a   :  { %v3535_v32 = vpop.f32.mrb[22].mxu0  ;;  %v3606_v59 = vpop.f32.mrb[22].mxu1 }
 0xc1b   :  { %v5837_v14 = vadd.f32 %v3535_v32, %v7823_v52  ;;  %v3537_v46 = vpop.f32.mrb[23].mxu0  ;;  %v3608_v4 = vpop.f32.mrb[23].mxu1  ;;  %v5853_v57 = vadd.f32 %v3606_v59, %v7838_v25 }
 0xc1c   :  { %v5838_v20 = vadd.f32 %v3537_v46, %v7827_v17  ;;  %v5854_v22 = vadd.f32 %v3608_v4, %v7833_v34 }
 0xc1d   :  { %v4675_v47 = vmul.f32 -1.442695, %v5837_v14 }
 0xc1e   :  { %v4676_v56 = vmul.f32 -1.442695, %v5838_v20  ;;  %v4677_v55 = vmul.f32 -1.442695, %v5854_v22 }
 0xc1f   :  { %6104 = vpow2.f32 %v4675_v47 }
 0xc20   :  { %6106 = vpow2.f32 %v4676_v56 }
 0xc21   :  { %6108 = vpow2.f32 %v4677_v55 }
 0xc22   :  { %6110 = vtanh.f32 %v5853_v57 }
 0xc29   :  { %v6105_v26 = vpop.eup %6104 }
 0xc2a   :  { %v6107_v29 = vpop.eup %6106  ;;  %v3618_v28 = vadd.f32 1.0, %v6105_v26 }
 0xc2b   :  { %v3624_v9 = vadd.f32 1.0, %v6107_v29  ;;  %v6109_v44 = vpop.eup %6108 }
 0xc2c   :  { %6112 = vrcp.f32 %v3618_v28  ;;  %v6111_v5 = vpop.eup %6110  ;;  %v3631_v45 = vadd.f32 1.0, %v6109_v44 }
 0xc2d   :  { %6114 = vrcp.f32 %v3624_v9 }
 0xc2e   :  { %6116 = vrcp.f32 %v3631_v45 }
 0xc36   :  { %v6113_v1 = vpop.eup %6112 }
 0xc37   :  { %v6115_v16 = vpop.eup %6114  ;;  %v3636_v54 = vmul.f32 %v6113_v1, %v6111_v5 }
 0xc38   :  { %v3635_v27 = vmul.f32 %v6115_v16, %v7929_v23  ;;  %v6117_v37 = vpop.eup %6116 }
 0xc3a   :  { %v8232_v8 = vadd.f32 %v3636_v54, %v3635_v27 }
 0xc3c   :  { %6118 = vtanh.f32 %v8232_v8 }
 0xc46   :  { %v6119_v35 = vpop.eup %6118 }
 0xc47   :  { %v3639_v38 = vmul.f32 %v6119_v35, %v6117_v37 }
 0xc49   :  { %4678 = vst [vmem:[%s8382_s7 + $0x18] sm:$0xff] %v3639_v38  ;;  %3778 = vmatmul.mubr.f32.vlgmr.msra.gmra.mrb[24].mxu0 %v3639_v38  ;;  %3849 = vmatmul.mubr.f32.vlgmr.msra.gmra.mrb[24].mxu1 %v3639_v38 }
 0xc4a   :  { %5610 = vmatpush1.bf16.msra.mxu0 %v7959_v36  ;;  %5642 = vmatpush1.bf16.msra.mxu1 %v7968_v41 }
 0xc4b   :  { %5612 = vmatprep.subr.bf16.mxu0 %v7982_v13  ;;  %5644 = vmatprep.subr.bf16.mxu1 %v7993_v63 }
 0xc4c   :  { %4021 = vmatprep.mubr.f32.mxu0 %v6184_v3  ;;  %4092 = vmatprep.mubr.f32.mxu1 %v6184_v3 }
 0xc4e   :  { %5614 = vmatpush1.bf16.msra.mxu0 %v7995_v53  ;;  %5646 = vmatpush1.bf16.msra.mxu1 %v8004_v48 }
 0xc4f   :  { %5616 = vmatprep.subr.bf16.mxu0 %v8018_v15  ;;  %5648 = vmatprep.subr.bf16.mxu1 %v8029_v21 }
 0xc52   :  { %5618 = vmatpush1.bf16.msra.mxu0 %v8031_v51  ;;  %5650 = vmatpush1.bf16.msra.mxu1 %v8040_v42 }
 0xc53   :  { %5620 = vmatprep.subr.bf16.mxu0 %v8054_v33  ;;  %5652 = vmatprep.subr.bf16.mxu1 %v8065_v19 }
 0xc56   :  { %5622 = vmatpush1.bf16.msra.mxu0 %v8067_v7  ;;  %5654 = vmatpush1.bf16.msra.mxu1 %v8076_v2 }
 0xc57   :  { %5624 = vmatprep.subr.bf16.mxu0 %v8090_v30  ;;  %5656 = vmatprep.subr.bf16.mxu1 %v8101_v12 }
 0xc5a   :  { %5626 = vmatpush1.bf16.msra.mxu0 %v8103_v62  ;;  %5658 = vmatpush1.bf16.msra.mxu1 %v8112_v49 }
 0xc5b   :  { %5628 = vmatprep.subr.bf16.mxu0 %v8125_v39  ;;  %5660 = vmatprep.subr.bf16.mxu1 %v8137_v40 }
 0xc5e   :  { %5630 = vmatpush1.bf16.msra.mxu0 %v8139_v58  ;;  %5662 = vmatpush1.bf16.msra.mxu1 %v8151_v6 }
 0xc5f   :  { %5632 = vmatprep.subr.bf16.mxu0 %v8163_v61  ;;  %5664 = vmatprep.subr.bf16.mxu1 %v8165_v11 }
 0xc62   :  { %5634 = vmatpush1.bf16.msra.mxu0 %v8177_v18  ;;  %5666 = vmatpush1.bf16.msra.mxu1 %v8190_v0 }
 0xc63   :  { %5636 = vmatprep.subr.bf16.mxu0 %v8192_v10  ;;  %5668 = vmatprep.subr.bf16.mxu1 %v8204_v31 }
 0xc66   :  { %5638 = vmatpush1.bf16.msra.mxu0 %v8216_v24  ;;  %5670 = vmatpush1.bf16.msra.mxu1 %v8220_v60 }
 0xc67   :  { %5672 = vmatprep.subr.bf16.mxu0 %v7946_v50  ;;  %5704 = vmatprep.subr.bf16.mxu1 %v7957_v43 }
 0xd1c   :  { %v3779_v23 = vpop.f32.mrb[24].mxu0  ;;  %v3850_v32 = vpop.f32.mrb[24].mxu1 }
 0xd1d   :  { %v5839_v59 = vadd.f32 %v3779_v23, %v7823_v52  ;;  %v3781_v14 = vpop.f32.mrb[25].mxu0  ;;  %v3852_v46 = vpop.f32.mrb[25].mxu1  ;;  %v5855_v55 = vadd.f32 %v3850_v32, %v7838_v25 }
 0xd1e   :  { %v5840_v4 = vadd.f32 %v3781_v14, %v7827_v17  ;;  %v5856_v56 = vadd.f32 %v3852_v46, %v7833_v34 }
 0xd1f   :  { %v4679_v20 = vmul.f32 -1.442695, %v5839_v59 }
 0xd20   :  { %v4680_v47 = vmul.f32 -1.442695, %v5840_v4  ;;  %v4681_v22 = vmul.f32 -1.442695, %v5856_v56 }
 0xd21   :  { %6120 = vpow2.f32 %v4679_v20 }
 0xd22   :  { %6122 = vpow2.f32 %v4680_v47 }
 0xd23   :  { %6124 = vpow2.f32 %v4681_v22 }
 0xd24   :  { %6126 = vtanh.f32 %v5855_v55 }
 0xd2b   :  { %v6121_v57 = vpop.eup %6120 }
 0xd2c   :  { %v6123_v26 = vpop.eup %6122  ;;  %v3862_v29 = vadd.f32 1.0, %v6121_v57 }
 0xd2d   :  { %v3868_v28 = vadd.f32 1.0, %v6123_v26  ;;  %v6125_v9 = vpop.eup %6124 }
 0xd2e   :  { %6128 = vrcp.f32 %v3862_v29  ;;  %v6127_v44 = vpop.eup %6126  ;;  %v3875_v54 = vadd.f32 1.0, %v6125_v9 }
 0xd2f   :  { %6130 = vrcp.f32 %v3868_v28 }
 0xd30   :  { %6132 = vrcp.f32 %v3875_v54 }
 0xd38   :  { %v6129_v5 = vpop.eup %6128 }
 0xd39   :  { %v6131_v1 = vpop.eup %6130  ;;  %v3880_v16 = vmul.f32 %v6129_v5, %v6127_v44 }
 0xd3a   :  { %v3879_v45 = vmul.f32 %v6131_v1, %v8232_v8  ;;  %v6133_v37 = vpop.eup %6132 }
 0xd3c   :  { %v8277_v27 = vadd.f32 %v3880_v16, %v3879_v45 }
 0xd3e   :  { %6134 = vtanh.f32 %v8277_v27 }
 0xd48   :  { %v6135_v35 = vpop.eup %6134 }
 0xd49   :  { %v3883_v38 = vmul.f32 %v6135_v35, %v6133_v37 }
 0xd4b   :  { %4682 = vst [vmem:[%s8382_s7 + $0x20] sm:$0xff] %v3883_v38  ;;  %4022 = vmatmul.mubr.f32.vlgmr.msra.gmra.mrb[26].mxu0 %v3883_v38  ;;  %4093 = vmatmul.mubr.f32.vlgmr.msra.gmra.mrb[26].mxu1 %v3883_v38 }
 0xd4c   :  { %5674 = vmatpush1.bf16.msra.mxu0 %v7959_v36  ;;  %5706 = vmatpush1.bf16.msra.mxu1 %v7968_v41 }
 0xd4d   :  { %5676 = vmatprep.subr.bf16.mxu0 %v7982_v13  ;;  %5708 = vmatprep.subr.bf16.mxu1 %v7993_v63 }
 0xd4e   :  { %4265 = vmatprep.mubr.f32.mxu0 %v6184_v3  ;;  %4336 = vmatprep.mubr.f32.mxu1 %v6184_v3 }
 0xd50   :  { %5678 = vmatpush1.bf16.msra.mxu0 %v7995_v53  ;;  %5710 = vmatpush1.bf16.msra.mxu1 %v8004_v48 }
 0xd51   :  { %5680 = vmatprep.subr.bf16.mxu0 %v8018_v15  ;;  %5712 = vmatprep.subr.bf16.mxu1 %v8029_v21 }
 0xd54   :  { %5682 = vmatpush1.bf16.msra.mxu0 %v8031_v51  ;;  %5714 = vmatpush1.bf16.msra.mxu1 %v8040_v42 }
 0xd55   :  { %5684 = vmatprep.subr.bf16.mxu0 %v8054_v33  ;;  %5716 = vmatprep.subr.bf16.mxu1 %v8065_v19 }
 0xd58   :  { %5686 = vmatpush1.bf16.msra.mxu0 %v8067_v7  ;;  %5718 = vmatpush1.bf16.msra.mxu1 %v8076_v2 }
 0xd59   :  { %5688 = vmatprep.subr.bf16.mxu0 %v8090_v30  ;;  %5720 = vmatprep.subr.bf16.mxu1 %v8101_v12 }
 0xd5c   :  { %5690 = vmatpush1.bf16.msra.mxu0 %v8103_v62  ;;  %5722 = vmatpush1.bf16.msra.mxu1 %v8112_v49 }
 0xd5d   :  { %5692 = vmatprep.subr.bf16.mxu0 %v8125_v39  ;;  %5724 = vmatprep.subr.bf16.mxu1 %v8137_v40 }
 0xd60   :  { %5694 = vmatpush1.bf16.msra.mxu0 %v8139_v58  ;;  %5726 = vmatpush1.bf16.msra.mxu1 %v8151_v6 }
 0xd61   :  { %5696 = vmatprep.subr.bf16.mxu0 %v8163_v61  ;;  %5728 = vmatprep.subr.bf16.mxu1 %v8165_v11 }
 0xd64   :  { %5698 = vmatpush1.bf16.msra.mxu0 %v8177_v18  ;;  %5730 = vmatpush1.bf16.msra.mxu1 %v8190_v0 }
 0xd65   :  { %5700 = vmatprep.subr.bf16.mxu0 %v8192_v10  ;;  %5732 = vmatprep.subr.bf16.mxu1 %v8204_v31 }
 0xd68   :  { %5702 = vmatpush1.bf16.msra.mxu0 %v8216_v24  ;;  %5734 = vmatpush1.bf16.msra.mxu1 %v8220_v60 }
 0xd69   :  { %5736 = vmatprep.subr.bf16.mxu0 %v7946_v50  ;;  %5768 = vmatprep.subr.bf16.mxu1 %v7957_v43 }
 0xe1e   :  { %v4023_v8 = vpop.f32.mrb[26].mxu0  ;;  %v4094_v23 = vpop.f32.mrb[26].mxu1 }
 0xe1f   :  { %v5841_v32 = vadd.f32 %v4023_v8, %v7823_v52  ;;  %v4025_v59 = vpop.f32.mrb[27].mxu0  ;;  %v4096_v14 = vpop.f32.mrb[27].mxu1  ;;  %v5857_v22 = vadd.f32 %v4094_v23, %v7838_v25 }
 0xe20   :  { %v5842_v46 = vadd.f32 %v4025_v59, %v7827_v17  ;;  %v5858_v47 = vadd.f32 %v4096_v14, %v7833_v34 }
 0xe21   :  { %v4683_v4 = vmul.f32 -1.442695, %v5841_v32 }
 0xe22   :  { %v4684_v20 = vmul.f32 -1.442695, %v5842_v46  ;;  %v4685_v56 = vmul.f32 -1.442695, %v5858_v47 }
 0xe23   :  { %6136 = vpow2.f32 %v4683_v4 }
 0xe24   :  { %6138 = vpow2.f32 %v4684_v20 }
 0xe25   :  { %6140 = vpow2.f32 %v4685_v56 }
 0xe26   :  { %6142 = vtanh.f32 %v5857_v22 }
 0xe2d   :  { %v6137_v50 = vpop.eup %6136 }
 0xe2e   :  { %v6139_v55 = vpop.eup %6138  ;;  %v4106_v43 = vadd.f32 1.0, %v6137_v50 }
 0xe2f   :  { %v4112_v57 = vadd.f32 1.0, %v6139_v55  ;;  %v6141_v26 = vpop.eup %6140 }
 0xe30   :  { %6144 = vrcp.f32 %v4106_v43  ;;  %v6143_v29 = vpop.eup %6142  ;;  %v4119_v5 = vadd.f32 1.0, %v6141_v26 }
 0xe31   :  { %6146 = vrcp.f32 %v4112_v57 }
 0xe32   :  { %6148 = vrcp.f32 %v4119_v5 }
 0xe3a   :  { %v6145_v28 = vpop.eup %6144 }
 0xe3b   :  { %v6147_v9 = vpop.eup %6146  ;;  %v4124_v44 = vmul.f32 %v6145_v28, %v6143_v29 }
 0xe3c   :  { %v4123_v1 = vmul.f32 %v6147_v9, %v8277_v27  ;;  %v6149_v54 = vpop.eup %6148 }
 0xe3e   :  { %v8322_v16 = vadd.f32 %v4124_v44, %v4123_v1 }
 0xe40   :  { %6150 = vtanh.f32 %v8322_v16 }
 0xe4a   :  { %v6151_v45 = vpop.eup %6150 }
 0xe4b   :  { %v4127_v37 = vmul.f32 %v6151_v45, %v6149_v54 }
 0xe4d   :  { %4686 = vst [vmem:[%s8382_s7 + $0x28] sm:$0xff] %v4127_v37  ;;  %4266 = vmatmul.mubr.f32.vlgmr.msra.gmra.mrb[28].mxu0 %v4127_v37  ;;  %4337 = vmatmul.mubr.f32.vlgmr.msra.gmra.mrb[28].mxu1 %v4127_v37 }
 0xe4e   :  { %5738 = vmatpush1.bf16.msra.mxu0 %v7959_v36  ;;  %5770 = vmatpush1.bf16.msra.mxu1 %v7968_v41 }
 0xe4f   :  { %5740 = vmatprep.subr.bf16.mxu0 %v7982_v13  ;;  %5772 = vmatprep.subr.bf16.mxu1 %v7993_v63 }
 0xe50   :  { %4509 = vmatprep.mubr.f32.mxu0 %v6184_v3  ;;  %4580 = vmatprep.mubr.f32.mxu1 %v6184_v3 }
 0xe52   :  { %5742 = vmatpush1.bf16.msra.mxu0 %v7995_v53  ;;  %5774 = vmatpush1.bf16.msra.mxu1 %v8004_v48 }
 0xe53   :  { %5744 = vmatprep.subr.bf16.mxu0 %v8018_v15  ;;  %5776 = vmatprep.subr.bf16.mxu1 %v8029_v21 }
 0xe56   :  { %5746 = vmatpush1.bf16.msra.mxu0 %v8031_v51  ;;  %5778 = vmatpush1.bf16.msra.mxu1 %v8040_v42 }
 0xe57   :  { %5748 = vmatprep.subr.bf16.mxu0 %v8054_v33  ;;  %5780 = vmatprep.subr.bf16.mxu1 %v8065_v19 }
 0xe5a   :  { %5750 = vmatpush1.bf16.msra.mxu0 %v8067_v7  ;;  %5782 = vmatpush1.bf16.msra.mxu1 %v8076_v2 }
 0xe5b   :  { %5752 = vmatprep.subr.bf16.mxu0 %v8090_v30  ;;  %5784 = vmatprep.subr.bf16.mxu1 %v8101_v12 }
 0xe5e   :  { %5754 = vmatpush1.bf16.msra.mxu0 %v8103_v62  ;;  %5786 = vmatpush1.bf16.msra.mxu1 %v8112_v49 }
 0xe5f   :  { %5756 = vmatprep.subr.bf16.mxu0 %v8125_v39  ;;  %5788 = vmatprep.subr.bf16.mxu1 %v8137_v40 }
 0xe62   :  { %5758 = vmatpush1.bf16.msra.mxu0 %v8139_v58  ;;  %5790 = vmatpush1.bf16.msra.mxu1 %v8151_v6 }
 0xe63   :  { %5760 = vmatprep.subr.bf16.mxu0 %v8163_v61  ;;  %5792 = vmatprep.subr.bf16.mxu1 %v8165_v11 }
 0xe66   :  { %5762 = vmatpush1.bf16.msra.mxu0 %v8177_v18  ;;  %5794 = vmatpush1.bf16.msra.mxu1 %v8190_v0 }
 0xe67   :  { %5764 = vmatprep.subr.bf16.mxu0 %v8192_v10  ;;  %5796 = vmatprep.subr.bf16.mxu1 %v8204_v31 }
 0xe6a   :  { %5766 = vmatpush1.bf16.msra.mxu0 %v8216_v24  ;;  %5798 = vmatpush1.bf16.msra.mxu1 %v8220_v60 }
 0xf20   :  { %v4267_v3 = vpop.f32.mrb[28].mxu0  ;;  %v4338_v36 = vpop.f32.mrb[28].mxu1 }
 0xf21   :  { %v5843_v41 = vadd.f32 %v4267_v3, %v7823_v52  ;;  %v4269_v13 = vpop.f32.mrb[29].mxu0  ;;  %v4340_v63 = vpop.f32.mrb[29].mxu1  ;;  %v5859_v42 = vadd.f32 %v4338_v36, %v7838_v25 }
 0xf22   :  { %v5844_v53 = vadd.f32 %v4269_v13, %v7827_v17  ;;  %v5860_v21 = vadd.f32 %v4340_v63, %v7833_v34 }
 0xf23   :  { %v4687_v48 = vmul.f32 -1.442695, %v5843_v41 }
 0xf24   :  { %v4688_v15 = vmul.f32 -1.442695, %v5844_v53  ;;  %v4689_v51 = vmul.f32 -1.442695, %v5860_v21 }
 0xf25   :  { %6152 = vpow2.f32 %v4687_v48 }
 0xf26   :  { %6154 = vpow2.f32 %v4688_v15 }
 0xf27   :  { %6156 = vpow2.f32 %v4689_v51 }
 0xf28   :  { %6158 = vtanh.f32 %v5859_v42 }
 0xf2f   :  { %v6153_v33 = vpop.eup %6152 }
 0xf30   :  { %v6155_v19 = vpop.eup %6154  ;;  %v4350_v7 = vadd.f32 1.0, %v6153_v33 }
 0xf31   :  { %v4356_v2 = vadd.f32 1.0, %v6155_v19  ;;  %v6157_v30 = vpop.eup %6156 }
 0xf32   :  { %6160 = vrcp.f32 %v4350_v7  ;;  %v6159_v12 = vpop.eup %6158  ;;  %v4363_v40 = vadd.f32 1.0, %v6157_v30 }
 0xf33   :  { %6162 = vrcp.f32 %v4356_v2 }
 0xf34   :  { %6164 = vrcp.f32 %v4363_v40 }
 0xf3c   :  { %v6161_v62 = vpop.eup %6160 }
 0xf3d   :  { %v6163_v49 = vpop.eup %6162  ;;  %v4368_v39 = vmul.f32 %v6161_v62, %v6159_v12 }
 0xf3e   :  { %v4367_v58 = vmul.f32 %v6163_v49, %v8322_v16  ;;  %v6165_v61 = vpop.eup %6164 }
 0xf40   :  { %v4369_v6 = vadd.f32 %v4368_v39, %v4367_v58 }
 0xf42   :  { %6166 = vtanh.f32 %v4369_v6 }
 0xf4c   :  { %v6167_v11 = vpop.eup %6166 }
 0xf4d   :  { %v4371_v18 = vmul.f32 %v6167_v11, %v6165_v61 }
 0xf4f   :  { %4690 = vst [vmem:[%s8382_s7 + $0x30] sm:$0xff] %v4371_v18  ;;  %4510 = vmatmul.mubr.f32.vlgmr.msra.gmra.mrb[30].mxu0 %v4371_v18  ;;  %4581 = vmatmul.mubr.f32.vlgmr.msra.gmra.mrb[30].mxu1 %v4371_v18 }
0x1022   :  { %v4511_v0 = vpop.f32.mrb[30].mxu0  ;;  %v4582_v10 = vpop.f32.mrb[30].mxu1 }
0x1023   :  { %v5845_v31 = vadd.f32 %v4511_v0, %v7823_v52  ;;  %v4513_v24 = vpop.f32.mrb[31].mxu0  ;;  %v4584_v60 = vpop.f32.mrb[31].mxu1  ;;  %v5861_v32 = vadd.f32 %v4582_v10, %v7838_v25 }
0x1024   :  { %v5846_v27 = vadd.f32 %v4513_v24, %v7827_v17  ;;  %v5862_v8 = vadd.f32 %v4584_v60, %v7833_v34 }
0x1025   :  { %v4691_v35 = vmul.f32 -1.442695, %v5845_v31 }
0x1026   :  { %v4692_v38 = vmul.f32 -1.442695, %v5846_v27  ;;  %v4693_v23 = vmul.f32 -1.442695, %v5862_v8 }
0x1027   :  { %6168 = vpow2.f32 %v4691_v35 }
0x1028   :  { %6170 = vpow2.f32 %v4692_v38 }
0x1029   :  { %6172 = vpow2.f32 %v4693_v23 }
0x102a   :  { %6174 = vtanh.f32 %v5861_v32 }
0x1031   :  { %v6169_v59 = vpop.eup %6168 }
0x1032   :  { %v6171_v14 = vpop.eup %6170  ;;  %v4594_v46 = vadd.f32 1.0, %v6169_v59 }
0x1033   :  { %v4600_v4 = vadd.f32 1.0, %v6171_v14  ;;  %v6173_v52 = vpop.eup %6172 }
0x1034   :  { %6176 = vrcp.f32 %v4594_v46  ;;  %v6175_v20 = vpop.eup %6174  ;;  %v4607_v22 = vadd.f32 1.0, %v6173_v52 }
0x1035   :  { %6178 = vrcp.f32 %v4600_v4 }
0x1036   :  { %6180 = vrcp.f32 %v4607_v22 }
0x103e   :  { %v6177_v17 = vpop.eup %6176 }
0x103f   :  { %v6179_v47 = vpop.eup %6178  ;;  %v4612_v56 = vmul.f32 %v6177_v17, %v6175_v20 }
0x1040   :  { %v4611_v50 = vmul.f32 %v6179_v47, %v4369_v6  ;;  %v6181_v34 = vpop.eup %6180 }
0x1042   :  { %v4613_v55 = vadd.f32 %v4612_v56, %v4611_v50 }
0x1044   :  { %6182 = vtanh.f32 %v4613_v55 }
0x104e   :  { %v6183_v25 = vpop.eup %6182 }
0x104f   :  { %v4615_v43 = vmul.f32 %v6183_v25, %v6181_v34 }
0x1051   :  { %4694 = vst [vmem:[%s8382_s7 + $0x38] sm:$0xff] %v4615_v43 }

</bundles_post_ra>
